<compile_context>
chip_gen: v7x
topology: tpu7x:2x2x1
jax: 0.10.0
libtpu: 0.0.40
codegen_flags: <defaults>
</compile_context>

<pallas_src>
import jax
import jax.numpy as jnp
from jax.experimental import pallas as pl
from jax.experimental.pallas import tpu as pltpu


def _round_up(n, m):
    return ((n + m - 1) // m) * m


def _pad_gate_cols(w, Hp):
    """w: (K, 4*H) in PyTorch gate order i,f,g,o -> (K, 4*Hp), each gate zero-padded."""
    K, four_h = w.shape
    H = four_h // 4
    if H == Hp:
        return w
    w = w.reshape(K, 4, H)
    w = jnp.pad(w, ((0, 0), (0, 0), (0, Hp - H)))
    return w.reshape(K, 4 * Hp)


_BUFFERED1_SUPPORTED = None


def _buffered_one_supported():
    """One-time probe: does this build accept pipeline_mode=pl.Buffered(1)?

    The probe is isolated on a tiny dummy kernel, so a failure here can never
    mask a genuine error in the real LSTM kernel.
    """
    global _BUFFERED1_SUPPORTED
    if _BUFFERED1_SUPPORTED is not None:
        return _BUFFERED1_SUPPORTED

    def _probe_kernel(x_ref, w_ref, o_ref):
        o_ref[...] = x_ref[...] + w_ref[...]

    try:
        out = pl.pallas_call(
            _probe_kernel,
            grid=(2,),
            in_specs=[
                pl.BlockSpec((8, 128), lambda i: (i, 0)),
                pl.BlockSpec((8, 128), lambda i: (0, 0),
                             pipeline_mode=pl.Buffered(1)),
            ],
            out_specs=pl.BlockSpec((8, 128), lambda i: (i, 0)),
            out_shape=jax.ShapeDtypeStruct((16, 128), jnp.float32),
        )(jnp.zeros((16, 128), jnp.float32), jnp.ones((8, 128), jnp.float32))
        jax.block_until_ready(out)
        _BUFFERED1_SUPPORTED = True
    except Exception:   # probe only — real kernel errors are never swallowed
        _BUFFERED1_SUPPORTED = False
    return _BUFFERED1_SUPPORTED


def _tpu_caps():
    """(vmem_capacity_bytes, mxu_width, has_two_tensorcores) with safe defaults."""
    vmem_cap = 64 * 1024 * 1024        # conservative default (v7x per-TC VMEM)
    mxu = 128
    two_tc = False
    try:
        vmem_cap = int(pltpu.get_tpu_info().vmem_capacity_bytes)
    except Exception:
        pass
    try:
        kind = jax.devices()[0].device_kind.lower()
        if ("v6" in kind) or ("v7" in kind) or ("trillium" in kind):
            mxu = 256
        two_tc = "v7" in kind
    except Exception:
        pass
    return vmem_cap, mxu, two_tc


def _make_lstm_kernel(seq_len, n_sub, proj_group, masked):
    def kernel(x_ref, wih_ref, whh_ref, b_ref,
               out_ref, hN_ref, cN_ref,
               h_scr, c_scr):
        t_blk = pl.program_id(1)
        Bt, Tc, Ep = x_ref.shape
        Hp = h_scr.shape[1]
        Bs = Bt // n_sub

        @pl.when(t_blk == 0)
        def _init():
            h_scr[...] = jnp.zeros_like(h_scr)
            c_scr[...] = jnp.zeros_like(c_scr)

        wih = wih_ref[...]            # (Ep, 4Hp)  compute dtype (resident)
        whh = whh_ref[...]            # (Hp, 4Hp)  recurrent dtype (resident)
        bias = b_ref[...]             # (1, 4Hp)   f32 (resident)

        hs = [h_scr[s * Bs:(s + 1) * Bs, :] for s in range(n_sub)]
        cs = [c_scr[s * Bs:(s + 1) * Bs, :] for s in range(n_sub)]

        for grp in range(Tc // proj_group):
            t0 = grp * proj_group
            # Hoisted input projection for `proj_group` timesteps: one big-M
            # MXU matmul.  Only this group's f32 gates_x slab is live at a
            # time, bounding VMEM/vreg pressure across the unrolled chunk.
            xg = x_ref[:, t0:t0 + proj_group, :].reshape(Bt * proj_group, Ep)
            gxg = jnp.dot(xg, wih, preferred_element_type=jnp.float32)
            gxg = gxg.reshape(Bt, proj_group, 4 * Hp)

            for tl in range(proj_group):
                i = t0 + tl
                if masked:
                    valid = (t_blk * Tc + i) < seq_len
                # Issue the independent recurrent matmuls for all batch
                # sub-tiles first so their MXU/EUP latencies overlap (ILP).
                recs = [jnp.dot(hs[s].astype(whh.dtype), whh,
                                preferred_element_type=jnp.float32)
                        for s in range(n_sub)]
                for s in range(n_sub):
                    g = gxg[s * Bs:(s + 1) * Bs, tl, :] + recs[s] + bias
                    sig_if = jax.nn.sigmoid(g[:, :2 * Hp])      # fused i/f
                    i_g = sig_if[:, :Hp]
                    f_g = sig_if[:, Hp:]
                    g_g = jnp.tanh(g[:, 2 * Hp:3 * Hp])
                    o_g = jax.nn.sigmoid(g[:, 3 * Hp:])
                    c_new = f_g * cs[s] + i_g * g_g
                    h_new = o_g * jnp.tanh(c_new)
                    if masked:
                        # Padded timesteps must not touch the state: zero
                        # inputs would still corrupt h/c through the bias.
                        c_new = jnp.where(valid, c_new, cs[s])
                        h_new = jnp.where(valid, h_new, hs[s])
                    cs[s] = c_new
                    hs[s] = h_new
                    # Dense, unmasked (Bs sublane x Hp lane) store: the
                    # sequence output is time-major.
                    out_ref[i, s * Bs:(s + 1) * Bs, :] = h_new.astype(out_ref.dtype)

        for s in range(n_sub):
            h_scr[s * Bs:(s + 1) * Bs, :] = hs[s]
            c_scr[s * Bs:(s + 1) * Bs, :] = cs[s]

        @pl.when(t_blk == pl.num_programs(1) - 1)
        def _finalize():
            hN_ref[...] = h_scr[...].astype(hN_ref.dtype)
            cN_ref[...] = c_scr[...].astype(cN_ref.dtype)

    return kernel


def lstm_encoder_forward(encoder_embeds, w_ih, w_hh, b_ih, b_hh,
                         *, compute_dtype=jnp.bfloat16,
                         recurrent_dtype=jnp.float32):
    """Single-layer batch_first nn.LSTM forward pass.

    encoder_embeds: (B, S, E) f32
    w_ih: (4H, E), w_hh: (4H, H), b_ih / b_hh: (4H,)  (PyTorch gate order i,f,g,o)
    Returns (output (B,S,H) f32, (h_n (1,B,H) f32, c_n (1,B,H) f32)).
    """
    B, S, E = encoder_embeds.shape
    H = w_hh.shape[1]

    Hp = _round_up(H, 128)             # lane-aligned hidden (per gate)
    Ep = _round_up(E, 128)             # lane-aligned embedding

    single_w = _buffered_one_supported()
    vmem_cap, mxu_w, two_tc = _tpu_caps()
    budget = int(vmem_cap * 0.85)      # headroom for compiler-internal scratch

    cd = jnp.dtype(compute_dtype).itemsize
    # Huge f32 recurrent weights: fall back to the compute dtype so the
    # resident weights still fit comfortably in VMEM.
    if Hp * 4 * Hp * jnp.dtype(recurrent_dtype).itemsize > budget // 4:
        recurrent_dtype = compute_dtype
    rd = jnp.dtype(recurrent_dtype).itemsize

    def _proj_group(tc):
        return 16 if tc % 16 == 0 else tc

    def _est_vmem(bt, tc):
        wbuf = 1 if single_w else 2
        pg = _proj_group(tc)
        b = 2 * bt * tc * Ep * cd                                        # x block (dbl-buf)
        b += 2 * tc * bt * Hp * cd                                       # out block (dbl-buf)
        b += wbuf * (Ep * 4 * Hp * cd + Hp * 4 * Hp * rd + 4 * Hp * 4)   # resident weights
        b += 2 * 2 * bt * Hp * 4                                         # final h/c blocks
        b += 2 * bt * Hp * 4                                             # h/c scratch
        b += bt * pg * 4 * Hp * 4                                        # group gates_x (f32)
        b += 4 * bt * 4 * Hp * 4                                         # per-step temporaries
        b += 2 * 1024 * 1024                                             # misc headroom
        return b

    # --- tile selection driven by the per-generation VMEM budget -----------
    bt_cap = 256 if (mxu_w >= 256 and B >= 256) else 128
    bt_all = sorted({min(_round_up(B, 8), c) for c in (bt_cap, 128, 64, 32, 16, 8)},
                    reverse=True)
    tc_all = (32, 16, 8)

    Bt, Tc = bt_all[-1], 8
    for bt in bt_all:
        fits = [tc for tc in tc_all if _est_vmem(bt, tc) <= budget]
        if fits:
            # minimal sequence padding first, then the largest chunk
            Tc = min(fits, key=lambda tc: (_round_up(S, tc), -tc))
            Bt = bt
            break

    # v7x has two TensorCores: make sure the "parallel" batch axis has at
    # least two blocks so both cores get work.
    if two_tc and B >= 16:
        while _round_up(B, Bt) // Bt < 2 and Bt > 8:
            Bt = max(8, _round_up(Bt // 2, 8))

    Bp = _round_up(B, Bt)
    S_pad = _round_up(S, Tc)
    masked = S_pad != S
    n_sub = 2 if (Bt >= 16 and Bt % 16 == 0) else 1
    grid = (Bp // Bt, S_pad // Tc)
    vmem_limit = int(max(budget, 32 * 1024 * 1024))

    # --- parameters: transpose, per-gate pad to Hp, cast --------------------
    wih_t = _pad_gate_cols(jnp.transpose(w_ih), Hp)                        # (E, 4Hp)
    wih_t = jnp.pad(wih_t, ((0, Ep - E), (0, 0))).astype(compute_dtype)    # (Ep, 4Hp)
    whh_t = _pad_gate_cols(jnp.transpose(w_hh), Hp)                        # (H, 4Hp)
    whh_t = jnp.pad(whh_t, ((0, Hp - H), (0, 0))).astype(recurrent_dtype)  # (Hp, 4Hp)
    bias = _pad_gate_cols((b_ih + b_hh).reshape(1, 4 * H), Hp).astype(jnp.float32)

    x_p = jnp.pad(encoder_embeds,
                  ((0, Bp - B), (0, S_pad - S), (0, Ep - E))).astype(compute_dtype)

    def _resident(shape):
        if single_w:
            return pl.BlockSpec(shape, lambda b, t: (0, 0),
                                pipeline_mode=pl.Buffered(1))
        return pl.BlockSpec(shape, lambda b, t: (0, 0))

    kernel = _make_lstm_kernel(seq_len=S, n_sub=n_sub,
                               proj_group=_proj_group(Tc), masked=masked)

    grid_spec = pltpu.PrefetchScalarGridSpec(
        num_scalar_prefetch=0,
        grid=grid,
        in_specs=[
            pl.BlockSpec((Bt, Tc, Ep), lambda b, t: (b, t, 0)),    # x chunk
            _resident((Ep, 4 * Hp)),                               # W_ih^T
            _resident((Hp, 4 * Hp)),                               # W_hh^T
            _resident((1, 4 * Hp)),                                # bias
        ],
        out_specs=[
            pl.BlockSpec((Tc, Bt, Hp), lambda b, t: (t, b, 0)),    # seq out (time-major)
            pl.BlockSpec((Bt, Hp), lambda b, t: (b, 0)),           # final h
            pl.BlockSpec((Bt, Hp), lambda b, t: (b, 0)),           # final c
        ],
        scratch_shapes=[
            pltpu.VMEM((Bt, Hp), jnp.float32),                     # h state
            pltpu.VMEM((Bt, Hp), jnp.float32),                     # c state
        ],
    )

    out_tm, h_p, c_p = pl.pallas_call(
        kernel,
        grid_spec=grid_spec,
        out_shape=(
            jax.ShapeDtypeStruct((S_pad, Bp, Hp), compute_dtype),  # bf16 writeback
            jax.ShapeDtypeStruct((Bp, Hp), jnp.float32),
            jax.ShapeDtypeStruct((Bp, Hp), jnp.float32),
        ),
        compiler_params=pltpu.CompilerParams(
            dimension_semantics=("parallel", "arbitrary"),
            vmem_limit_bytes=vmem_limit,
        ),
    )(x_p, wih_t, whh_t, bias)

    # One fused slice + transpose + upcast back to PyTorch's batch-first f32 view.
    encoder_output = jnp.transpose(out_tm[:S, :B, :H], (1, 0, 2)).astype(jnp.float32)
    hidden = h_p[None, :B, :H]
    cell = c_p[None, :B, :H]
    return encoder_output, (hidden, cell)


def _reference_lstm(encoder_embeds, w_ih, w_hh, b_ih, b_hh,
                    compute_dtype=jnp.bfloat16, recurrent_dtype=jnp.float32):
    """Pure-JAX lax.scan reference mirroring the kernel's quantization choices."""
    B, S, E = encoder_embeds.shape
    H = w_hh.shape[1]

    def q(a, dt):
        return a.astype(dt).astype(jnp.float32)

    x_tm = jnp.transpose(q(encoder_embeds, compute_dtype), (1, 0, 2))   # (S, B, E)
    wih_t = q(w_ih, compute_dtype).T                                    # (E, 4H)
    whh_t = q(w_hh, recurrent_dtype).T                                  # (H, 4H)
    b = (b_ih + b_hh).astype(jnp.float32)

    def step(carry, x_t):
        h, c = carry
        gates = x_t @ wih_t + q(h, recurrent_dtype) @ whh_t + b
        i = jax.nn.sigmoid(gates[:, 0 * H:1 * H])
        f = jax.nn.sigmoid(gates[:, 1 * H:2 * H])
        g = jnp.tanh(gates[:, 2 * H:3 * H])
        o = jax.nn.sigmoid(gates[:, 3 * H:4 * H])
        c_new = f * c + i * g
        h_new = o * jnp.tanh(c_new)
        return (h_new, c_new), h_new

    init = (jnp.zeros((B, H), jnp.float32), jnp.zeros((B, H), jnp.float32))
    (h_last, c_last), outs = jax.lax.scan(step, init, x_tm)
    return jnp.transpose(outs, (1, 0, 2)), (h_last[None], c_last[None])


def _run_check(B, S, E, seed=0):
    H = E
    key = jax.random.PRNGKey(seed)
    k_x, k_wih, k_whh, k_bih, k_bhh = jax.random.split(key, 5)

    bound = 1.0 / jnp.sqrt(H)   # PyTorch default uniform(-1/sqrt(H), 1/sqrt(H))
    x = jax.random.normal(k_x, (B, S, E), dtype=jnp.float32)
    w_ih = jax.random.uniform(k_wih, (4 * H, E), minval=-bound, maxval=bound, dtype=jnp.float32)
    w_hh = jax.random.uniform(k_whh, (4 * H, H), minval=-bound, maxval=bound, dtype=jnp.float32)
    b_ih = jax.random.uniform(k_bih, (4 * H,), minval=-bound, maxval=bound, dtype=jnp.float32)
    b_hh = jax.random.uniform(k_bhh, (4 * H,), minval=-bound, maxval=bound, dtype=jnp.float32)

    out, (h_n, c_n) = lstm_encoder_forward(x, w_ih, w_hh, b_ih, b_hh)
    jax.block_until_ready((out, h_n, c_n))

    out_ref, (h_ref, c_ref) = _reference_lstm(x, w_ih, w_hh, b_ih, b_hh)
    assert out.shape == (B, S, H) and h_n.shape == (1, B, H) and c_n.shape == (1, B, H)
    assert jnp.allclose(out, out_ref, atol=1e-2, rtol=1e-2), "output mismatch"
    assert jnp.allclose(h_n, h_ref, atol=1e-2, rtol=1e-2), "hidden mismatch"
    assert jnp.allclose(c_n, c_ref, atol=1e-2, rtol=1e-2), "cell mismatch"


if __name__ == "__main__":
    # Small shapes consistent with the module: batch=2, seq=8, embedding_dim(=hidden)=32
    _run_check(B=2, S=8, E=32, seed=0)
    # Also exercise the sequence-padding + masked-timestep path (odd S).
    _run_check(B=2, S=5, E=32, seed=1)
    print("KERNEL_OK")
</pallas_src>

<mosaic_0001>
module attributes {stable_mosaic.version = 11 : i64} {
  func.func @_probe_kernel(%arg0: i32, %arg1: memref<8x128xf32, #tpu.memory_space<vmem>>, %arg2: memref<8x128xf32, #tpu.memory_space<vmem>>, %arg3: memref<8x128xf32, #tpu.memory_space<vmem>>) attributes {dimension_semantics = [#tpu.dimension_semantics<arbitrary>], iteration_bounds = array<i64: 2>, scalar_prefetch = 0 : i64, scratch_operands = 0 : i64, tpu.core_type = #tpu.core_type<tc>, window_params = [{transform_indices = @transform_0, window_bounds = array<i64: 8, 128>}, {pipeline_mode = #tpu.pipeline_mode<synchronous>, transform_indices = @transform_1, window_bounds = array<i64: 8, 128>}, {transform_indices = @transform_2, window_bounds = array<i64: 8, 128>}]} {
    %c0 = arith.constant 0 : index
    %c0_0 = arith.constant 0 : index
    %0 = vector.load %arg1[%c0, %c0_0] : memref<8x128xf32, #tpu.memory_space<vmem>>, vector<8x128xf32>
    %c0_1 = arith.constant 0 : index
    %c0_2 = arith.constant 0 : index
    %1 = vector.load %arg2[%c0_1, %c0_2] : memref<8x128xf32, #tpu.memory_space<vmem>>, vector<8x128xf32>
    %2 = arith.addf %0, %1 : vector<8x128xf32>
    %c0_3 = arith.constant 0 : index
    %c0_4 = arith.constant 0 : index
    %3 = vector.load %arg3[%c0_3, %c0_4] : memref<8x128xf32, #tpu.memory_space<vmem>>, vector<8x128xf32>
    tpu.vector_store %arg3[%c0_3, %c0_4], %2 {strides = array<i32>} : memref<8x128xf32, #tpu.memory_space<vmem>>, vector<8x128xf32>,
    return
  }
  func.func @transform_0(%arg0: i32) -> (i32, i32) {
    %c0_i32 = arith.constant 0 : i32
    %c0_i32_0 = arith.constant 0 : i32
    return %arg0, %c0_i32 : i32, i32
  }
  func.func @transform_1(%arg0: i32) -> (i32, i32) {
    %c0_i32 = arith.constant 0 : i32
    %c0_i32_0 = arith.constant 0 : i32
    %c0_i32_1 = arith.constant 0 : i32
    return %c0_i32, %c0_i32_0 : i32, i32
  }
  func.func @transform_2(%arg0: i32) -> (i32, i32) {
    %c0_i32 = arith.constant 0 : i32
    %c0_i32_0 = arith.constant 0 : i32
    return %arg0, %c0_i32 : i32, i32
  }
}

module attributes {stable_mosaic.version = 11 : i64} {
  func.func @kernel(%arg0: i32, %arg1: i32, %arg2: memref<8x8x128xbf16, #tpu.memory_space<vmem>>, %arg3: memref<128x512xbf16, #tpu.memory_space<vmem>>, %arg4: memref<128x512xf32, #tpu.memory_space<vmem>>, %arg5: memref<1x512xf32, #tpu.memory_space<vmem>>, %arg6: memref<8x8x128xbf16, #tpu.memory_space<vmem>>, %arg7: memref<8x128xf32, #tpu.memory_space<vmem>>, %arg8: memref<8x128xf32, #tpu.memory_space<vmem>>, %arg9: memref<8x128xf32, #tpu.memory_space<vmem>>, %arg10: memref<8x128xf32, #tpu.memory_space<vmem>>) attributes {dimension_semantics = [#tpu.dimension_semantics<parallel>, #tpu.dimension_semantics<arbitrary>], iteration_bounds = array<i64: 1, 1>, scalar_prefetch = 0 : i64, scratch_operands = 2 : i64, tpu.core_type = #tpu.core_type<tc>, window_params = [{transform_indices = @transform_0, window_bounds = array<i64: 8, 8, 128>}, {pipeline_mode = #tpu.pipeline_mode<synchronous>, transform_indices = @transform_1, window_bounds = array<i64: 128, 512>}, {pipeline_mode = #tpu.pipeline_mode<synchronous>, transform_indices = @transform_2, window_bounds = array<i64: 128, 512>}, {pipeline_mode = #tpu.pipeline_mode<synchronous>, transform_indices = @transform_3, window_bounds = array<i64: 1, 512>}, {transform_indices = @transform_4, window_bounds = array<i64: 8, 8, 128>}, {transform_indices = @transform_5, window_bounds = array<i64: 8, 128>}, {transform_indices = @transform_6, window_bounds = array<i64: 8, 128>}]} {
    %c0_i32 = arith.constant 0 : i32
    %0 = arith.cmpi eq, %arg1, %c0_i32 : i32
    %1 = arith.extui %0 : i1 to i32
    %c0_i32_0 = arith.constant 0 : i32
    %2 = arith.cmpi ne, %1, %c0_i32_0 : i32
    scf.if %2 {
      %cst_60 = arith.constant 0.000000e+00 : f32
      %265 = vector.broadcast %cst_60 : f32 to vector<8x128xf32>
      %c0_61 = arith.constant 0 : index
      %c0_62 = arith.constant 0 : index
      %266 = vector.load %arg9[%c0_61, %c0_62] : memref<8x128xf32, #tpu.memory_space<vmem>>, vector<8x128xf32>
      tpu.vector_store %arg9[%c0_61, %c0_62], %265 {strides = array<i32>} : memref<8x128xf32, #tpu.memory_space<vmem>>, vector<8x128xf32>,
      %cst_63 = arith.constant 0.000000e+00 : f32
      %267 = vector.broadcast %cst_63 : f32 to vector<8x128xf32>
      %c0_64 = arith.constant 0 : index
      %c0_65 = arith.constant 0 : index
      %268 = vector.load %arg10[%c0_64, %c0_65] : memref<8x128xf32, #tpu.memory_space<vmem>>, vector<8x128xf32>
      tpu.vector_store %arg10[%c0_64, %c0_65], %267 {strides = array<i32>} : memref<8x128xf32, #tpu.memory_space<vmem>>, vector<8x128xf32>,
    } else {
    }
    %c0 = arith.constant 0 : index
    %c0_1 = arith.constant 0 : index
    %3 = vector.load %arg3[%c0, %c0_1] : memref<128x512xbf16, #tpu.memory_space<vmem>>, vector<128x512xbf16>
    %c0_2 = arith.constant 0 : index
    %c0_3 = arith.constant 0 : index
    %4 = vector.load %arg4[%c0_2, %c0_3] : memref<128x512xf32, #tpu.memory_space<vmem>>, vector<128x512xf32>
    %c0_4 = arith.constant 0 : index
    %c0_5 = arith.constant 0 : index
    %5 = vector.load %arg5[%c0_4, %c0_5] : memref<1x512xf32, #tpu.memory_space<vmem>>, vector<1x512xf32>
    %c0_6 = arith.constant 0 : index
    %c0_7 = arith.constant 0 : index
    %6 = vector.load %arg9[%c0_6, %c0_7] : memref<8x128xf32, #tpu.memory_space<vmem>>, vector<8x128xf32>
    %c0_8 = arith.constant 0 : index
    %c0_9 = arith.constant 0 : index
    %7 = vector.load %arg10[%c0_8, %c0_9] : memref<8x128xf32, #tpu.memory_space<vmem>>, vector<8x128xf32>
    %c0_10 = arith.constant 0 : index
    %c0_11 = arith.constant 0 : index
    %c0_12 = arith.constant 0 : index
    %8 = vector.load %arg2[%c0_10, %c0_11, %c0_12] : memref<8x8x128xbf16, #tpu.memory_space<vmem>>, vector<8x8x128xbf16>
    %9 = vector.shape_cast %8 : vector<8x8x128xbf16> to vector<64x128xbf16>
    %cst = arith.constant dense<0.000000e+00> : vector<64x512xf32>
    %10 = tpu.matmul %9, %3, %cst {dimension_numbers = #tpu.dot_dimension_numbers<[1], [0], [0], [1], [0, 0, 1, 1], [], []>} : vector<64x128xbf16>, vector<128x512xbf16>, vector<64x512xf32> -> vector<64x512xf32>
    %11 = vector.shape_cast %10 : vector<64x512xf32> to vector<8x8x512xf32>
    %cst_13 = arith.constant dense<0.000000e+00> : vector<8x512xf32>
    %12 = tpu.matmul %6, %4, %cst_13 {dimension_numbers = #tpu.dot_dimension_numbers<[1], [0], [0], [1], [0, 0, 1, 1], [], []>} : vector<8x128xf32>, vector<128x512xf32>, vector<8x512xf32> -> vector<8x512xf32>
    %13 = vector.extract_strided_slice %11 {offsets = [0, 0, 0], sizes = [8, 1, 512], strides = [1, 1, 1]} : vector<8x8x512xf32> to vector<8x1x512xf32>
    %14 = vector.shape_cast %13 : vector<8x1x512xf32> to vector<8x512xf32>
    %15 = arith.addf %14, %12 : vector<8x512xf32>
    %16 = vector.broadcast %5 : vector<1x512xf32> to vector<8x512xf32>
    %17 = arith.addf %15, %16 : vector<8x512xf32>
    %18 = vector.extract_strided_slice %17 {offsets = [0, 0], sizes = [8, 256], strides = [1, 1]} : vector<8x512xf32> to vector<8x256xf32>
    %19 = arith.negf %18 : vector<8x256xf32>
    %20 = math.exp %19 : vector<8x256xf32>
    %cst_14 = arith.constant 1.000000e+00 : f32
    %21 = vector.broadcast %cst_14 : f32 to vector<8x256xf32>
    %22 = arith.addf %21, %20 : vector<8x256xf32>
    %23 = arith.divf %21, %22 : vector<8x256xf32>
    %24 = vector.extract_strided_slice %23 {offsets = [0, 0], sizes = [8, 128], strides = [1, 1]} : vector<8x256xf32> to vector<8x128xf32>
    %25 = vector.extract_strided_slice %23 {offsets = [0, 128], sizes = [8, 128], strides = [1, 1]} : vector<8x256xf32> to vector<8x128xf32>
    %26 = vector.extract_strided_slice %17 {offsets = [0, 256], sizes = [8, 128], strides = [1, 1]} : vector<8x512xf32> to vector<8x128xf32>
    %27 = math.tanh %26 : vector<8x128xf32>
    %28 = vector.extract_strided_slice %17 {offsets = [0, 384], sizes = [8, 128], strides = [1, 1]} : vector<8x512xf32> to vector<8x128xf32>
    %29 = arith.negf %28 : vector<8x128xf32>
    %30 = math.exp %29 : vector<8x128xf32>
    %cst_15 = arith.constant 1.000000e+00 : f32
    %31 = vector.broadcast %cst_15 : f32 to vector<8x128xf32>
    %32 = arith.addf %31, %30 : vector<8x128xf32>
    %33 = arith.divf %31, %32 : vector<8x128xf32>
    %34 = arith.mulf %25, %7 : vector<8x128xf32>
    %35 = arith.mulf %24, %27 : vector<8x128xf32>
    %36 = arith.addf %34, %35 : vector<8x128xf32>
    %37 = math.tanh %36 : vector<8x128xf32>
    %38 = arith.mulf %33, %37 : vector<8x128xf32>
    %39 = arith.truncf %38 : vector<8x128xf32> to vector<8x128xbf16>
    %c0_16 = arith.constant 0 : index
    %c0_17 = arith.constant 0 : index
    %c0_18 = arith.constant 0 : index
    %40 = vector.load %arg6[%c0_16, %c0_17, %c0_18] : memref<8x8x128xbf16, #tpu.memory_space<vmem>>, vector<1x8x128xbf16>
    %41 = vector.shape_cast %40 : vector<1x8x128xbf16> to vector<8x128xbf16>
    %42 = vector.shape_cast %39 : vector<8x128xbf16> to vector<1x8x128xbf16>
    tpu.vector_store %arg6[%c0_16, %c0_17, %c0_18], %42 {strides = array<i32>} : memref<8x8x128xbf16, #tpu.memory_space<vmem>>, vector<1x8x128xbf16>,
    %cst_19 = arith.constant dense<0.000000e+00> : vector<8x512xf32>
    %43 = tpu.matmul %38, %4, %cst_19 {dimension_numbers = #tpu.dot_dimension_numbers<[1], [0], [0], [1], [0, 0, 1, 1], [], []>} : vector<8x128xf32>, vector<128x512xf32>, vector<8x512xf32> -> vector<8x512xf32>
    %44 = vector.extract_strided_slice %11 {offsets = [0, 1, 0], sizes = [8, 1, 512], strides = [1, 1, 1]} : vector<8x8x512xf32> to vector<8x1x512xf32>
    %45 = vector.shape_cast %44 : vector<8x1x512xf32> to vector<8x512xf32>
    %46 = arith.addf %45, %43 : vector<8x512xf32>
    %47 = vector.broadcast %5 : vector<1x512xf32> to vector<8x512xf32>
    %48 = arith.addf %46, %47 : vector<8x512xf32>
    %49 = vector.extract_strided_slice %48 {offsets = [0, 0], sizes = [8, 256], strides = [1, 1]} : vector<8x512xf32> to vector<8x256xf32>
    %50 = arith.negf %49 : vector<8x256xf32>
    %51 = math.exp %50 : vector<8x256xf32>
    %cst_20 = arith.constant 1.000000e+00 : f32
    %52 = vector.broadcast %cst_20 : f32 to vector<8x256xf32>
    %53 = arith.addf %52, %51 : vector<8x256xf32>
    %54 = arith.divf %52, %53 : vector<8x256xf32>
    %55 = vector.extract_strided_slice %54 {offsets = [0, 0], sizes = [8, 128], strides = [1, 1]} : vector<8x256xf32> to vector<8x128xf32>
    %56 = vector.extract_strided_slice %54 {offsets = [0, 128], sizes = [8, 128], strides = [1, 1]} : vector<8x256xf32> to vector<8x128xf32>
    %57 = vector.extract_strided_slice %48 {offsets = [0, 256], sizes = [8, 128], strides = [1, 1]} : vector<8x512xf32> to vector<8x128xf32>
    %58 = math.tanh %57 : vector<8x128xf32>
    %59 = vector.extract_strided_slice %48 {offsets = [0, 384], sizes = [8, 128], strides = [1, 1]} : vector<8x512xf32> to vector<8x128xf32>
    %60 = arith.negf %59 : vector<8x128xf32>
    %61 = math.exp %60 : vector<8x128xf32>
    %cst_21 = arith.constant 1.000000e+00 : f32
    %62 = vector.broadcast %cst_21 : f32 to vector<8x128xf32>
    %63 = arith.addf %62, %61 : vector<8x128xf32>
    %64 = arith.divf %62, %63 : vector<8x128xf32>
    %65 = arith.mulf %56, %36 : vector<8x128xf32>
    %66 = arith.mulf %55, %58 : vector<8x128xf32>
    %67 = arith.addf %65, %66 : vector<8x128xf32>
    %68 = math.tanh %67 : vector<8x128xf32>
    %69 = arith.mulf %64, %68 : vector<8x128xf32>
    %70 = arith.truncf %69 : vector<8x128xf32> to vector<8x128xbf16>
    %c1 = arith.constant 1 : index
    %c0_22 = arith.constant 0 : index
    %c0_23 = arith.constant 0 : index
    %71 = vector.load %arg6[%c1, %c0_22, %c0_23] : memref<8x8x128xbf16, #tpu.memory_space<vmem>>, vector<1x8x128xbf16>
    %72 = vector.shape_cast %71 : vector<1x8x128xbf16> to vector<8x128xbf16>
    %73 = vector.shape_cast %70 : vector<8x128xbf16> to vector<1x8x128xbf16>
    tpu.vector_store %arg6[%c1, %c0_22, %c0_23], %73 {strides = array<i32>} : memref<8x8x128xbf16, #tpu.memory_space<vmem>>, vector<1x8x128xbf16>,
    %cst_24 = arith.constant dense<0.000000e+00> : vector<8x512xf32>
    %74 = tpu.matmul %69, %4, %cst_24 {dimension_numbers = #tpu.dot_dimension_numbers<[1], [0], [0], [1], [0, 0, 1, 1], [], []>} : vector<8x128xf32>, vector<128x512xf32>, vector<8x512xf32> -> vector<8x512xf32>
    %75 = vector.extract_strided_slice %11 {offsets = [0, 2, 0], sizes = [8, 1, 512], strides = [1, 1, 1]} : vector<8x8x512xf32> to vector<8x1x512xf32>
    %76 = vector.shape_cast %75 : vector<8x1x512xf32> to vector<8x512xf32>
    %77 = arith.addf %76, %74 : vector<8x512xf32>
    %78 = vector.broadcast %5 : vector<1x512xf32> to vector<8x512xf32>
    %79 = arith.addf %77, %78 : vector<8x512xf32>
    %80 = vector.extract_strided_slice %79 {offsets = [0, 0], sizes = [8, 256], strides = [1, 1]} : vector<8x512xf32> to vector<8x256xf32>
    %81 = arith.negf %80 : vector<8x256xf32>
    %82 = math.exp %81 : vector<8x256xf32>
    %cst_25 = arith.constant 1.000000e+00 : f32
    %83 = vector.broadcast %cst_25 : f32 to vector<8x256xf32>
    %84 = arith.addf %83, %82 : vector<8x256xf32>
    %85 = arith.divf %83, %84 : vector<8x256xf32>
    %86 = vector.extract_strided_slice %85 {offsets = [0, 0], sizes = [8, 128], strides = [1, 1]} : vector<8x256xf32> to vector<8x128xf32>
    %87 = vector.extract_strided_slice %85 {offsets = [0, 128], sizes = [8, 128], strides = [1, 1]} : vector<8x256xf32> to vector<8x128xf32>
    %88 = vector.extract_strided_slice %79 {offsets = [0, 256], sizes = [8, 128], strides = [1, 1]} : vector<8x512xf32> to vector<8x128xf32>
    %89 = math.tanh %88 : vector<8x128xf32>
    %90 = vector.extract_strided_slice %79 {offsets = [0, 384], sizes = [8, 128], strides = [1, 1]} : vector<8x512xf32> to vector<8x128xf32>
    %91 = arith.negf %90 : vector<8x128xf32>
    %92 = math.exp %91 : vector<8x128xf32>
    %cst_26 = arith.constant 1.000000e+00 : f32
    %93 = vector.broadcast %cst_26 : f32 to vector<8x128xf32>
    %94 = arith.addf %93, %92 : vector<8x128xf32>
    %95 = arith.divf %93, %94 : vector<8x128xf32>
    %96 = arith.mulf %87, %67 : vector<8x128xf32>
    %97 = arith.mulf %86, %89 : vector<8x128xf32>
    %98 = arith.addf %96, %97 : vector<8x128xf32>
    %99 = math.tanh %98 : vector<8x128xf32>
    %100 = arith.mulf %95, %99 : vector<8x128xf32>
    %101 = arith.truncf %100 : vector<8x128xf32> to vector<8x128xbf16>
    %c2 = arith.constant 2 : index
    %c0_27 = arith.constant 0 : index
    %c0_28 = arith.constant 0 : index
    %102 = vector.load %arg6[%c2, %c0_27, %c0_28] : memref<8x8x128xbf16, #tpu.memory_space<vmem>>, vector<1x8x128xbf16>
    %103 = vector.shape_cast %102 : vector<1x8x128xbf16> to vector<8x128xbf16>
    %104 = vector.shape_cast %101 : vector<8x128xbf16> to vector<1x8x128xbf16>
    tpu.vector_store %arg6[%c2, %c0_27, %c0_28], %104 {strides = array<i32>} : memref<8x8x128xbf16, #tpu.memory_space<vmem>>, vector<1x8x128xbf16>,
    %cst_29 = arith.constant dense<0.000000e+00> : vector<8x512xf32>
    %105 = tpu.matmul %100, %4, %cst_29 {dimension_numbers = #tpu.dot_dimension_numbers<[1], [0], [0], [1], [0, 0, 1, 1], [], []>} : vector<8x128xf32>, vector<128x512xf32>, vector<8x512xf32> -> vector<8x512xf32>
    %106 = vector.extract_strided_slice %11 {offsets = [0, 3, 0], sizes = [8, 1, 512], strides = [1, 1, 1]} : vector<8x8x512xf32> to vector<8x1x512xf32>
    %107 = vector.shape_cast %106 : vector<8x1x512xf32> to vector<8x512xf32>
    %108 = arith.addf %107, %105 : vector<8x512xf32>
    %109 = vector.broadcast %5 : vector<1x512xf32> to vector<8x512xf32>
    %110 = arith.addf %108, %109 : vector<8x512xf32>
    %111 = vector.extract_strided_slice %110 {offsets = [0, 0], sizes = [8, 256], strides = [1, 1]} : vector<8x512xf32> to vector<8x256xf32>
    %112 = arith.negf %111 : vector<8x256xf32>
    %113 = math.exp %112 : vector<8x256xf32>
    %cst_30 = arith.constant 1.000000e+00 : f32
    %114 = vector.broadcast %cst_30 : f32 to vector<8x256xf32>
    %115 = arith.addf %114, %113 : vector<8x256xf32>
    %116 = arith.divf %114, %115 : vector<8x256xf32>
    %117 = vector.extract_strided_slice %116 {offsets = [0, 0], sizes = [8, 128], strides = [1, 1]} : vector<8x256xf32> to vector<8x128xf32>
    %118 = vector.extract_strided_slice %116 {offsets = [0, 128], sizes = [8, 128], strides = [1, 1]} : vector<8x256xf32> to vector<8x128xf32>
    %119 = vector.extract_strided_slice %110 {offsets = [0, 256], sizes = [8, 128], strides = [1, 1]} : vector<8x512xf32> to vector<8x128xf32>
    %120 = math.tanh %119 : vector<8x128xf32>
    %121 = vector.extract_strided_slice %110 {offsets = [0, 384], sizes = [8, 128], strides = [1, 1]} : vector<8x512xf32> to vector<8x128xf32>
    %122 = arith.negf %121 : vector<8x128xf32>
    %123 = math.exp %122 : vector<8x128xf32>
    %cst_31 = arith.constant 1.000000e+00 : f32
    %124 = vector.broadcast %cst_31 : f32 to vector<8x128xf32>
    %125 = arith.addf %124, %123 : vector<8x128xf32>
    %126 = arith.divf %124, %125 : vector<8x128xf32>
    %127 = arith.mulf %118, %98 : vector<8x128xf32>
    %128 = arith.mulf %117, %120 : vector<8x128xf32>
    %129 = arith.addf %127, %128 : vector<8x128xf32>
    %130 = math.tanh %129 : vector<8x128xf32>
    %131 = arith.mulf %126, %130 : vector<8x128xf32>
    %132 = arith.truncf %131 : vector<8x128xf32> to vector<8x128xbf16>
    %c3 = arith.constant 3 : index
    %c0_32 = arith.constant 0 : index
    %c0_33 = arith.constant 0 : index
    %133 = vector.load %arg6[%c3, %c0_32, %c0_33] : memref<8x8x128xbf16, #tpu.memory_space<vmem>>, vector<1x8x128xbf16>
    %134 = vector.shape_cast %133 : vector<1x8x128xbf16> to vector<8x128xbf16>
    %135 = vector.shape_cast %132 : vector<8x128xbf16> to vector<1x8x128xbf16>
    tpu.vector_store %arg6[%c3, %c0_32, %c0_33], %135 {strides = array<i32>} : memref<8x8x128xbf16, #tpu.memory_space<vmem>>, vector<1x8x128xbf16>,
    %cst_34 = arith.constant dense<0.000000e+00> : vector<8x512xf32>
    %136 = tpu.matmul %131, %4, %cst_34 {dimension_numbers = #tpu.dot_dimension_numbers<[1], [0], [0], [1], [0, 0, 1, 1], [], []>} : vector<8x128xf32>, vector<128x512xf32>, vector<8x512xf32> -> vector<8x512xf32>
    %137 = vector.extract_strided_slice %11 {offsets = [0, 4, 0], sizes = [8, 1, 512], strides = [1, 1, 1]} : vector<8x8x512xf32> to vector<8x1x512xf32>
    %138 = vector.shape_cast %137 : vector<8x1x512xf32> to vector<8x512xf32>
    %139 = arith.addf %138, %136 : vector<8x512xf32>
    %140 = vector.broadcast %5 : vector<1x512xf32> to vector<8x512xf32>
    %141 = arith.addf %139, %140 : vector<8x512xf32>
    %142 = vector.extract_strided_slice %141 {offsets = [0, 0], sizes = [8, 256], strides = [1, 1]} : vector<8x512xf32> to vector<8x256xf32>
    %143 = arith.negf %142 : vector<8x256xf32>
    %144 = math.exp %143 : vector<8x256xf32>
    %cst_35 = arith.constant 1.000000e+00 : f32
    %145 = vector.broadcast %cst_35 : f32 to vector<8x256xf32>
    %146 = arith.addf %145, %144 : vector<8x256xf32>
    %147 = arith.divf %145, %146 : vector<8x256xf32>
    %148 = vector.extract_strided_slice %147 {offsets = [0, 0], sizes = [8, 128], strides = [1, 1]} : vector<8x256xf32> to vector<8x128xf32>
    %149 = vector.extract_strided_slice %147 {offsets = [0, 128], sizes = [8, 128], strides = [1, 1]} : vector<8x256xf32> to vector<8x128xf32>
    %150 = vector.extract_strided_slice %141 {offsets = [0, 256], sizes = [8, 128], strides = [1, 1]} : vector<8x512xf32> to vector<8x128xf32>
    %151 = math.tanh %150 : vector<8x128xf32>
    %152 = vector.extract_strided_slice %141 {offsets = [0, 384], sizes = [8, 128], strides = [1, 1]} : vector<8x512xf32> to vector<8x128xf32>
    %153 = arith.negf %152 : vector<8x128xf32>
    %154 = math.exp %153 : vector<8x128xf32>
    %cst_36 = arith.constant 1.000000e+00 : f32
    %155 = vector.broadcast %cst_36 : f32 to vector<8x128xf32>
    %156 = arith.addf %155, %154 : vector<8x128xf32>
    %157 = arith.divf %155, %156 : vector<8x128xf32>
    %158 = arith.mulf %149, %129 : vector<8x128xf32>
    %159 = arith.mulf %148, %151 : vector<8x128xf32>
    %160 = arith.addf %158, %159 : vector<8x128xf32>
    %161 = math.tanh %160 : vector<8x128xf32>
    %162 = arith.mulf %157, %161 : vector<8x128xf32>
    %163 = arith.truncf %162 : vector<8x128xf32> to vector<8x128xbf16>
    %c4 = arith.constant 4 : index
    %c0_37 = arith.constant 0 : index
    %c0_38 = arith.constant 0 : index
    %164 = vector.load %arg6[%c4, %c0_37, %c0_38] : memref<8x8x128xbf16, #tpu.memory_space<vmem>>, vector<1x8x128xbf16>
    %165 = vector.shape_cast %164 : vector<1x8x128xbf16> to vector<8x128xbf16>
    %166 = vector.shape_cast %163 : vector<8x128xbf16> to vector<1x8x128xbf16>
    tpu.vector_store %arg6[%c4, %c0_37, %c0_38], %166 {strides = array<i32>} : memref<8x8x128xbf16, #tpu.memory_space<vmem>>, vector<1x8x128xbf16>,
    %cst_39 = arith.constant dense<0.000000e+00> : vector<8x512xf32>
    %167 = tpu.matmul %162, %4, %cst_39 {dimension_numbers = #tpu.dot_dimension_numbers<[1], [0], [0], [1], [0, 0, 1, 1], [], []>} : vector<8x128xf32>, vector<128x512xf32>, vector<8x512xf32> -> vector<8x512xf32>
    %168 = vector.extract_strided_slice %11 {offsets = [0, 5, 0], sizes = [8, 1, 512], strides = [1, 1, 1]} : vector<8x8x512xf32> to vector<8x1x512xf32>
    %169 = vector.shape_cast %168 : vector<8x1x512xf32> to vector<8x512xf32>
    %170 = arith.addf %169, %167 : vector<8x512xf32>
    %171 = vector.broadcast %5 : vector<1x512xf32> to vector<8x512xf32>
    %172 = arith.addf %170, %171 : vector<8x512xf32>
    %173 = vector.extract_strided_slice %172 {offsets = [0, 0], sizes = [8, 256], strides = [1, 1]} : vector<8x512xf32> to vector<8x256xf32>
    %174 = arith.negf %173 : vector<8x256xf32>
    %175 = math.exp %174 : vector<8x256xf32>
    %cst_40 = arith.constant 1.000000e+00 : f32
    %176 = vector.broadcast %cst_40 : f32 to vector<8x256xf32>
    %177 = arith.addf %176, %175 : vector<8x256xf32>
    %178 = arith.divf %176, %177 : vector<8x256xf32>
    %179 = vector.extract_strided_slice %178 {offsets = [0, 0], sizes = [8, 128], strides = [1, 1]} : vector<8x256xf32> to vector<8x128xf32>
    %180 = vector.extract_strided_slice %178 {offsets = [0, 128], sizes = [8, 128], strides = [1, 1]} : vector<8x256xf32> to vector<8x128xf32>
    %181 = vector.extract_strided_slice %172 {offsets = [0, 256], sizes = [8, 128], strides = [1, 1]} : vector<8x512xf32> to vector<8x128xf32>
    %182 = math.tanh %181 : vector<8x128xf32>
    %183 = vector.extract_strided_slice %172 {offsets = [0, 384], sizes = [8, 128], strides = [1, 1]} : vector<8x512xf32> to vector<8x128xf32>
    %184 = arith.negf %183 : vector<8x128xf32>
    %185 = math.exp %184 : vector<8x128xf32>
    %cst_41 = arith.constant 1.000000e+00 : f32
    %186 = vector.broadcast %cst_41 : f32 to vector<8x128xf32>
    %187 = arith.addf %186, %185 : vector<8x128xf32>
    %188 = arith.divf %186, %187 : vector<8x128xf32>
    %189 = arith.mulf %180, %160 : vector<8x128xf32>
    %190 = arith.mulf %179, %182 : vector<8x128xf32>
    %191 = arith.addf %189, %190 : vector<8x128xf32>
    %192 = math.tanh %191 : vector<8x128xf32>
    %193 = arith.mulf %188, %192 : vector<8x128xf32>
    %194 = arith.truncf %193 : vector<8x128xf32> to vector<8x128xbf16>
    %c5 = arith.constant 5 : index
    %c0_42 = arith.constant 0 : index
    %c0_43 = arith.constant 0 : index
    %195 = vector.load %arg6[%c5, %c0_42, %c0_43] : memref<8x8x128xbf16, #tpu.memory_space<vmem>>, vector<1x8x128xbf16>
    %196 = vector.shape_cast %195 : vector<1x8x128xbf16> to vector<8x128xbf16>
    %197 = vector.shape_cast %194 : vector<8x128xbf16> to vector<1x8x128xbf16>
    tpu.vector_store %arg6[%c5, %c0_42, %c0_43], %197 {strides = array<i32>} : memref<8x8x128xbf16, #tpu.memory_space<vmem>>, vector<1x8x128xbf16>,
    %cst_44 = arith.constant dense<0.000000e+00> : vector<8x512xf32>
    %198 = tpu.matmul %193, %4, %cst_44 {dimension_numbers = #tpu.dot_dimension_numbers<[1], [0], [0], [1], [0, 0, 1, 1], [], []>} : vector<8x128xf32>, vector<128x512xf32>, vector<8x512xf32> -> vector<8x512xf32>
    %199 = vector.extract_strided_slice %11 {offsets = [0, 6, 0], sizes = [8, 1, 512], strides = [1, 1, 1]} : vector<8x8x512xf32> to vector<8x1x512xf32>
    %200 = vector.shape_cast %199 : vector<8x1x512xf32> to vector<8x512xf32>
    %201 = arith.addf %200, %198 : vector<8x512xf32>
    %202 = vector.broadcast %5 : vector<1x512xf32> to vector<8x512xf32>
    %203 = arith.addf %201, %202 : vector<8x512xf32>
    %204 = vector.extract_strided_slice %203 {offsets = [0, 0], sizes = [8, 256], strides = [1, 1]} : vector<8x512xf32> to vector<8x256xf32>
    %205 = arith.negf %204 : vector<8x256xf32>
    %206 = math.exp %205 : vector<8x256xf32>
    %cst_45 = arith.constant 1.000000e+00 : f32
    %207 = vector.broadcast %cst_45 : f32 to vector<8x256xf32>
    %208 = arith.addf %207, %206 : vector<8x256xf32>
    %209 = arith.divf %207, %208 : vector<8x256xf32>
    %210 = vector.extract_strided_slice %209 {offsets = [0, 0], sizes = [8, 128], strides = [1, 1]} : vector<8x256xf32> to vector<8x128xf32>
    %211 = vector.extract_strided_slice %209 {offsets = [0, 128], sizes = [8, 128], strides = [1, 1]} : vector<8x256xf32> to vector<8x128xf32>
    %212 = vector.extract_strided_slice %203 {offsets = [0, 256], sizes = [8, 128], strides = [1, 1]} : vector<8x512xf32> to vector<8x128xf32>
    %213 = math.tanh %212 : vector<8x128xf32>
    %214 = vector.extract_strided_slice %203 {offsets = [0, 384], sizes = [8, 128], strides = [1, 1]} : vector<8x512xf32> to vector<8x128xf32>
    %215 = arith.negf %214 : vector<8x128xf32>
    %216 = math.exp %215 : vector<8x128xf32>
    %cst_46 = arith.constant 1.000000e+00 : f32
    %217 = vector.broadcast %cst_46 : f32 to vector<8x128xf32>
    %218 = arith.addf %217, %216 : vector<8x128xf32>
    %219 = arith.divf %217, %218 : vector<8x128xf32>
    %220 = arith.mulf %211, %191 : vector<8x128xf32>
    %221 = arith.mulf %210, %213 : vector<8x128xf32>
    %222 = arith.addf %220, %221 : vector<8x128xf32>
    %223 = math.tanh %222 : vector<8x128xf32>
    %224 = arith.mulf %219, %223 : vector<8x128xf32>
    %225 = arith.truncf %224 : vector<8x128xf32> to vector<8x128xbf16>
    %c6 = arith.constant 6 : index
    %c0_47 = arith.constant 0 : index
    %c0_48 = arith.constant 0 : index
    %226 = vector.load %arg6[%c6, %c0_47, %c0_48] : memref<8x8x128xbf16, #tpu.memory_space<vmem>>, vector<1x8x128xbf16>
    %227 = vector.shape_cast %226 : vector<1x8x128xbf16> to vector<8x128xbf16>
    %228 = vector.shape_cast %225 : vector<8x128xbf16> to vector<1x8x128xbf16>
    tpu.vector_store %arg6[%c6, %c0_47, %c0_48], %228 {strides = array<i32>} : memref<8x8x128xbf16, #tpu.memory_space<vmem>>, vector<1x8x128xbf16>,
    %cst_49 = arith.constant dense<0.000000e+00> : vector<8x512xf32>
    %229 = tpu.matmul %224, %4, %cst_49 {dimension_numbers = #tpu.dot_dimension_numbers<[1], [0], [0], [1], [0, 0, 1, 1], [], []>} : vector<8x128xf32>, vector<128x512xf32>, vector<8x512xf32> -> vector<8x512xf32>
    %230 = vector.extract_strided_slice %11 {offsets = [0, 7, 0], sizes = [8, 1, 512], strides = [1, 1, 1]} : vector<8x8x512xf32> to vector<8x1x512xf32>
    %231 = vector.shape_cast %230 : vector<8x1x512xf32> to vector<8x512xf32>
    %232 = arith.addf %231, %229 : vector<8x512xf32>
    %233 = vector.broadcast %5 : vector<1x512xf32> to vector<8x512xf32>
    %234 = arith.addf %232, %233 : vector<8x512xf32>
    %235 = vector.extract_strided_slice %234 {offsets = [0, 0], sizes = [8, 256], strides = [1, 1]} : vector<8x512xf32> to vector<8x256xf32>
    %236 = arith.negf %235 : vector<8x256xf32>
    %237 = math.exp %236 : vector<8x256xf32>
    %cst_50 = arith.constant 1.000000e+00 : f32
    %238 = vector.broadcast %cst_50 : f32 to vector<8x256xf32>
    %239 = arith.addf %238, %237 : vector<8x256xf32>
    %240 = arith.divf %238, %239 : vector<8x256xf32>
    %241 = vector.extract_strided_slice %240 {offsets = [0, 0], sizes = [8, 128], strides = [1, 1]} : vector<8x256xf32> to vector<8x128xf32>
    %242 = vector.extract_strided_slice %240 {offsets = [0, 128], sizes = [8, 128], strides = [1, 1]} : vector<8x256xf32> to vector<8x128xf32>
    %243 = vector.extract_strided_slice %234 {offsets = [0, 256], sizes = [8, 128], strides = [1, 1]} : vector<8x512xf32> to vector<8x128xf32>
    %244 = math.tanh %243 : vector<8x128xf32>
    %245 = vector.extract_strided_slice %234 {offsets = [0, 384], sizes = [8, 128], strides = [1, 1]} : vector<8x512xf32> to vector<8x128xf32>
    %246 = arith.negf %245 : vector<8x128xf32>
    %247 = math.exp %246 : vector<8x128xf32>
    %cst_51 = arith.constant 1.000000e+00 : f32
    %248 = vector.broadcast %cst_51 : f32 to vector<8x128xf32>
    %249 = arith.addf %248, %247 : vector<8x128xf32>
    %250 = arith.divf %248, %249 : vector<8x128xf32>
    %251 = arith.mulf %242, %222 : vector<8x128xf32>
    %252 = arith.mulf %241, %244 : vector<8x128xf32>
    %253 = arith.addf %251, %252 : vector<8x128xf32>
    %254 = math.tanh %253 : vector<8x128xf32>
    %255 = arith.mulf %250, %254 : vector<8x128xf32>
    %256 = arith.truncf %255 : vector<8x128xf32> to vector<8x128xbf16>
    %c7 = arith.constant 7 : index
    %c0_52 = arith.constant 0 : index
    %c0_53 = arith.constant 0 : index
    %257 = vector.load %arg6[%c7, %c0_52, %c0_53] : memref<8x8x128xbf16, #tpu.memory_space<vmem>>, vector<1x8x128xbf16>
    %258 = vector.shape_cast %257 : vector<1x8x128xbf16> to vector<8x128xbf16>
    %259 = vector.shape_cast %256 : vector<8x128xbf16> to vector<1x8x128xbf16>
    tpu.vector_store %arg6[%c7, %c0_52, %c0_53], %259 {strides = array<i32>} : memref<8x8x128xbf16, #tpu.memory_space<vmem>>, vector<1x8x128xbf16>,
    %c0_54 = arith.constant 0 : index
    %c0_55 = arith.constant 0 : index
    %260 = vector.load %arg9[%c0_54, %c0_55] : memref<8x128xf32, #tpu.memory_space<vmem>>, vector<8x128xf32>
    tpu.vector_store %arg9[%c0_54, %c0_55], %255 {strides = array<i32>} : memref<8x128xf32, #tpu.memory_space<vmem>>, vector<8x128xf32>,
    %c0_56 = arith.constant 0 : index
    %c0_57 = arith.constant 0 : index
    %261 = vector.load %arg10[%c0_56, %c0_57] : memref<8x128xf32, #tpu.memory_space<vmem>>, vector<8x128xf32>
    tpu.vector_store %arg10[%c0_56, %c0_57], %253 {strides = array<i32>} : memref<8x128xf32, #tpu.memory_space<vmem>>, vector<8x128xf32>,
    %c0_i32_58 = arith.constant 0 : i32
    %262 = arith.cmpi eq, %arg1, %c0_i32_58 : i32
    %263 = arith.extui %262 : i1 to i32
    %c0_i32_59 = arith.constant 0 : i32
    %264 = arith.cmpi ne, %263, %c0_i32_59 : i32
    scf.if %264 {
      %c0_60 = arith.constant 0 : index
      %c0_61 = arith.constant 0 : index
      %265 = vector.load %arg9[%c0_60, %c0_61] : memref<8x128xf32, #tpu.memory_space<vmem>>, vector<8x128xf32>
      %c0_62 = arith.constant 0 : index
      %c0_63 = arith.constant 0 : index
      %266 = vector.load %arg7[%c0_62, %c0_63] : memref<8x128xf32, #tpu.memory_space<vmem>>, vector<8x128xf32>
      tpu.vector_store %arg7[%c0_62, %c0_63], %265 {strides = array<i32>} : memref<8x128xf32, #tpu.memory_space<vmem>>, vector<8x128xf32>,
      %c0_64 = arith.constant 0 : index
      %c0_65 = arith.constant 0 : index
      %267 = vector.load %arg10[%c0_64, %c0_65] : memref<8x128xf32, #tpu.memory_space<vmem>>, vector<8x128xf32>
      %c0_66 = arith.constant 0 : index
      %c0_67 = arith.constant 0 : index
      %268 = vector.load %arg8[%c0_66, %c0_67] : memref<8x128xf32, #tpu.memory_space<vmem>>, vector<8x128xf32>
      tpu.vector_store %arg8[%c0_66, %c0_67], %267 {strides = array<i32>} : memref<8x128xf32, #tpu.memory_space<vmem>>, vector<8x128xf32>,
    } else {
    }
    return
  }
  func.func @transform_0(%arg0: i32, %arg1: i32) -> (i32, i32, i32) {
    %c0_i32 = arith.constant 0 : i32
    %c0_i32_0 = arith.constant 0 : i32
    return %arg0, %arg1, %c0_i32 : i32, i32, i32
  }
  func.func @transform_1(%arg0: i32, %arg1: i32) -> (i32, i32) {
    %c0_i32 = arith.constant 0 : i32
    %c0_i32_0 = arith.constant 0 : i32
    %c0_i32_1 = arith.constant 0 : i32
    return %c0_i32, %c0_i32_0 : i32, i32
  }
  func.func @transform_2(%arg0: i32, %arg1: i32) -> (i32, i32) {
    %c0_i32 = arith.constant 0 : i32
    %c0_i32_0 = arith.constant 0 : i32
    %c0_i32_1 = arith.constant 0 : i32
    return %c0_i32, %c0_i32_0 : i32, i32
  }
  func.func @transform_3(%arg0: i32, %arg1: i32) -> (i32, i32) {
    %c0_i32 = arith.constant 0 : i32
    %c0_i32_0 = arith.constant 0 : i32
    %c0_i32_1 = arith.constant 0 : i32
    return %c0_i32, %c0_i32_0 : i32, i32
  }
  func.func @transform_4(%arg0: i32, %arg1: i32) -> (i32, i32, i32) {
    %c0_i32 = arith.constant 0 : i32
    %c0_i32_0 = arith.constant 0 : i32
    return %arg1, %arg0, %c0_i32 : i32, i32, i32
  }
  func.func @transform_5(%arg0: i32, %arg1: i32) -> (i32, i32) {
    %c0_i32 = arith.constant 0 : i32
    %c0_i32_0 = arith.constant 0 : i32
    return %arg0, %c0_i32 : i32, i32
  }
  func.func @transform_6(%arg0: i32, %arg1: i32) -> (i32, i32) {
    %c0_i32 = arith.constant 0 : i32
    %c0_i32_0 = arith.constant 0 : i32
    return %arg0, %c0_i32 : i32, i32
  }
}

</mosaic_0001>

<bundles_post_ra>
// kernel: tpu_custom_call.1
= control target key start
LH: loop header
LB: loop body
LE: loop exit
PB: predicated region body
PF: predicated region fallthrough
CT: control target
= control target key end

     0   :  { %7 = vsyncpa [#allocation3], 0  ;;  %s690_s0 = inlined_call_operand.hbm [shape: f32[16,128], index: 0, kind: input, shape index: {}]   ;;  %s691_s1 = inlined_call_operand.hbm [shape: f32[8,128], index: 1, kind: input, shape index: {}]   ;;  %s692_s2 = inlined_call_operand.hbm [shape: f32[16,128], index: 2, kind: output, shape index: {}]  }
   0x1   :  { %9 = vsyncpa [#allocation3 + $0x1], 0 }
   0x2   :  { %10 = vsyncpa [#allocation6], 0 }
   0x3   :  { %11 = vsyncpa [#allocation4], 0 }
   0x4   :  { %13 = vsyncpa [#allocation4 + $0x1], 0  ;;  %s489_s9 = smov 0   ;;  %s491_s10 = smov 0  }
   0x5   :  { %s493_s11 = smov 0   ;;  %s495_s12 = smov 0  }
   0x6 LB: > { %s510_s13 = sadd.s32 4294967295, %s469_s12   ;;  %s270_s14 = sadd.s32 4294967294, %s469_s12   ;;  %s469_s12 = sphi %s495_s12, %s716_s12   ;;  %s465_s11 = sphi %s493_s11, %s715_s11   ;;  %s461_s10 = sphi %s491_s10, %s714_s10   ;;  %s457_s9 = sphi %s489_s9, %s713_s9  }
   0x7   : > { %p39_p0 = scmp.ne.s32.totalorder %s461_s10, %s457_s9  ;;  %p693_p1 = scmp.eq.s32.totalorder %s510_s13, 0 }
   0x8   : > { %p90_p3 = scmp.eq.s32.totalorder %s270_s14, 1  ;;  %p271_p5 = scmp.ge.s32.totalorder %s469_s12, 1 }
   0x9   : > { %p519_p4 = por %p693_p1, %p39_p0  ;;  %p97_p7 = scmp.lt.s32.totalorder %s469_s12, 3 }
   0xa   : > { %p524_p6 = por %p90_p3, %p39_p0  ;;  %s471_s18 = smov [#allocation5]  }
   0xb   : > { %s696_s15 = scalar_select %p519_p4, 1, 0 }
   0xc   : > { %s697_s16 = scalar_select %p524_p6, 1, 0 }
   0xd   : > { %p529_p8 = pnand %p271_p5, %p97_p7  ;;  %s110_s19 = sshll.u32 %s471_s18, 4  ;;  %s111_s19 = int_to_ptr.vmem [resolvable:$true] %s110_s19 }
   0xe   : > { %s537_s20 = sadd.s32 1, %s469_s12   ;;  %s26_s24 = sadd.s32 1, %s465_s11 }
   0xf   : > { %s698_s17 = scalar_select %p529_p8, 1, 0 }
  0x10   : > { %p292_p10 = pneg %p529_p8  ;;  %s23_s22 = ssub.s32 %s469_s12, %s537_s20 }
  0x11   : > { %p547_p12 = scmp.eq.s32.totalorder %s23_s22, 0  ;;  %s341_s27 = scalar_lea.hbm %s691_s1, 128 }
  0x12   : > { %p541_p11 = pnand %p292_p10, %p693_p1  ;;  %p342_p0 = scmp.ne.s32.totalorder %s691_s1, %s341_s27 }
  0x13   : > { %s700_s23 = scalar_select %p547_p12, 1, 0 }
  0x14   : > { %p343_p3 = pneg %p541_p11  ;;  %p348_p10 = scmp.lt.u32.totalorder %s341_s27, %s691_s1 }
  0x16   : > { %p344_p5 = pnand %p343_p3, %p342_p0 }
  0x18   : > { %p345_p7 = pneg %p344_p5 }
  0x1a   : > { %p350_p9 = pnand %p348_p10, %p345_p7 }
  0x1c   : > { %353 = shalt.err (!%p350_p9)
}
  0x1d   : > { %s354_s4 = scalar_lea.vmem %s111_s19, 128  ;;  %p362_p6 = scmp.lt.s32.totalorder %s111_s19, %s111_s19 }
  0x1e   : > { %p355_p1 = scmp.ne.s32.totalorder %s111_s19, %s354_s4  ;;  %p363_p4 = scmp.lt.s32.totalorder %s354_s4, %s354_s4 }
  0x20   : > { %p357_p2 = pnand %p355_p1, %p343_p3  ;;  %p364_p8 = por %p363_p4, %p362_p6 }
  0x22   : > { %p358_p13 = pneg %p357_p2 }
  0x24   : > { %p365_p12 = pnand %p364_p8, %p358_p13 }
  0x26   : > { %368 = shalt.err (!%p365_p12)
}
  0x27   : > { %295 = dma.hbm_to_vmem [thread:$0]  (!%p541_p11), %s691_s1, 128, %s111_s19, [#allocation6]  }
  0x28   : > { %p701_p1 = scmp.ne.s32.totalorder %s700_s23, 0  ;;  %p34_p2 = scmp.eq.s32.totalorder %s469_s12, 0 }
  0x29   : > { %p702_p4 = scmp.ne.s32.totalorder %s465_s11, %s461_s10  ;;  %p703_p6 = scmp.eq.s32.totalorder %s510_s13, 1 }
  0x2a   : > { %s573_s7 = scalar_select %p701_p1, %s465_s11, %s26_s24  }
  0x2b   : > { %p581_p8 = por %p703_p6, %p702_p4  ;;  %p305_p9 = scmp.lt.s32.totalorder %s469_s12, 2 }
  0x2c   : > { %s121_s14 = sand.u32 1, %s465_s11   ;;  %p705_p12 = pmov %p702_p4 }
  0x2d   : > { %s274_s18 = sshll.u32 %s121_s14, 3  ;;  %s275_s21 = sshll.u32 %s469_s12, 7 }
  0x2e   : > { %p35_p13 = por %p34_p2, %p705_p12  ;;  %s594_s19 = scalar_lea.hbm %s690_s0, %s275_s21 }
  0x2f   : > { %s125_s23 = scalar_lea.vmem [#allocation2], %s274_s18  ;;  %s122_s27 = scalar_lea.sflag [#allocation3], %s121_s14 }
  0x30   : > { %s132_s24 = sshll.u32 %s125_s23, 4  ;;  %p596_p11 = pnand %p305_p9, %p35_p13  ;;  %s600_s24 = int_to_ptr.vmem [resolvable:$true] %s132_s24 }
  0x31   : > { %s369_s28 = scalar_lea.hbm %s594_s19, 128  ;;  %s374_s3 = scalar_lea.hbm %s690_s0, 256 }
  0x32   : > { %p370_p0 = scmp.ne.s32.totalorder %s594_s19, %s369_s28  ;;  %p371_p3 = pneg %p596_p11 }
  0x33   : > { %p375_p10 = scmp.lt.u32.totalorder %s594_s19, %s690_s0  ;;  %p376_p1 = scmp.lt.u32.totalorder %s374_s3, %s369_s28 }
  0x34   : > { %p372_p5 = pnand %p371_p3, %p370_p0  ;;  %p378_p4 = scmp.lt.u32.totalorder %s369_s28, %s594_s19 }
  0x35   : > { %p377_p2 = por %p376_p1, %p375_p10 }
  0x36   : > { %p373_p7 = pneg %p372_p5 }
  0x37   : > { %p379_p6 = por %p378_p4, %p377_p2 }
  0x39   : > { %p380_p9 = pnand %p379_p6, %p373_p7 }
  0x3b   : > { %383 = shalt.err (!%p380_p9)
}
  0x3c   : > { %s384_s6 = scalar_lea.vmem %s600_s24, 128  ;;  %s472_s14 = smov [#allocation2]  }
  0x3d   : > { %p385_p12 = scmp.ne.s32.totalorder %s600_s24, %s384_s6  ;;  %s389_s18 = sshll.u32 %s472_s14, 4  ;;  %s390_s18 = int_to_ptr.vmem [resolvable:$false] %s389_s18 }
  0x3e   : > { %s391_s21 = scalar_lea.vmem %s390_s18, 256  ;;  %p392_p5 = scmp.lt.s32.totalorder %s600_s24, %s390_s18 }
  0x3f   : > { %p387_p13 = pnand %p385_p12, %p371_p3  ;;  %p393_p10 = scmp.lt.s32.totalorder %s391_s21, %s384_s6 }
  0x41   : > { %p388_p0 = pneg %p387_p13  ;;  %p394_p1 = por %p393_p10, %p392_p5 }
  0x43   : > { %p395_p2 = pnand %p394_p1, %p388_p0 }
  0x45   : > { %398 = shalt.err (!%p395_p2)
}
  0x46   : > { %299 = dma.hbm_to_vmem [thread:$0]  (!%p596_p11), %s594_s19, 128, %s600_s24, %s122_s27  }
  0x47   : > { %p707_p7 = scmp.ne.s32.totalorder %s698_s17, 0 }
  0x48   : > { %s630_s22 = sand.u32 (!%p707_p7), 1, %s461_s10   ;;  %p708_p3 = scmp.ne.s32.totalorder (!%p707_p7), %s696_s15, 0 }
  0x49   : > { %141 = sbr.rel (%p707_p7) target bundleno = 109 (0x6d), region = 28  ;;  %s277_s25 = sshll.u32 (!%p707_p7), %s630_s22, 3 }
  0x4a   : > { %s144_s23 = scalar_lea.sflag (!%p707_p7), [#allocation3], %s630_s22  ;;  %s147_s28 = scalar_lea.vmem (!%p707_p7), [#allocation2], %s277_s25 }
  0x50   : > { %444 = dma.done.wait (%p708_p3), %s144_s23, 128  }
  0x51   : > { %446 = vsyncadd (%p708_p3), %s144_s23, 4294967168  ;;  %p709_p4 = scmp.eq.s32.totalorder %s510_s13, 0 }
  0x53   : > { %448 = dma.done.wait (%p709_p4), [#allocation6], 128   ;;  %p710_p11 = pmov %p709_p4 }
  0x54   : > { %s171_s17 = scalar_lea.vmem [#allocation7], %s277_s25  ;;  %s281_s24 = sshll.u32 %s510_s13, 7  ;;  %v172_v0 = vld [vmem:[%s147_s28] sm:$0xff]  ;;  %v173_v1 = vld [vmem:[#allocation5] sm:$0xff] }
  0x55   : > { %450 = vsyncadd (%p710_p11), [#allocation6], 4294967168  ;;  %s190_s19 = sshll.u32 %s171_s17, 4  ;;  %v174_v2 = vadd.f32 %v173_v1, %v172_v0  ;;  %s648_s27 = scalar_lea.hbm %s692_s2, %s281_s24  ;;  %s643_s19 = int_to_ptr.vmem [resolvable:$true] %s190_s19 }
  0x56   : > { %s177_s29 = scalar_lea.sflag [#allocation4], %s630_s22  ;;  %s399_s30 = scalar_lea.vmem %s643_s19, 128 }
  0x57   : > { %175 = vst [vmem:[%s171_s17] sm:$0xff] %v174_v2  ;;  %p400_p6 = scmp.ne.s32.totalorder %s643_s19, %s399_s30  ;;  %s473_s13 = smov [#allocation7]  }
  0x58   : > { %s403_s3 = sshll.u32 %s473_s13, 4  ;;  %s404_s3 = int_to_ptr.vmem [resolvable:$false] %s403_s3 }
  0x59   : > { %p401_p9 = pnand %p400_p6, %p581_p8  ;;  %s405_s4 = scalar_lea.vmem %s404_s3, 256 }
  0x5a   : > { %p406_p13 = scmp.lt.s32.totalorder %s643_s19, %s404_s3  ;;  %p407_p0 = scmp.lt.s32.totalorder %s405_s4, %s399_s30 }
  0x5b   : > { %p402_p12 = pneg %p401_p9 }
  0x5c   : > { %p408_p5 = por %p407_p0, %p406_p13 }
  0x5e   : > { %p409_p10 = pnand %p408_p5, %p402_p12 }
  0x60   : > { %412 = shalt.err (!%p409_p10)
}
  0x61   : > { %s413_s5 = scalar_lea.hbm %s648_s27, 128  ;;  %s417_s18 = scalar_lea.hbm %s692_s2, 256 }
  0x62   : > { %p414_p1 = scmp.ne.s32.totalorder %s648_s27, %s413_s5  ;;  %p418_p3 = scmp.lt.u32.totalorder %s648_s27, %s692_s2 }
  0x63   : > { %p419_p4 = scmp.lt.u32.totalorder %s417_s18, %s413_s5  ;;  %p421_p6 = scmp.lt.u32.totalorder %s413_s5, %s648_s27 }
  0x64   : > { %p415_p2 = pnand %p414_p1, %p581_p8 }
  0x65   : > { %p420_p11 = por %p419_p4, %p418_p3 }
  0x66   : > { %p416_p7 = pneg %p415_p2 }
  0x67   : > { %p422_p9 = por %p421_p6, %p420_p11 }
  0x69   : > { %p423_p12 = pnand %p422_p9, %p416_p7 }
  0x6b   : > { %426 = shalt.err (!%p423_p12)
}
  0x6c   : > { %290 = dma.vmem_to_hbm [thread:$0]  (%p581_p8), %s643_s19, 128, %s648_s27, %s177_s29  }
  0x6d PF: > { %s202_s25 = sand.u32 1, %s457_s9   ;;  %p711_p13 = scmp.ne.s32.totalorder %s697_s16, 0 }
  0x6e   : > { %p712_p0 = scmp.ge.s32.totalorder %s469_s12, 2  ;;  %s203_s23 = scalar_lea.sflag [#allocation4], %s202_s25 }
  0x70   : > { %p301_p5 = pnand %p712_p0, %p711_p13 }
  0x72   : > { %452 = dma.done.wait (!%p301_p5), %s203_s23, 128  }
  0x73   : > { %454 = vsyncadd (!%p301_p5), %s203_s23, 4294967168  ;;  %p16_p10 = scmp.ge.s32.totalorder %s537_s20, 4   ;;  %s713_s9 = smov %s461_s10 }
  0x74   : > { %s714_s10 = smov %s465_s11  ;;  %s715_s11 = smov %s573_s7 }
  0x75   : > { %s716_s12 = smov %s537_s20  ;;  %18 = sbr.rel (!%p16_p10) target bundleno = 6 (0x6), region = 77 }
  0x7c   :  { %208 = vsyncpa [#allocation3], 1 }
  0x7d   :  { %210 = vsyncpa [#allocation3 + $0x1], 1 }
  0x7e   :  { %211 = vsyncpa [#allocation6], 1 }
  0x7f   :  { %212 = vsyncpa [#allocation4], 1 }
  0x80   :  { %214 = vsyncpa [#allocation4 + $0x1], 1 }

// kernel: tpu_custom_call.1
= control target key start
LH: loop header
LB: loop body
LE: loop exit
PB: predicated region body
PF: predicated region fallthrough
CT: control target
= control target key end

     0   :  { %12 = vsyncpa [#allocation5], 0  ;;  %s9096_s0 = inlined_call_operand.hbm [shape: bf16[8,8,128], index: 0, kind: input, shape index: {}]   ;;  %s9097_s1 = inlined_call_operand.hbm [shape: bf16[128,512], index: 1, kind: input, shape index: {}]   ;;  %s9098_s2 = inlined_call_operand.hbm [shape: f32[128,512], index: 2, kind: input, shape index: {}]   ;;  %s9099_s3 = inlined_call_operand.vmem [shape: f32[1,512], index: 3, kind: input, shape index: {}]   ;;  %s9100_s4 = inlined_call_operand.hbm [shape: bf16[8,8,128], index: 4, kind: output, shape index: {0}]   ;;  %s9101_s5 = inlined_call_operand.hbm [shape: f32[8,128], index: 5, kind: output, shape index: {1}]   ;;  %s9102_s6 = inlined_call_operand.hbm [shape: f32[8,128], index: 6, kind: output, shape index: {2}]  }
   0x1   :  { %13 = vsyncpa [#allocation8], 0 }
   0x2   :  { %14 = vsyncpa [#allocation6], 0 }
   0x3   :  { %15 = vsyncpa [#allocation12], 0  ;;  %s7243_s21 = smov [#allocation7]   ;;  %s7103_s25 = scalar_lea.hbm %s9097_s1, 4096 }
   0x4   :  { %s33_s22 = sshll.u32 %s7243_s21, 4  ;;  %p7104_p0 = scmp.ne.s32.totalorder %s9097_s1, %s7103_s25  ;;  %s34_s22 = int_to_ptr.vmem [resolvable:$true] %s33_s22 }
   0x5   :  { %p7107_p1 = scmp.lt.u32.totalorder %s7103_s25, %s9097_s1 }
   0x7   :  { %p7109_p2 = pnand %p7107_p1, %p7104_p0 }
   0x9   :  { %7112 = shalt.err (!%p7109_p2)
}
   0xa   :  { %s7113_s30 = scalar_lea.vmem %s34_s22, 4096  ;;  %p7118_p4 = scmp.lt.s32.totalorder %s34_s22, %s34_s22 }
   0xb   :  { %p7114_p3 = scmp.ne.s32.totalorder %s34_s22, %s7113_s30  ;;  %p7119_p5 = scmp.lt.s32.totalorder %s7113_s30, %s7113_s30 }
   0xd   :  { %p7120_p6 = por %p7119_p5, %p7118_p4 }
   0xf   :  { %p7121_p7 = pnand %p7120_p6, %p7114_p3 }
  0x11   :  { %7124 = shalt.err (!%p7121_p7)
}
  0x12   :  { %s7244_s7 = smov 256   ;;  %s7245_s8 = smov 16  }
  0x13   :  { %39 = dma.hbm_to_vmem [thread:$0]  %s9097_s1, 4096, %s34_s22, [#allocation8], %s7244_s7, %s7244_s7, %s7245_s8  }
  0x14   :  { %s7246_s11 = smov [#allocation4]   ;;  %s7125_s15 = scalar_lea.hbm %s9096_s0, 512 }
  0x15   :  { %s21_s12 = sshll.u32 %s7246_s11, 4  ;;  %p7126_p8 = scmp.ne.s32.totalorder %s9096_s0, %s7125_s15  ;;  %s22_s12 = int_to_ptr.vmem [resolvable:$true] %s21_s12 }
  0x16   :  { %p7129_p9 = scmp.lt.u32.totalorder %s7125_s15, %s9096_s0 }
  0x18   :  { %p7131_p10 = pnand %p7129_p9, %p7126_p8 }
  0x1a   :  { %7134 = shalt.err (!%p7131_p10)
}
  0x1b   :  { %s7135_s20 = scalar_lea.vmem %s22_s12, 512  ;;  %p7140_p12 = scmp.lt.s32.totalorder %s22_s12, %s22_s12 }
  0x1c   :  { %p7136_p11 = scmp.ne.s32.totalorder %s22_s12, %s7135_s20  ;;  %p7141_p13 = scmp.lt.s32.totalorder %s7135_s20, %s7135_s20 }
  0x1e   :  { %p7142_p0 = por %p7141_p13, %p7140_p12 }
  0x20   :  { %p7143_p1 = pnand %p7142_p0, %p7136_p11 }
  0x22   :  { %7146 = shalt.err (!%p7143_p1)
}
  0x23   :  { %s7247_s1 = smov 64   ;;  %s7248_s21 = smov 4  }
  0x24   :  { %27 = dma.hbm_to_vmem [thread:$0]  %s9096_s0, 512, %s22_s12, [#allocation5], %s7247_s1, %s7247_s1, %s7248_s21  }
  0x25   :  { %s7249_s24 = smov [#allocation9]   ;;  %s7147_s28 = scalar_lea.hbm %s9098_s2, 8192 }
  0x26   :  { %s45_s25 = sshll.u32 %s7249_s24, 4  ;;  %p7148_p2 = scmp.ne.s32.totalorder %s9098_s2, %s7147_s28  ;;  %s46_s25 = int_to_ptr.vmem [resolvable:$true] %s45_s25 }
  0x27   :  { %p7151_p3 = scmp.lt.u32.totalorder %s7147_s28, %s9098_s2 }
  0x29   :  { %p7153_p4 = pnand %p7151_p3, %p7148_p2 }
  0x2b   :  { %7156 = shalt.err (!%p7153_p4)
}
  0x2c   :  { %s7157_s9 = scalar_lea.vmem %s46_s25, 8192  ;;  %p7162_p6 = scmp.lt.s32.totalorder %s46_s25, %s46_s25 }
  0x2d   :  { %p7158_p5 = scmp.ne.s32.totalorder %s46_s25, %s7157_s9  ;;  %p7163_p7 = scmp.lt.s32.totalorder %s7157_s9, %s7157_s9 }
  0x2f   :  { %p7164_p8 = por %p7163_p7, %p7162_p6 }
  0x31   :  { %p7165_p9 = pnand %p7164_p8, %p7158_p5 }
  0x33   :  { %7168 = shalt.err (!%p7165_p9)
}
  0x34   :  { %s7250_s0 = smov 512   ;;  %s7251_s10 = smov 32  }
  0x35   :  { %51 = dma.hbm_to_vmem [thread:$0]  %s9098_s2, 8192, %s46_s25, [#allocation8], %s7250_s0, %s7250_s0, %s7251_s10  }
  0x36   :  { %7235 = dma.done.wait [#allocation5], 512  }
  0x37   :  { %7236 = vsyncadd [#allocation5], 4294966784 }
  0x38   :  { %7237 = dma.done.wait [#allocation8], 12288  }
  0x39   :  { %7238 = vsyncadd [#allocation8], 4294955008  ;;  %v7252_v0 = vmov 0   ;;  %v7253_v1 = vmov 0.0   ;;  %v6023_v2 = vld [vmem:[#allocation7 + $0x4] ss:$16 sps:$4 sm:$0xff]  }
  0x3a   :  { %393 = vmatprep.mubr.bf16.mxu0 %v7252_v0  ;;  %466 = vmatprep.mubr.bf16.mxu1 %v7252_v0  ;;  %68 = vst [vmem:[#allocation2] sm:$0xff] %v7253_v1  ;;  %69 = vst [vmem:[#allocation3] sm:$0xff] %v7253_v1  ;;  %v6025_v3 = vld [vmem:[#allocation7 + $0xc] ss:$16 sps:$4 sm:$0xff]   ;;  %v6027_v4 = vld [vmem:[#allocation7] ss:$16 sps:$4 sm:$0xff]  }
  0x3b   :  { %361 = vmatprep.subr.bf16.mxu0 %v6023_v2  ;;  %v6028_v5 = vld [vmem:[#allocation7 + $0x8] ss:$16 sps:$4 sm:$0xff]   ;;  %434 = vmatprep.subr.bf16.mxu1 %v6025_v3  ;;  %v6029_v6 = vld [vmem:[#allocation7 + $0x24] ss:$16 sps:$4 sm:$0xff]   ;;  %v6031_v7 = vld [vmem:[#allocation7 + $0x2c] ss:$16 sps:$4 sm:$0xff]  }
  0x3c   :  { %362 = vmatpush1.bf16.msra.mxu0 %v6027_v4  ;;  %435 = vmatpush1.bf16.msra.mxu1 %v6028_v5  ;;  %v6033_v8 = vld [vmem:[#allocation7 + $0x20] ss:$16 sps:$4 sm:$0xff]   ;;  %v6034_v9 = vld [vmem:[#allocation7 + $0x28] ss:$16 sps:$4 sm:$0xff]   ;;  %v6035_v10 = vld [vmem:[#allocation7 + $0x44] ss:$16 sps:$4 sm:$0xff]  }
  0x3d   :  { %363 = vmatprep.subr.bf16.mxu0 %v6029_v6  ;;  %436 = vmatprep.subr.bf16.mxu1 %v6031_v7  ;;  %v6037_v11 = vld [vmem:[#allocation7 + $0x4c] ss:$16 sps:$4 sm:$0xff]   ;;  %v6039_v12 = vld [vmem:[#allocation7 + $0x40] ss:$16 sps:$4 sm:$0xff]   ;;  %v6040_v13 = vld [vmem:[#allocation7 + $0x48] ss:$16 sps:$4 sm:$0xff]  }
  0x3e   :  { %v6041_v14 = vld [vmem:[#allocation7 + $0x64] ss:$16 sps:$4 sm:$0xff]   ;;  %v6043_v15 = vld [vmem:[#allocation7 + $0x6c] ss:$16 sps:$4 sm:$0xff]   ;;  %v6045_v16 = vld [vmem:[#allocation7 + $0x60] ss:$16 sps:$4 sm:$0xff]  }
  0x3f   :  { %v6046_v17 = vld [vmem:[#allocation7 + $0x68] ss:$16 sps:$4 sm:$0xff]   ;;  %v6047_v18 = vld [vmem:[#allocation7 + $0x84] ss:$16 sps:$4 sm:$0xff]   ;;  %v6049_v19 = vld [vmem:[#allocation7 + $0x8c] ss:$16 sps:$4 sm:$0xff]  }
  0x40   :  { %364 = vmatpush1.bf16.msra.mxu0 %v6033_v8  ;;  %437 = vmatpush1.bf16.msra.mxu1 %v6034_v9  ;;  %v6051_v20 = vld [vmem:[#allocation7 + $0x80] ss:$16 sps:$4 sm:$0xff]   ;;  %v6052_v21 = vld [vmem:[#allocation7 + $0x88] ss:$16 sps:$4 sm:$0xff]   ;;  %v6053_v22 = vld [vmem:[#allocation7 + $0xa4] ss:$16 sps:$4 sm:$0xff]  }
  0x41   :  { %365 = vmatprep.subr.bf16.mxu0 %v6035_v10  ;;  %438 = vmatprep.subr.bf16.mxu1 %v6037_v11  ;;  %v6055_v23 = vld [vmem:[#allocation7 + $0xac] ss:$16 sps:$4 sm:$0xff]   ;;  %v6057_v24 = vld [vmem:[#allocation7 + $0xa0] ss:$16 sps:$4 sm:$0xff]   ;;  %v6058_v25 = vld [vmem:[#allocation7 + $0xa8] ss:$16 sps:$4 sm:$0xff]  }
  0x42   :  { %v6059_v26 = vld [vmem:[#allocation7 + $0xc4] ss:$16 sps:$4 sm:$0xff]   ;;  %v6061_v27 = vld [vmem:[#allocation7 + $0xcc] ss:$16 sps:$4 sm:$0xff]   ;;  %v6063_v28 = vld [vmem:[#allocation7 + $0xc0] ss:$16 sps:$4 sm:$0xff]  }
  0x43   :  { %v6064_v29 = vld [vmem:[#allocation7 + $0xc8] ss:$16 sps:$4 sm:$0xff]   ;;  %v6065_v30 = vld [vmem:[#allocation7 + $0xe4] ss:$16 sps:$4 sm:$0xff]   ;;  %v6067_v31 = vld [vmem:[#allocation7 + $0xec] ss:$16 sps:$4 sm:$0xff]  }
  0x44   :  { %366 = vmatpush1.bf16.msra.mxu0 %v6039_v12  ;;  %439 = vmatpush1.bf16.msra.mxu1 %v6040_v13  ;;  %v103_v32 = vld [vmem:[#allocation9 + $0x8] sm:$0xff]  ;;  %v105_v34 = vld [vmem:[#allocation9 + $0x18] sm:$0xff]  ;;  %v6069_v36 = vld [vmem:[#allocation7 + $0xe0] ss:$16 sps:$4 sm:$0xff]   ;;  %vm1047_vm0 = vcmask 1041409   ;;  %vm1050_vm1 = vcmask 1042434  }
  0x45   :  { %367 = vmatprep.subr.bf16.mxu0 %v6041_v14  ;;  %440 = vmatprep.subr.bf16.mxu1 %v6043_v15  ;;  %v107_v33 = vld [vmem:[#allocation9 + $0x28] sm:$0xff]  ;;  %v109_v35 = vld [vmem:[#allocation9 + $0x38] sm:$0xff]  ;;  %v102_v38 = vld [vmem:[#allocation9] sm:$0xff]  ;;  %vm1053_vm2 = vcmask 1043459   ;;  %vm1056_vm3 = vcmask 1044484   ;;  %vm1059_vm4 = vcmask 1045509  }
  0x46   :  { %v6070_v37 = vld [vmem:[#allocation7 + $0xe8] ss:$16 sps:$4 sm:$0xff]   ;;  %v106_v39 = vld [vmem:[#allocation9 + $0x20] sm:$0xff]  ;;  %v7335_v40 = vpack.c.bf16 %v107_v33, %v103_v32  ;;  %v7337_v41 = vpack.c.bf16 %v109_v35, %v105_v34  ;;  %v104_v42 = vld [vmem:[#allocation9 + $0x10] sm:$0xff]  ;;  %vm1062_vm5 = vcmask 1046534   ;;  %vm1065_vm6 = vcmask 1047559  }
  0x47   :  { %v108_v43 = vld [vmem:[#allocation9 + $0x30] sm:$0xff]  ;;  %v111_v44 = vld [vmem:[#allocation9 + $0x48] sm:$0xff]  ;;  %v113_v46 = vld [vmem:[#allocation9 + $0x58] sm:$0xff]  ;;  %v7339_v50 = vpack.c.bf16 %v106_v39, %v102_v38  ;;  %s7255_s15 = smov [#allocation11]   ;;  %s7256_s17 = smov [#allocation13]  }
  0x48   :  { %368 = vmatpush1.bf16.msra.mxu0 %v6045_v16  ;;  %441 = vmatpush1.bf16.msra.mxu1 %v6046_v17  ;;  %9234 = vst [vmem:[#allocation18_spill] sm:$0xff] %v7335_v40  ;;  %9235 = vst [vmem:[#allocation19_spill] sm:$0xff] %v7337_v41  ;;  %v115_v45 = vld [vmem:[#allocation9 + $0x68] sm:$0xff]  ;;  %v117_v47 = vld [vmem:[#allocation9 + $0x78] sm:$0xff]  ;;  %v7341_v51 = vpack.c.bf16 %v108_v43, %v104_v42  ;;  %s5114_s16 = sshll.u32 %s7255_s15, 4  ;;  %s5124_s18 = sshll.u32 %s7256_s17, 4  ;;  %s9043_s16 = int_to_ptr.vmem [resolvable:$true] %s5114_s16  ;;  %s9045_s18 = int_to_ptr.vmem [resolvable:$true] %s5124_s18 }
  0x49   :  { %369 = vmatprep.subr.bf16.mxu0 %v6047_v18  ;;  %442 = vmatprep.subr.bf16.mxu1 %v6049_v19  ;;  %v6071_v48 = vld [vmem:[#allocation4] sm:$0xff]   ;;  %v112_v53 = vld [vmem:[#allocation9 + $0x50] sm:$0xff]  ;;  %v7345_v55 = vpack.c.bf16 %v115_v45, %v111_v44  ;;  %v7347_v56 = vpack.c.bf16 %v117_v47, %v113_v46  ;;  %v119_v57 = vld [vmem:[#allocation9 + $0x88] sm:$0xff] }
  0x4a   :  { %v110_v49 = vld [vmem:[#allocation9 + $0x40] sm:$0xff]  ;;  %v116_v54 = vld [vmem:[#allocation9 + $0x70] sm:$0xff]  ;;  %v123_v58 = vld [vmem:[#allocation9 + $0xa8] sm:$0xff] }
  0x4b   :  { %v114_v52 = vld [vmem:[#allocation9 + $0x60] sm:$0xff]  ;;  %v121_v59 = vld [vmem:[#allocation9 + $0x98] sm:$0xff]  ;;  %v7353_v62 = vpack.c.bf16 %v116_v54, %v112_v53  ;;  %v7357_v3 = vpack.c.bf16 %v123_v58, %v119_v57  ;;  %v120_v5 = vld [vmem:[#allocation9 + $0x90] sm:$0xff] }
  0x4c   :  { %370 = vmatpush1.bf16.msra.mxu0 %v6051_v20  ;;  %443 = vmatpush1.bf16.msra.mxu1 %v6052_v21  ;;  %v125_v60 = vld [vmem:[#allocation9 + $0xb8] sm:$0xff]  ;;  %v7351_v61 = vpack.c.bf16 %v114_v52, %v110_v49  ;;  %v118_v63 = vld [vmem:[#allocation9 + $0x80] sm:$0xff]  ;;  %v124_v6 = vld [vmem:[#allocation9 + $0xb0] sm:$0xff] }
  0x4d   :  { %371 = vmatprep.subr.bf16.mxu0 %v6053_v22  ;;  %444 = vmatprep.subr.bf16.mxu1 %v6055_v23  ;;  %v122_v2 = vld [vmem:[#allocation9 + $0xa0] sm:$0xff]  ;;  %v7359_v4 = vpack.c.bf16 %v125_v60, %v121_v59  ;;  %v127_v7 = vld [vmem:[#allocation9 + $0xc8] sm:$0xff]  ;;  %v129_v9 = vld [vmem:[#allocation9 + $0xd8] sm:$0xff]  ;;  %v7367_v14 = vpack.c.bf16 %v124_v6, %v120_v5 }
  0x4e   :  { %v131_v8 = vld [vmem:[#allocation9 + $0xe8] sm:$0xff]  ;;  %v133_v10 = vld [vmem:[#allocation9 + $0xf8] sm:$0xff]  ;;  %v126_v12 = vld [vmem:[#allocation9 + $0xc0] sm:$0xff]  ;;  %v7365_v13 = vpack.c.bf16 %v122_v2, %v118_v63 }
  0x4f   :  { %9236 = vst [vmem:[#allocation20_spill] sm:$0xff] %v7359_v4  ;;  %v6072_v11 = vld [vmem:[#allocation4 + $0x8] sm:$0xff]   ;;  %9238 = vst [vmem:[#allocation22_spill] sm:$0xff] %v7367_v14  ;;  %v130_v15 = vld [vmem:[#allocation9 + $0xe0] sm:$0xff]  ;;  %v7371_v16 = vpack.c.bf16 %v131_v8, %v127_v7  ;;  %v7373_v17 = vpack.c.bf16 %v133_v10, %v129_v9 }
  0x50   :  { %372 = vmatpush1.bf16.msra.mxu0 %v6057_v24  ;;  %445 = vmatpush1.bf16.msra.mxu1 %v6058_v25  ;;  %9237 = vst [vmem:[#allocation21_spill] sm:$0xff] %v7365_v13  ;;  %v128_v18 = vld [vmem:[#allocation9 + $0xd0] sm:$0xff]  ;;  %v135_v20 = vld [vmem:[#allocation9 + $0x108] sm:$0xff]  ;;  %v137_v22 = vld [vmem:[#allocation9 + $0x118] sm:$0xff]  ;;  %v7377_v24 = vpack.c.bf16 %v130_v15, %v126_v12 }
  0x51   :  { %373 = vmatprep.subr.bf16.mxu0 %v6059_v26  ;;  %446 = vmatprep.subr.bf16.mxu1 %v6061_v27  ;;  %9239 = vst [vmem:[#allocation23_spill] sm:$0xff] %v7371_v16  ;;  %9240 = vst [vmem:[#allocation24_spill] sm:$0xff] %v7373_v17  ;;  %v132_v19 = vld [vmem:[#allocation9 + $0xf0] sm:$0xff]  ;;  %v139_v21 = vld [vmem:[#allocation9 + $0x128] sm:$0xff] }
  0x52   :  { %v141_v23 = vld [vmem:[#allocation9 + $0x138] sm:$0xff]  ;;  %9241 = vst [vmem:[#allocation25_spill] sm:$0xff] %v7377_v24  ;;  %v7379_v25 = vpack.c.bf16 %v132_v19, %v128_v18  ;;  %v134_v26 = vld [vmem:[#allocation9 + $0x100] sm:$0xff]  ;;  %v143_v32 = vld [vmem:[#allocation9 + $0x148] sm:$0xff] }
  0x53   :  { %v138_v27 = vld [vmem:[#allocation9 + $0x120] sm:$0xff]  ;;  %v147_v33 = vld [vmem:[#allocation9 + $0x168] sm:$0xff]  ;;  %v145_v34 = vld [vmem:[#allocation9 + $0x158] sm:$0xff] }
  0x54   :  { %374 = vmatpush1.bf16.msra.mxu0 %v6063_v28  ;;  %447 = vmatpush1.bf16.msra.mxu1 %v6064_v29  ;;  %9242 = vst [vmem:[#allocation26_spill] sm:$0xff] %v7379_v25  ;;  %v7383_v28 = vpack.c.bf16 %v139_v21, %v135_v20  ;;  %v7385_v29 = vpack.c.bf16 %v141_v23, %v137_v22  ;;  %v149_v35 = vld [vmem:[#allocation9 + $0x178] sm:$0xff]  ;;  %v142_v39 = vld [vmem:[#allocation9 + $0x140] sm:$0xff]  ;;  %v144_v45 = vld [vmem:[#allocation9 + $0x150] sm:$0xff] }
  0x55   :  { %375 = vmatprep.subr.bf16.mxu0 %v6065_v30  ;;  %448 = vmatprep.subr.bf16.mxu1 %v6067_v31  ;;  %v136_v30 = vld [vmem:[#allocation9 + $0x110] sm:$0xff]  ;;  %v146_v42 = vld [vmem:[#allocation9 + $0x160] sm:$0xff]  ;;  %v7397_v43 = vpack.c.bf16 %v147_v33, %v143_v32  ;;  %v7399_v44 = vpack.c.bf16 %v149_v35, %v145_v34  ;;  %v151_v47 = vld [vmem:[#allocation9 + $0x188] sm:$0xff] }
  0x56   :  { %9243 = vst [vmem:[#allocation27_spill] sm:$0xff] %v7383_v28  ;;  %9244 = vst [vmem:[#allocation28_spill] sm:$0xff] %v7385_v29  ;;  %v140_v31 = vld [vmem:[#allocation9 + $0x130] sm:$0xff]  ;;  %v153_v49 = vld [vmem:[#allocation9 + $0x198] sm:$0xff]  ;;  %v7403_v53 = vpack.c.bf16 %v146_v42, %v142_v39 }
  0x57   :  { %v7393_v38 = vpack.c.bf16 %v140_v31, %v136_v30  ;;  %9247 = vst [vmem:[#allocation31_spill] sm:$0xff] %v7397_v43  ;;  %9248 = vst [vmem:[#allocation32_spill] sm:$0xff] %v7399_v44  ;;  %v148_v46 = vld [vmem:[#allocation9 + $0x170] sm:$0xff]  ;;  %v157_v52 = vld [vmem:[#allocation9 + $0x1b8] sm:$0xff] }
  0x58   :  { %376 = vmatpush1.bf16.msra.mxu0 %v6069_v36  ;;  %449 = vmatpush1.bf16.msra.mxu1 %v6070_v37  ;;  %v6073_v36 = vld [vmem:[#allocation4 + $0x10] sm:$0xff]   ;;  %v7391_v37 = vpack.c.bf16 %v138_v27, %v134_v26  ;;  %9249 = vst [vmem:[#allocation33_spill] sm:$0xff] %v7403_v53  ;;  %v7405_v54 = vpack.c.bf16 %v148_v46, %v144_v45  ;;  %v150_v57 = vld [vmem:[#allocation9 + $0x180] sm:$0xff]  ;;  %v159_v5 = vld [vmem:[#allocation9 + $0x1c8] sm:$0xff] }
  0x59   :  { %5498 = vmatprep.subr.bf16.mxu0 %v7335_v40  ;;  %5530 = vmatprep.subr.bf16.mxu1 %v7337_v41  ;;  %9246 = vst [vmem:[#allocation30_spill] sm:$0xff] %v7393_v38  ;;  %v154_v58 = vld [vmem:[#allocation9 + $0x1a0] sm:$0xff]  ;;  %v7411_v60 = vpack.c.bf16 %v157_v52, %v153_v49  ;;  %v152_v63 = vld [vmem:[#allocation9 + $0x190] sm:$0xff]  ;;  %v163_v6 = vld [vmem:[#allocation9 + $0x1e8] sm:$0xff] }
  0x5a   :  { %9245 = vst [vmem:[#allocation29_spill] sm:$0xff] %v7391_v37  ;;  %9250 = vst [vmem:[#allocation34_spill] sm:$0xff] %v7405_v54  ;;  %v156_v2 = vld [vmem:[#allocation9 + $0x1b0] sm:$0xff]  ;;  %v161_v7 = vld [vmem:[#allocation9 + $0x1d8] sm:$0xff]  ;;  %v7417_v10 = vpack.c.bf16 %v154_v58, %v150_v57  ;;  %v7423_v15 = vpack.c.bf16 %v163_v6, %v159_v5  ;;  %v746_v6 = vlaneseq }
  0x5b   :  { %394 = vmatmul.mubr.bf16.vlgmr.msra.gmra.mrb[0].mxu0 %v6071_v48  ;;  %467 = vmatmul.mubr.bf16.vlgmr.msra.gmra.mrb[0].mxu1 %v6071_v48  ;;  %v155_v48 = vld [vmem:[#allocation9 + $0x1a8] sm:$0xff]  ;;  %9252 = vst [vmem:[#allocation36_spill] sm:$0xff] %v7411_v60  ;;  %v165_v8 = vld [vmem:[#allocation9 + $0x1f8] sm:$0xff]  ;;  %v158_v12 = vld [vmem:[#allocation9 + $0x1c0] sm:$0xff] }
  0x5c   :  { %5500 = vmatpush1.bf16.msra.mxu0 %v7339_v50  ;;  %5532 = vmatpush1.bf16.msra.mxu1 %v7341_v51  ;;  %v7409_v59 = vpack.c.bf16 %v155_v48, %v151_v47  ;;  %v6074_v9 = vld [vmem:[#allocation4 + $0x18] sm:$0xff]   ;;  %9253 = vst [vmem:[#allocation37_spill] sm:$0xff] %v7417_v10  ;;  %9255 = vst [vmem:[#allocation39_spill] sm:$0xff] %v7423_v15  ;;  %v162_v18 = vld [vmem:[#allocation9 + $0x1e0] sm:$0xff] }
  0x5d   :  { %5502 = vmatprep.subr.bf16.mxu0 %v7345_v55  ;;  %5534 = vmatprep.subr.bf16.mxu1 %v7347_v56  ;;  %v160_v19 = vld [vmem:[#allocation9 + $0x1d0] sm:$0xff]  ;;  %v7429_v21 = vpack.c.bf16 %v162_v18, %v158_v12 }
  0x5e   :  { %403 = vmatprep.mubr.bf16.mxu0 %v7252_v0  ;;  %476 = vmatprep.mubr.bf16.mxu1 %v7252_v0  ;;  %9251 = vst [vmem:[#allocation35_spill] sm:$0xff] %v7409_v59  ;;  %v164_v20 = vld [vmem:[#allocation9 + $0x1f0] sm:$0xff] }
  0x5f   :  { %9257 = vst [vmem:[#allocation41_spill] sm:$0xff] %v7429_v21  ;;  %v7431_v22 = vpack.c.bf16 %v164_v20, %v160_v19 }
  0x60   :  { %5504 = vmatpush1.bf16.msra.mxu0 %v7351_v61  ;;  %5536 = vmatpush1.bf16.msra.mxu1 %v7353_v62 }
  0x61   :  { %5506 = vmatprep.subr.bf16.mxu0 %v7357_v3  ;;  %5538 = vmatprep.subr.bf16.mxu1 %v7359_v4  ;;  %9258 = vst [vmem:[#allocation42_spill] sm:$0xff] %v7431_v22 }
  0x63   :  { %404 = vmatmul.mubr.bf16.gmra.mrb[4].mxu0 %v6072_v11  ;;  %477 = vmatmul.mubr.bf16.gmra.mrb[4].mxu1 %v6072_v11  ;;  %v7419_v11 = vpack.c.bf16 %v156_v2, %v152_v63 }
  0x64   :  { %5508 = vmatpush1.bf16.msra.mxu0 %v7365_v13  ;;  %5540 = vmatpush1.bf16.msra.mxu1 %v7367_v14 }
  0x65   :  { %5510 = vmatprep.subr.bf16.mxu0 %v7371_v16  ;;  %5542 = vmatprep.subr.bf16.mxu1 %v7373_v17  ;;  %9254 = vst [vmem:[#allocation38_spill] sm:$0xff] %v7419_v11 }
  0x66   :  { %413 = vmatprep.mubr.bf16.mxu0 %v7252_v0  ;;  %486 = vmatprep.mubr.bf16.mxu1 %v7252_v0 }
  0x68   :  { %5512 = vmatpush1.bf16.msra.mxu0 %v7377_v24  ;;  %5544 = vmatpush1.bf16.msra.mxu1 %v7379_v25 }
  0x69   :  { %5514 = vmatprep.subr.bf16.mxu0 %v7383_v28  ;;  %5546 = vmatprep.subr.bf16.mxu1 %v7385_v29 }
  0x6b   :  { %414 = vmatmul.mubr.bf16.gmra.mrb[8].mxu0 %v6073_v36  ;;  %487 = vmatmul.mubr.bf16.gmra.mrb[8].mxu1 %v6073_v36 }
  0x6c   :  { %5516 = vmatpush1.bf16.msra.mxu0 %v7391_v37  ;;  %5548 = vmatpush1.bf16.msra.mxu1 %v7393_v38 }
  0x6d   :  { %5518 = vmatprep.subr.bf16.mxu0 %v7397_v43  ;;  %5550 = vmatprep.subr.bf16.mxu1 %v7399_v44 }
  0x6e   :  { %423 = vmatprep.mubr.bf16.mxu0 %v7252_v0  ;;  %496 = vmatprep.mubr.bf16.mxu1 %v7252_v0  ;;  %v7425_v0 = vpack.c.bf16 %v165_v8, %v161_v7 }
  0x70   :  { %5520 = vmatpush1.bf16.msra.mxu0 %v7403_v53  ;;  %5552 = vmatpush1.bf16.msra.mxu1 %v7405_v54  ;;  %9256 = vst [vmem:[#allocation40_spill] sm:$0xff] %v7425_v0 }
  0x71   :  { %5522 = vmatprep.subr.bf16.mxu0 %v7409_v59  ;;  %5554 = vmatprep.subr.bf16.mxu1 %v7411_v60 }
  0x73   :  { %424 = vmatmul.mubr.bf16.gmra.mrb[12].mxu0 %v6074_v9  ;;  %497 = vmatmul.mubr.bf16.gmra.mrb[12].mxu1 %v6074_v9  ;;  %v747_v9 = vshrl.u32 %v746_v6, 7  ;;  %v166_v6 = vld [vmem:[%s9099_s3] sm:$0xf]  ;;  %s7254_s3 = smov [#allocation10]  }
  0x74   :  { %5524 = vmatpush1.bf16.msra.mxu0 %v7417_v10  ;;  %5556 = vmatpush1.bf16.msra.mxu1 %v7419_v11  ;;  %s5101_s14 = sshll.u32 %s7254_s3, 4  ;;  %s5102_s14 = int_to_ptr.vmem [resolvable:$true] %s5101_s14 }
  0x75   :  { %5526 = vmatprep.subr.bf16.mxu0 %v7423_v15  ;;  %5558 = vmatprep.subr.bf16.mxu1 %v7425_v0  ;;  %s7169_s19 = scalar_lea.vmem %s5102_s14, 512  ;;  %p7174_p11 = scmp.lt.s32.totalorder %s5102_s14, %s5102_s14 }
  0x76   :  { %571 = vmatprep.mubr.f32.mxu0 %v7253_v1  ;;  %642 = vmatprep.mubr.f32.mxu1 %v7253_v1  ;;  %p7170_p10 = scmp.ne.s32.totalorder %s5102_s14, %s7169_s19  ;;  %p7175_p12 = scmp.lt.s32.totalorder %s7169_s19, %s7169_s19 }
  0x78   :  { %5528 = vmatpush1.bf16.msra.mxu0 %v7429_v21  ;;  %5560 = vmatpush1.bf16.msra.mxu1 %v7431_v22  ;;  %p7176_p13 = por %p7175_p12, %p7174_p11 }
  0x79   :  { %5562 = vmatprep.subr.bf16.mxu0 %v7335_v40  ;;  %5594 = vmatprep.subr.bf16.mxu1 %v7337_v41 }
  0x7a   :  { %p7177_p0 = pnand %p7176_p13, %p7170_p10 }
  0x7b   :  { %572 = vmatmul.mubr.f32.vlgmr.msra.gmra.mrb[16].mxu0 %v7253_v1  ;;  %643 = vmatmul.mubr.f32.vlgmr.msra.gmra.mrb[16].mxu1 %v7253_v1 }
  0x7c   :  { %5564 = vmatpush1.bf16.msra.mxu0 %v7339_v50  ;;  %5596 = vmatpush1.bf16.msra.mxu1 %v7341_v51 }
  0x7d   :  { %5566 = vmatprep.subr.bf16.mxu0 %v7345_v55  ;;  %5598 = vmatprep.subr.bf16.mxu1 %v7347_v56 }
  0x7e   :  { %1157 = vmatprep.mubr.f32.mxu0 %v7253_v1  ;;  %1228 = vmatprep.mubr.f32.mxu1 %v7253_v1 }
  0x80   :  { %5568 = vmatpush1.bf16.msra.mxu0 %v7351_v61  ;;  %5600 = vmatpush1.bf16.msra.mxu1 %v7353_v62 }
  0x81   :  { %5570 = vmatprep.subr.bf16.mxu0 %v7357_v3  ;;  %5602 = vmatprep.subr.bf16.mxu1 %v7359_v4 }
  0x84   :  { %5572 = vmatpush1.bf16.msra.mxu0 %v7365_v13  ;;  %5604 = vmatpush1.bf16.msra.mxu1 %v7367_v14 }
  0x85   :  { %5574 = vmatprep.subr.bf16.mxu0 %v7371_v16  ;;  %5606 = vmatprep.subr.bf16.mxu1 %v7373_v17 }
  0x88   :  { %5576 = vmatpush1.bf16.msra.mxu0 %v7377_v24  ;;  %5608 = vmatpush1.bf16.msra.mxu1 %v7379_v25 }
  0x89   :  { %5578 = vmatprep.subr.bf16.mxu0 %v7383_v28  ;;  %5610 = vmatprep.subr.bf16.mxu1 %v7385_v29 }
  0x8c   :  { %5580 = vmatpush1.bf16.msra.mxu0 %v7391_v37  ;;  %5612 = vmatpush1.bf16.msra.mxu1 %v7393_v38 }
  0x8d   :  { %5582 = vmatprep.subr.bf16.mxu0 %v7397_v43  ;;  %5614 = vmatprep.subr.bf16.mxu1 %v7399_v44 }
  0x90   :  { %5584 = vmatpush1.bf16.msra.mxu0 %v7403_v53  ;;  %5616 = vmatpush1.bf16.msra.mxu1 %v7405_v54 }
  0x91   :  { %5586 = vmatprep.subr.bf16.mxu0 %v7409_v59  ;;  %5618 = vmatprep.subr.bf16.mxu1 %v7411_v60 }
  0x94   :  { %5588 = vmatpush1.bf16.msra.mxu0 %v7417_v10  ;;  %5620 = vmatpush1.bf16.msra.mxu1 %v7419_v11 }
  0x95   :  { %5590 = vmatprep.subr.bf16.mxu0 %v7423_v15  ;;  %5622 = vmatprep.subr.bf16.mxu1 %v7425_v0  ;;  %v752_v0 = vsub.s32 1, %v747_v9  ;;  %v760_v15 = vsub.s32 3, %v747_v9 }
  0x97   :  { %v7548_v54 = vrot.slane %v166_v6, %v752_v0  ;;  %v7550_v53 = vrot.slane %v166_v6, %v760_v15 }
  0x98   :  { %5592 = vmatpush1.bf16.msra.mxu0 %v7429_v21  ;;  %5624 = vmatpush1.bf16.msra.mxu1 %v7431_v22  ;;  %v748_v22 = vsub.s32 0, %v747_v9  ;;  %v756_v21 = vsub.s32 2, %v747_v9 }
  0x99   :  { %5626 = vmatprep.subr.bf16.mxu0 %v7335_v40  ;;  %5658 = vmatprep.subr.bf16.mxu1 %v7337_v41  ;;  %9286 = vst [vmem:[#allocation70_spill] sm:$0xff] %v7548_v54 }
  0x9a   :  { %v7544_v10 = vrot.slane %v166_v6, %v748_v22  ;;  %v7546_v59 = vrot.slane %v166_v6, %v756_v21 }
  0x9c   :  { %9284 = vst [vmem:[#allocation68_spill] sm:$0xff] %v7544_v10  ;;  %9285 = vst [vmem:[#allocation69_spill] sm:$0xff] %v7546_v59 }
 0x12e   :  { %v7477_v1 = vpop.f32.mrb[0].mxu0  ;;  %v7479_v23 = vpop.f32.mrb[0].mxu1 }
 0x12f   :  { %9259 = vst [vmem:[#allocation43_spill] sm:$0xff] %v7477_v1  ;;  %9260 = vst [vmem:[#allocation44_spill] sm:$0xff] %v7479_v23  ;;  %v7481_v26 = vpop.f32.mrb[1].mxu0  ;;  %v7483_v27 = vpop.f32.mrb[1].mxu1 }
 0x130   :  { %9261 = vst [vmem:[#allocation45_spill] sm:$0xff] %v7481_v26  ;;  %v7485_v30 = vpop.f32.mrb[2].mxu0  ;;  %v7487_v31 = vpop.f32.mrb[2].mxu1 }
 0x131   :  { %9262 = vst [vmem:[#allocation46_spill] sm:$0xff] %v7485_v30  ;;  %9263 = vst [vmem:[#allocation47_spill] sm:$0xff] %v7487_v31  ;;  %v7489_v32 = vpop.f32.mrb[3].mxu0  ;;  %v7491_v33 = vpop.f32.mrb[3].mxu1 }
 0x132   :  { %9264 = vst [vmem:[#allocation48_spill] sm:$0xff] %v7489_v32  ;;  %9265 = vst [vmem:[#allocation49_spill] sm:$0xff] %v7491_v33 }
 0x136   :  { %v7493_v34 = vpop.f32.mrb[4].mxu0  ;;  %v7495_v35 = vpop.f32.mrb[4].mxu1 }
 0x137   :  { %9266 = vst [vmem:[#allocation50_spill] sm:$0xff] %v7493_v34  ;;  %9267 = vst [vmem:[#allocation51_spill] sm:$0xff] %v7495_v35  ;;  %v7497_v36 = vpop.f32.mrb[5].mxu0  ;;  %v7499_v39 = vpop.f32.mrb[5].mxu1 }
 0x138   :  { %9268 = vst [vmem:[#allocation52_spill] sm:$0xff] %v7497_v36  ;;  %v7501_v42 = vpop.f32.mrb[6].mxu0  ;;  %v7503_v45 = vpop.f32.mrb[6].mxu1 }
 0x139   :  { %9269 = vst [vmem:[#allocation53_spill] sm:$0xff] %v7501_v42  ;;  %9270 = vst [vmem:[#allocation54_spill] sm:$0xff] %v7503_v45  ;;  %v7505_v46 = vpop.f32.mrb[7].mxu0  ;;  %v7507_v47 = vpop.f32.mrb[7].mxu1 }
 0x13a   :  { %9271 = vst [vmem:[#allocation55_spill] sm:$0xff] %v7505_v46 }
 0x13e   :  { %v7509_v48 = vpop.f32.mrb[8].mxu0  ;;  %v7511_v49 = vpop.f32.mrb[8].mxu1 }
 0x13f   :  { %9272 = vst [vmem:[#allocation56_spill] sm:$0xff] %v7509_v48  ;;  %9273 = vst [vmem:[#allocation57_spill] sm:$0xff] %v7511_v49  ;;  %v7513_v52 = vpop.f32.mrb[9].mxu0  ;;  %v7515_v57 = vpop.f32.mrb[9].mxu1 }
 0x140   :  { %9274 = vst [vmem:[#allocation58_spill] sm:$0xff] %v7513_v52  ;;  %v7517_v58 = vpop.f32.mrb[10].mxu0  ;;  %v7519_v63 = vpop.f32.mrb[10].mxu1 }
 0x141   :  { %9275 = vst [vmem:[#allocation59_spill] sm:$0xff] %v7517_v58  ;;  %9276 = vst [vmem:[#allocation60_spill] sm:$0xff] %v7519_v63  ;;  %v7521_v2 = vpop.f32.mrb[11].mxu0  ;;  %v7523_v5 = vpop.f32.mrb[11].mxu1 }
 0x142   :  { %9277 = vst [vmem:[#allocation61_spill] sm:$0xff] %v7521_v2 }
 0x146   :  { %v7525_v7 = vpop.f32.mrb[12].mxu0  ;;  %v7527_v8 = vpop.f32.mrb[12].mxu1 }
 0x147   :  { %9278 = vst [vmem:[#allocation62_spill] sm:$0xff] %v7525_v7  ;;  %9279 = vst [vmem:[#allocation63_spill] sm:$0xff] %v7527_v8  ;;  %v7529_v12 = vpop.f32.mrb[13].mxu0  ;;  %v7531_v18 = vpop.f32.mrb[13].mxu1 }
 0x148   :  { %9280 = vst [vmem:[#allocation64_spill] sm:$0xff] %v7529_v12  ;;  %v7533_v19 = vpop.f32.mrb[14].mxu0  ;;  %v7535_v20 = vpop.f32.mrb[14].mxu1 }
 0x149   :  { %9281 = vst [vmem:[#allocation65_spill] sm:$0xff] %v7533_v19  ;;  %9282 = vst [vmem:[#allocation66_spill] sm:$0xff] %v7535_v20  ;;  %v7537_v41 = vpop.f32.mrb[15].mxu0  ;;  %v7539_v40 = vpop.f32.mrb[15].mxu1 }
 0x14a   :  { %9283 = vst [vmem:[#allocation67_spill] sm:$0xff] %v7537_v41 }
 0x14e   :  { %v573_v11 = vpop.f32.mrb[16].mxu0  ;;  %v644_v60 = vpop.f32.mrb[16].mxu1 }
 0x14f   :  { %v653_v44 = vrot.slane %v573_v11, 1  ;;  %v657_v43 = vrot.slane %v573_v11, 2  ;;  %v661_v38 = vrot.slane %v573_v11, 3  ;;  %v665_v37 = vrot.slane %v573_v11, 4  ;;  %v7552_v29 = vpop.f32.mrb[17].mxu0  ;;  %v7554_v9 = vpop.f32.mrb[17].mxu1 }
 0x150   :  { %v669_v28 = vrot.slane %v573_v11, 5  ;;  %v673_v25 = vrot.slane %v573_v11, 6  ;;  %v677_v24 = vrot.slane %v573_v11, 7  ;;  %v713_v22 = vadd.f32 %v573_v11, %v7477_v1 }
 0x151   :  { %v717_v21 = vadd.f32 %v653_v44, %v7485_v30  ;;  %v721_v0 = vadd.f32 %v657_v43, %v7493_v34  ;;  %v725_v15 = vadd.f32 %v661_v38, %v7501_v42  ;;  %v729_v6 = vadd.f32 %v665_v37, %v7509_v48 }
 0x152   :  { %v733_v17 = vadd.f32 %v669_v28, %v7517_v58  ;;  %v737_v16 = vadd.f32 %v673_v25, %v7525_v7  ;;  %v741_v14 = vadd.f32 %v677_v24, %v7533_v19  ;;  %v766_v13 = vadd.f32 %v7544_v10, %v713_v22 }
 0x153   :  { %v770_v4 = vadd.f32 %v7544_v10, %v717_v21  ;;  %v774_v11 = vadd.f32 %v7544_v10, %v721_v0  ;;  %v778_v44 = vadd.f32 %v7544_v10, %v725_v15  ;;  %v782_v43 = vadd.f32 %v7544_v10, %v729_v6 }
 0x154   :  { %v786_v38 = vadd.f32 %v7544_v10, %v733_v17  ;;  %v790_v37 = vadd.f32 %v7544_v10, %v737_v16  ;;  %v794_v28 = vadd.f32 %v7544_v10, %v741_v14  ;;  %v5177_v58 = vmul.f32 -1.442695, %v766_v13 }
 0x155   :  { %v5179_v25 = vmul.f32 -1.442695, %v770_v4  ;;  %v5181_v7 = vmul.f32 -1.442695, %v774_v11  ;;  %v5183_v24 = vmul.f32 -1.442695, %v778_v44  ;;  %v715_v22 = vadd.f32 %v644_v60, %v7479_v23 }
 0x156   :  { %6075 = vpow2.f32 %v5177_v58  ;;  %v5185_v21 = vmul.f32 -1.442695, %v782_v43  ;;  %v5187_v19 = vmul.f32 -1.442695, %v786_v38  ;;  %v5189_v0 = vmul.f32 -1.442695, %v790_v37 }
 0x157   :  { %6077 = vpow2.f32 %v5179_v25  ;;  %v5191_v15 = vmul.f32 -1.442695, %v794_v28  ;;  %v655_v48 = vrot.slane %v644_v60, 1  ;;  %v659_v6 = vrot.slane %v644_v60, 2 }
 0x158   :  { %6079 = vpow2.f32 %v5181_v7  ;;  %v663_v17 = vrot.slane %v644_v60, 3  ;;  %v667_v42 = vrot.slane %v644_v60, 4  ;;  %v671_v16 = vrot.slane %v644_v60, 5 }
 0x159   :  { %6081 = vpow2.f32 %v5183_v24  ;;  %v675_v14 = vrot.slane %v644_v60, 6  ;;  %v679_v13 = vrot.slane %v644_v60, 7  ;;  %v719_v4 = vadd.f32 %v655_v48, %v7487_v31 }
 0x15a   :  { %6083 = vpow2.f32 %v5185_v21  ;;  %v723_v11 = vadd.f32 %v659_v6, %v7495_v35  ;;  %v727_v58 = vadd.f32 %v663_v17, %v7503_v45  ;;  %v731_v44 = vadd.f32 %v667_v42, %v7511_v49 }
 0x15b   :  { %6085 = vpow2.f32 %v5187_v19  ;;  %v735_v43 = vadd.f32 %v671_v16, %v7519_v63  ;;  %v739_v7 = vadd.f32 %v675_v14, %v7527_v8  ;;  %v743_v38 = vadd.f32 %v679_v13, %v7535_v20 }
 0x15c   :  { %6087 = vpow2.f32 %v5189_v0  ;;  %v768_v37 = vadd.f32 %v7546_v59, %v715_v22  ;;  %v772_v60 = vadd.f32 %v7546_v59, %v719_v4  ;;  %v776_v48 = vadd.f32 %v7546_v59, %v723_v11 }
 0x15d   :  { %6089 = vpow2.f32 %v5191_v15  ;;  %v780_v28 = vadd.f32 %v7546_v59, %v727_v58  ;;  %v784_v25 = vadd.f32 %v7546_v59, %v731_v44  ;;  %v7586_v42 = vadd.f32 %v7546_v59, %v735_v43 }
 0x15e   :  { %v7589_v19 = vadd.f32 %v7546_v59, %v739_v7  ;;  %v7592_v24 = vadd.f32 %v7546_v59, %v743_v38  ;;  %6091 = vtanh.f32 %v768_v37  ;;  %v654_v22 = vrot.slane %v7552_v29, 1 }
 0x15f   :  { %6093 = vtanh.f32 %v772_v60  ;;  %v658_v21 = vrot.slane %v7552_v29, 2  ;;  %v662_v0 = vrot.slane %v7552_v29, 3  ;;  %v666_v15 = vrot.slane %v7552_v29, 4 }
 0x160   :  { %v6076_v6 = vpop.eup %6075  ;;  %6095 = vtanh.f32 %v776_v48  ;;  %v670_v17 = vrot.slane %v7552_v29, 5  ;;  %v674_v16 = vrot.slane %v7552_v29, 6  ;;  %v678_v14 = vrot.slane %v7552_v29, 7 }
 0x161   :  { %v6078_v13 = vpop.eup %6077  ;;  %v846_v4 = vadd.f32 1.0, %v6076_v6  ;;  %6097 = vtanh.f32 %v780_v28  ;;  %v714_v11 = vadd.f32 %v7552_v29, %v7481_v26  ;;  %v718_v58 = vadd.f32 %v654_v22, %v7489_v32 }
 0x162   :  { %v6080_v44 = vpop.eup %6079  ;;  %v848_v43 = vadd.f32 1.0, %v6078_v13  ;;  %6099 = vtanh.f32 %v784_v25  ;;  %v722_v7 = vadd.f32 %v658_v21, %v7497_v36  ;;  %v726_v38 = vadd.f32 %v662_v0, %v7505_v46 }
 0x163   :  { %v6082_v37 = vpop.eup %6081  ;;  %v850_v60 = vadd.f32 1.0, %v6080_v44  ;;  %6101 = vrcp.f32 %v846_v4  ;;  %v730_v48 = vadd.f32 %v666_v15, %v7513_v52  ;;  %v734_v6 = vadd.f32 %v670_v17, %v7521_v2 }
 0x164   :  { %v6084_v28 = vpop.eup %6083  ;;  %v852_v59 = vadd.f32 1.0, %v6082_v37  ;;  %6103 = vrcp.f32 %v848_v43  ;;  %v738_v29 = vadd.f32 %v674_v16, %v7529_v12  ;;  %v742_v22 = vadd.f32 %v678_v14, %v7537_v41 }
 0x165   :  { %v6086_v13 = vpop.eup %6085  ;;  %v854_v25 = vadd.f32 1.0, %v6084_v28  ;;  %6105 = vrcp.f32 %v850_v60  ;;  %v767_v21 = vadd.f32 %v7548_v54, %v714_v11  ;;  %v771_v0 = vadd.f32 %v7548_v54, %v718_v58 }
 0x166   :  { %v6088_v44 = vpop.eup %6087  ;;  %v856_v4 = vadd.f32 1.0, %v6086_v13  ;;  %6107 = vrcp.f32 %v852_v59  ;;  %v775_v15 = vadd.f32 %v7548_v54, %v722_v7  ;;  %v779_v17 = vadd.f32 %v7548_v54, %v726_v38 }
 0x167   :  { %v6090_v37 = vpop.eup %6089  ;;  %v858_v43 = vadd.f32 1.0, %v6088_v44  ;;  %6109 = vrcp.f32 %v854_v25  ;;  %v783_v16 = vadd.f32 %v7548_v54, %v730_v48  ;;  %v787_v14 = vadd.f32 %v7548_v54, %v734_v6 }
 0x168   :  { %v6092_v28 = vpop.eup %6091  ;;  %v860_v60 = vadd.f32 1.0, %v6090_v37  ;;  %6111 = vrcp.f32 %v856_v4  ;;  %v791_v11 = vadd.f32 %v7548_v54, %v738_v29  ;;  %v795_v58 = vadd.f32 %v7548_v54, %v742_v22 }
 0x169   :  { %v6094_v13 = vpop.eup %6093  ;;  %6113 = vrcp.f32 %v858_v43  ;;  %v5178_v59 = vmul.f32 -1.442695, %v767_v21  ;;  %v5180_v7 = vmul.f32 -1.442695, %v771_v0  ;;  %v5182_v41 = vmul.f32 -1.442695, %v775_v15 }
 0x16a   :  { %v6096_v38 = vpop.eup %6095  ;;  %6115 = vrcp.f32 %v860_v60  ;;  %v5184_v44 = vmul.f32 -1.442695, %v779_v17  ;;  %v5186_v25 = vmul.f32 -1.442695, %v783_v16  ;;  %v5188_v12 = vmul.f32 -1.442695, %v787_v14 }
 0x16b   :  { %v6098_v48 = vpop.eup %6097  ;;  %6117 = vtanh.f32 %v7586_v42  ;;  %v5190_v6 = vmul.f32 -1.442695, %v791_v11  ;;  %v5192_v37 = vmul.f32 -1.442695, %v795_v58  ;;  %v656_v4 = vrot.slane %v7554_v9, 1 }
 0x16c   :  { %v6100_v29 = vpop.eup %6099  ;;  %6119 = vtanh.f32 %v7589_v19  ;;  %v660_v22 = vrot.slane %v7554_v9, 2  ;;  %v664_v21 = vrot.slane %v7554_v9, 3  ;;  %v668_v0 = vrot.slane %v7554_v9, 4 }
 0x16d   :  { %v6102_v15 = vpop.eup %6101  ;;  %6121 = vtanh.f32 %v7592_v24  ;;  %v672_v17 = vrot.slane %v7554_v9, 5  ;;  %v676_v42 = vrot.slane %v7554_v9, 6  ;;  %v680_v43 = vrot.slane %v7554_v9, 7 }
 0x16e   :  { %v6104_v16 = vpop.eup %6103  ;;  %v7628_v14 = vmul.f32 %v6102_v15, %v6092_v28  ;;  %6123 = vpow2.f32 %v5178_v59  ;;  %v716_v19 = vadd.f32 %v7554_v9, %v7483_v27  ;;  %v720_v60 = vadd.f32 %v656_v4, %v7491_v33 }
 0x16f   :  { %v6106_v11 = vpop.eup %6105  ;;  %v7633_v58 = vmul.f32 %v6104_v16, %v6094_v13  ;;  %6125 = vpow2.f32 %v5180_v7  ;;  %v724_v24 = vadd.f32 %v660_v22, %v7499_v39  ;;  %v728_v54 = vadd.f32 %v664_v21, %v7507_v47 }
 0x170   :  { %v6108_v2 = vpop.eup %6107  ;;  %v7637_v52 = vmul.f32 %v6106_v11, %v6096_v38  ;;  %6127 = vpow2.f32 %v5182_v41  ;;  %v732_v28 = vadd.f32 %v668_v0, %v7515_v57  ;;  %v736_v59 = vadd.f32 %v672_v17, %v7523_v5 }
 0x171   :  { %v6110_v15 = vpop.eup %6109  ;;  %6129 = vpow2.f32 %v5184_v44  ;;  %v740_v9 = vadd.f32 %v676_v42, %v7531_v18  ;;  %v744_v13 = vadd.f32 %v680_v43, %v7539_v40  ;;  %v769_v7 = vadd.f32 %v7550_v53, %v716_v19 }
 0x172   :  { %v6112_v4 = vpop.eup %6111  ;;  %6131 = vpow2.f32 %v5186_v25  ;;  %v773_v22 = vadd.f32 %v7550_v53, %v720_v60  ;;  %v777_v38 = vadd.f32 %v7550_v53, %v724_v24  ;;  %v781_v41 = vadd.f32 %v7550_v53, %v728_v54 }
 0x173   :  { %v6114_v21 = vpop.eup %6113  ;;  %6133 = vpow2.f32 %v5188_v12  ;;  %v785_v0 = vadd.f32 %v7550_v53, %v732_v28  ;;  %v5193_v44 = vmul.f32 -1.442695, %v769_v7  ;;  %v7648_v24 = vmul.f32 %v6108_v2, %v6098_v48 }
 0x174   :  { %v6116_v17 = vpop.eup %6115  ;;  %6135 = vpow2.f32 %v5190_v6  ;;  %v5194_v42 = vmul.f32 -1.442695, %v773_v22  ;;  %v5195_v43 = vmul.f32 -1.442695, %v777_v38  ;;  %v5196_v19 = vmul.f32 -1.442695, %v781_v41 }
 0x175   :  { %v6118_v16 = vpop.eup %6117  ;;  %6137 = vpow2.f32 %v5192_v37  ;;  %v5197_v25 = vmul.f32 -1.442695, %v785_v0  ;;  %v7650_v54 = vmul.f32 %v6110_v15, %v6100_v29  ;;  %v789_v2 = vadd.f32 %v7550_v53, %v736_v59 }
 0x176   :  { %v6120_v11 = vpop.eup %6119  ;;  %6139 = vpow2.f32 %v5193_v44  ;;  %v7652_v12 = vmul.f32 %v6118_v16, %v6112_v4  ;;  %v793_v15 = vadd.f32 %v7550_v53, %v740_v9 }
 0x177   :  { %v6122_v60 = vpop.eup %6121  ;;  %6141 = vpow2.f32 %v5194_v42  ;;  %v7654_v6 = vmul.f32 %v6120_v11, %v6114_v21 }
 0x178   :  { %v6124_v28 = vpop.eup %6123  ;;  %6143 = vpow2.f32 %v5195_v43  ;;  %v7656_v7 = vmul.f32 %v6122_v60, %v6116_v17  ;;  %v5199_v60 = vmul.f32 -1.442695, %v793_v15 }
 0x179   :  { %v6126_v37 = vpop.eup %6125  ;;  %v847_v22 = vadd.f32 1.0, %v6124_v28  ;;  %6145 = vpow2.f32 %v5196_v19  ;;  %v5198_v19 = vmul.f32 -1.442695, %v789_v2  ;;  %v797_v28 = vadd.f32 %v7550_v53, %v744_v13 }
 0x17a   :  { %v6128_v38 = vpop.eup %6127  ;;  %v849_v41 = vadd.f32 1.0, %v6126_v37  ;;  %6147 = vpow2.f32 %v5197_v25 }
 0x17b   :  { %v6130_v0 = vpop.eup %6129  ;;  %v851_v44 = vadd.f32 1.0, %v6128_v38  ;;  %6149 = vrcp.f32 %v847_v22 }
 0x17c   :  { %v6132_v48 = vpop.eup %6131  ;;  %v853_v29 = vadd.f32 1.0, %v6130_v0  ;;  %6151 = vrcp.f32 %v849_v41  ;;  %v7661_v0 = vld [vmem:[#allocation2] sm:$0xff] }
 0x17d   :  { %v6134_v4 = vpop.eup %6133  ;;  %v855_v21 = vadd.f32 1.0, %v6132_v48  ;;  %6153 = vrcp.f32 %v851_v44  ;;  %v951_v44 = vrot.slane %v7661_v0, 1  ;;  %v953_v13 = vrot.slane %v7661_v0, 3 }
 0x17e   :  { %v6136_v17 = vpop.eup %6135  ;;  %v857_v42 = vadd.f32 1.0, %v6134_v4  ;;  %6155 = vrcp.f32 %v853_v29  ;;  %v952_v29 = vrot.slane %v7661_v0, 2  ;;  %v5200_v4 = vmul.f32 -1.442695, %v797_v28 }
 0x17f   :  { %v6138_v16 = vpop.eup %6137  ;;  %v859_v43 = vadd.f32 1.0, %v6136_v17  ;;  %6157 = vrcp.f32 %v855_v21 }
 0x180   :  { %v6140_v11 = vpop.eup %6139  ;;  %v861_v25 = vadd.f32 1.0, %v6138_v16  ;;  %6159 = vrcp.f32 %v857_v42  ;;  %v954_v42 = vrot.slane %v7661_v0, 4 }
 0x181   :  { %v6142_v59 = vpop.eup %6141  ;;  %6161 = vrcp.f32 %v859_v43  ;;  %v926_v37 = vadd.f32 1.0, %v6140_v11 }
 0x182   :  { %v6144_v9 = vpop.eup %6143  ;;  %6163 = vrcp.f32 %v861_v25  ;;  %v927_v22 = vadd.f32 1.0, %v6142_v59 }
 0x183   :  { %v6146_v38 = vpop.eup %6145  ;;  %6165 = vpow2.f32 %v5198_v19  ;;  %v928_v41 = vadd.f32 1.0, %v6144_v9  ;;  %v955_v19 = vrot.slane %v7661_v0, 5  ;;  %v957_v9 = vrot.slane %v7661_v0, 7 }
 0x184   :  { %v6148_v2 = vpop.eup %6147  ;;  %6167 = vpow2.f32 %v5199_v60  ;;  %v929_v48 = vadd.f32 1.0, %v6146_v38  ;;  %v956_v60 = vrot.slane %v7661_v0, 6 }
 0x185   :  { %v6150_v15 = vpop.eup %6149  ;;  %6169 = vrcp.f32 %v926_v37  ;;  %v930_v17 = vadd.f32 1.0, %v6148_v2 }
 0x186   :  { %v6152_v21 = vpop.eup %6151  ;;  %6171 = vrcp.f32 %v927_v22  ;;  %v966_v16 = vmul.f32 %v7661_v0, %v6150_v15 }
 0x187   :  { %v6154_v43 = vpop.eup %6153  ;;  %6173 = vrcp.f32 %v928_v41  ;;  %v967_v11 = vmul.f32 %v6152_v21, %v951_v44 }
 0x188   :  { %v6156_v25 = vpop.eup %6155  ;;  %6175 = vrcp.f32 %v929_v48  ;;  %v968_v59 = vmul.f32 %v6154_v43, %v952_v29  ;;  %v7671_v28 = vadd.f32 %v7628_v14, %v966_v16 }
 0x189   :  { %v6158_v37 = vpop.eup %6157  ;;  %6177 = vpow2.f32 %v5200_v4  ;;  %v969_v22 = vmul.f32 %v6156_v25, %v953_v13  ;;  %v7675_v38 = vadd.f32 %v7633_v58, %v967_v11 }
 0x18a   :  { %v6160_v41 = vpop.eup %6159  ;;  %6179 = vrcp.f32 %v930_v17  ;;  %v970_v2 = vmul.f32 %v6158_v37, %v954_v42  ;;  %v7678_v44 = vadd.f32 %v7637_v52, %v968_v59 }
 0x18b   :  { %v6162_v48 = vpop.eup %6161  ;;  %v971_v15 = vmul.f32 %v6160_v41, %v955_v19  ;;  %v7681_v29 = vadd.f32 %v7648_v24, %v969_v22  ;;  %6181 = vtanh.f32 %v7671_v28 }
 0x18c   :  { %9287 = vst [vmem:[#allocation71_spill] sm:$0xff] %v7678_v44  ;;  %v6164_v14 = vpop.eup %6163  ;;  %v972_v4 = vmul.f32 %v6162_v48, %v956_v60  ;;  %v7685_v13 = vadd.f32 %v7650_v54, %v970_v2  ;;  %6183 = vtanh.f32 %v7675_v38 }
 0x18d   :  { %9288 = vst [vmem:[#allocation72_spill] sm:$0xff] %v7681_v29  ;;  %v6166_v58 = vpop.eup %6165  ;;  %v973_v21 = vmul.f32 %v6164_v14, %v957_v9  ;;  %v7689_v17 = vadd.f32 %v7652_v12, %v971_v15  ;;  %6185 = vtanh.f32 %v7678_v44 }
 0x18e   :  { %9289 = vst [vmem:[#allocation73_spill] sm:$0xff] %v7685_v13  ;;  %v6168_v52 = vpop.eup %6167  ;;  %v931_v42 = vadd.f32 1.0, %v6166_v58  ;;  %v7693_v24 = vadd.f32 %v7654_v6, %v972_v4  ;;  %6187 = vtanh.f32 %v7681_v29 }
 0x18f   :  { %9290 = vst [vmem:[#allocation74_spill] sm:$0xff] %v7689_v17  ;;  %v6170_v16 = vpop.eup %6169  ;;  %v932_v43 = vadd.f32 1.0, %v6168_v52  ;;  %v7697_v54 = vadd.f32 %v7656_v7, %v973_v21  ;;  %6189 = vtanh.f32 %v7685_v13 }
 0x190   :  { %9291 = vst [vmem:[#allocation75_spill] sm:$0xff] %v7693_v24  ;;  %v6172_v19 = vpop.eup %6171  ;;  %6191 = vrcp.f32 %v931_v42 }
 0x191   :  { %9292 = vst [vmem:[#allocation76_spill] sm:$0xff] %v7697_v54  ;;  %v6174_v12 = vpop.eup %6173  ;;  %6193 = vrcp.f32 %v932_v43 }
 0x192   :  { %v6176_v11 = vpop.eup %6175  ;;  %6195 = vtanh.f32 %v7689_v17 }
 0x193   :  { %v6178_v25 = vpop.eup %6177  ;;  %6197 = vtanh.f32 %v7693_v24 }
 0x194   :  { %v6180_v6 = vpop.eup %6179  ;;  %v933_v60 = vadd.f32 1.0, %v6178_v25  ;;  %6199 = vtanh.f32 %v7697_v54 }
 0x195   :  { %v6182_v59 = vpop.eup %6181 }
 0x196   :  { %v6184_v37 = vpop.eup %6183  ;;  %6201 = vrcp.f32 %v933_v60  ;;  %v998_v7 = vmul.f32 %v6182_v59, %v6170_v16 }
 0x197   :  { %v6186_v9 = vpop.eup %6185  ;;  %v999_v22 = vmul.f32 %v6184_v37, %v6172_v19 }
 0x198   :  { %v6188_v41 = vpop.eup %6187  ;;  %v1000_v2 = vmul.f32 %v6186_v9, %v6174_v12  ;;  %v5433_v48 = vpack.c.bf16 %v998_v7, %v998_v7 }
 0x199   :  { %v6190_v15 = vpop.eup %6189  ;;  %v1001_v14 = vmul.f32 %v6188_v41, %v6176_v11  ;;  %v5434_v4 = vpack.c.bf16 %v999_v22, %v999_v22  ;;  %v1078_v58 = vrot.slane %v999_v22, 7 }
 0x19a   :  { %v6192_v21 = vpop.eup %6191  ;;  %v1002_v52 = vmul.f32 %v6190_v15, %v6180_v6  ;;  %v5435_v42 = vpack.c.bf16 %v1000_v2, %v1000_v2  ;;  %v1038_v43 = vunpack.c.l.b16 %v5433_v48  ;;  %v1080_v16 = vrot.slane %v1000_v2, 6 }
 0x19b   :  { %v6194_v25 = vpop.eup %6193  ;;  %v5436_v19 = vpack.c.bf16 %v1001_v14, %v1001_v14  ;;  %v1039_v60 = vunpack.c.l.b16 %v5434_v4  ;;  %v1079_v59 = vsel %vm1047_vm0, %v1078_v58, %v998_v7  ;;  %v1082_v37 = vrot.slane %v1001_v14, 5 }
 0x19c   :  { %v6196_v12 = vpop.eup %6195  ;;  %v5437_v9 = vpack.c.bf16 %v1002_v52, %v1002_v52  ;;  %v1040_v54 = vunpack.c.l.b16 %v5435_v42  ;;  %v1081_v24 = vsel %vm1050_vm1, %v1080_v16, %v1079_v59  ;;  %v1084_v11 = vrot.slane %v1002_v52, 4 }
 0x19d   :  { %v6198_v41 = vpop.eup %6197  ;;  %v1003_v17 = vmul.f32 %v6196_v12, %v6192_v21  ;;  %v1041_v22 = vunpack.c.l.b16 %v5436_v19  ;;  %v1046_v13 = vrot.slane %v1039_v60, 7  ;;  %v1083_v6 = vsel %vm1053_vm2, %v1082_v37, %v1081_v24 }
 0x19e   :  { %v6200_v48 = vpop.eup %6199  ;;  %v1004_v2 = vmul.f32 %v6198_v41, %v6194_v25  ;;  %v1042_v15 = vunpack.c.l.b16 %v5437_v9  ;;  %v1049_v29 = vrot.slane %v1040_v54, 6  ;;  %v1085_v4 = vsel %vm1056_vm3, %v1084_v11, %v1083_v6 }
 0x19f   :  { %v5438_v7 = vpack.c.bf16 %v1003_v17, %v1003_v17  ;;  %v1048_v14 = vsel %vm1047_vm0, %v1046_v13, %v1038_v43  ;;  %v1052_v58 = vrot.slane %v1041_v22, 5  ;;  %v1086_v42 = vrot.slane %v1003_v17, 3 }
 0x1a0   :  { %v6202_v44 = vpop.eup %6201  ;;  %v5439_v16 = vpack.c.bf16 %v1004_v2, %v1004_v2  ;;  %v1051_v52 = vsel %vm1050_vm1, %v1049_v29, %v1048_v14  ;;  %v1055_v21 = vrot.slane %v1042_v15, 4  ;;  %v1088_v19 = vrot.slane %v1004_v2, 2  ;;  %v9293_v2 = vld [vmem:[#allocation20_spill] sm:$0xff]  ;;  %v9294_v15 = vld [vmem:[#allocation21_spill] sm:$0xff] }
 0x1a1   :  { %v1005_v60 = vmul.f32 %v6202_v44, %v6200_v48  ;;  %v1043_v59 = vunpack.c.l.b16 %v5438_v7  ;;  %v1054_v24 = vsel %vm1053_vm2, %v1052_v58, %v1051_v52  ;;  %v1087_v25 = vsel %vm1059_vm4, %v1086_v42, %v1085_v4  ;;  %v9295_v4 = vld [vmem:[#allocation22_spill] sm:$0xff]  ;;  %v9296_v7 = vld [vmem:[#allocation23_spill] sm:$0xff]  ;;  %v9297_v14 = vld [vmem:[#allocation24_spill] sm:$0xff] }
 0x1a2   :  { %v1044_v54 = vunpack.c.l.b16 %v5439_v16  ;;  %v1057_v37 = vsel %vm1056_vm3, %v1055_v21, %v1054_v24  ;;  %v1089_v13 = vsel %vm1062_vm5, %v1088_v19, %v1087_v25  ;;  %v9298_v58 = vld [vmem:[#allocation25_spill] sm:$0xff]  ;;  %v9300_v42 = vld [vmem:[#allocation27_spill] sm:$0xff]  ;;  %v9301_v16 = vld [vmem:[#allocation28_spill] sm:$0xff] }
 0x1a3   :  { %v5440_v43 = vpack.c.bf16 %v1005_v60, %v1005_v60  ;;  %v1058_v17 = vrot.slane %v1043_v59, 3  ;;  %v1090_v12 = vrot.slane %v1005_v60, 1  ;;  %v9302_v52 = vld [vmem:[#allocation29_spill] sm:$0xff]  ;;  %v9303_v21 = vld [vmem:[#allocation30_spill] sm:$0xff]  ;;  %v9304_v19 = vld [vmem:[#allocation31_spill] sm:$0xff] }
 0x1a4   :  { %v1061_v9 = vrot.slane %v1044_v54, 2  ;;  %v9305_v60 = vld [vmem:[#allocation32_spill] sm:$0xff]  ;;  %v9306_v59 = vld [vmem:[#allocation33_spill] sm:$0xff]  ;;  %v9307_v24 = vld [vmem:[#allocation34_spill] sm:$0xff] }
 0x1a5   :  { %v1045_v11 = vunpack.c.l.b16 %v5440_v43  ;;  %v1060_v29 = vsel %vm1059_vm4, %v1058_v17, %v1057_v37  ;;  %v1091_v44 = vsel %vm1065_vm6, %v1090_v12, %v1089_v13  ;;  %v9308_v25 = vld [vmem:[#allocation35_spill] sm:$0xff]  ;;  %v9309_v54 = vld [vmem:[#allocation36_spill] sm:$0xff]  ;;  %v9310_v37 = vld [vmem:[#allocation37_spill] sm:$0xff] }
 0x1a6   :  { %v1063_v41 = vsel %vm1062_vm5, %v1061_v9, %v1060_v29  ;;  %1158 = vmatmul.mubr.f32.vlgmr.msra.gmra.mrb[18].mxu0 %v1091_v44  ;;  %1229 = vmatmul.mubr.f32.vlgmr.msra.gmra.mrb[18].mxu1 %v1091_v44  ;;  %v9311_v13 = vld [vmem:[#allocation38_spill] sm:$0xff]  ;;  %v9312_v43 = vld [vmem:[#allocation39_spill] sm:$0xff]  ;;  %v9313_v17 = vld [vmem:[#allocation40_spill] sm:$0xff] }
 0x1a7   :  { %v1064_v22 = vrot.slane %v1045_v11, 1  ;;  %5628 = vmatpush1.bf16.msra.mxu0 %v7339_v50  ;;  %5660 = vmatpush1.bf16.msra.mxu1 %v7341_v51  ;;  %v9314_v12 = vld [vmem:[#allocation41_spill] sm:$0xff]  ;;  %v9315_v9 = vld [vmem:[#allocation42_spill] sm:$0xff]  ;;  %v9317_v29 = vld [vmem:[#allocation19_spill] sm:$0xff] }
 0x1a8   :  { %5630 = vmatprep.subr.bf16.mxu0 %v7345_v55  ;;  %5662 = vmatprep.subr.bf16.mxu1 %v7347_v56  ;;  %v9316_v11 = vld [vmem:[#allocation18_spill] sm:$0xff] }
 0x1a9   :  { %v1066_v6 = vsel %vm1065_vm6, %v1064_v22, %v1063_v41  ;;  %1724 = vmatprep.mubr.f32.mxu0 %v7661_v0  ;;  %1795 = vmatprep.mubr.f32.mxu1 %v7661_v0  ;;  %v9299_v0 = vld [vmem:[#allocation26_spill] sm:$0xff] }
 0x1aa   :  { %v1067_v48 = vpack.c.b16 %v1066_v6, %v1066_v6 }
 0x1ab   :  { %5632 = vmatpush1.bf16.msra.mxu0 %v7351_v61  ;;  %5664 = vmatpush1.bf16.msra.mxu1 %v7353_v62 }
 0x1ac   :  { %1069 = vst [vmem:[#allocation10] sm:$0xf] %v1067_v48  ;;  %5634 = vmatprep.subr.bf16.mxu0 %v7357_v3  ;;  %5666 = vmatprep.subr.bf16.mxu1 %v9293_v2 }
 0x1af   :  { %5636 = vmatpush1.bf16.msra.mxu0 %v9294_v15  ;;  %5668 = vmatpush1.bf16.msra.mxu1 %v9295_v4 }
 0x1b0   :  { %5638 = vmatprep.subr.bf16.mxu0 %v9296_v7  ;;  %5670 = vmatprep.subr.bf16.mxu1 %v9297_v14 }
 0x1b3   :  { %5640 = vmatpush1.bf16.msra.mxu0 %v9298_v58  ;;  %5672 = vmatpush1.bf16.msra.mxu1 %v9299_v0 }
 0x1b4   :  { %5642 = vmatprep.subr.bf16.mxu0 %v9300_v42  ;;  %5674 = vmatprep.subr.bf16.mxu1 %v9301_v16  ;;  %v9322_v42 = vld [vmem:[#allocation65_spill] sm:$0xff] }
 0x1b7   :  { %5644 = vmatpush1.bf16.msra.mxu0 %v9302_v52  ;;  %5676 = vmatpush1.bf16.msra.mxu1 %v9303_v21  ;;  %v9321_v52 = vld [vmem:[#allocation62_spill] sm:$0xff] }
 0x1b8   :  { %5646 = vmatprep.subr.bf16.mxu0 %v9304_v19  ;;  %5678 = vmatprep.subr.bf16.mxu1 %v9305_v60  ;;  %v9320_v19 = vld [vmem:[#allocation59_spill] sm:$0xff] }
 0x1bb   :  { %5648 = vmatpush1.bf16.msra.mxu0 %v9306_v59  ;;  %5680 = vmatpush1.bf16.msra.mxu1 %v9307_v24  ;;  %v9319_v59 = vld [vmem:[#allocation56_spill] sm:$0xff] }
 0x1bc   :  { %5650 = vmatprep.subr.bf16.mxu0 %v9308_v25  ;;  %5682 = vmatprep.subr.bf16.mxu1 %v9309_v54 }
 0x1bf   :  { %5652 = vmatpush1.bf16.msra.mxu0 %v9310_v37  ;;  %5684 = vmatpush1.bf16.msra.mxu1 %v9311_v13 }
 0x1c0   :  { %5654 = vmatprep.subr.bf16.mxu0 %v9312_v43  ;;  %5686 = vmatprep.subr.bf16.mxu1 %v9313_v17 }
 0x1c3   :  { %5656 = vmatpush1.bf16.msra.mxu0 %v9314_v12  ;;  %5688 = vmatpush1.bf16.msra.mxu1 %v9315_v9 }
 0x1c4   :  { %5690 = vmatprep.subr.bf16.mxu0 %v9316_v11  ;;  %5722 = vmatprep.subr.bf16.mxu1 %v9317_v29  ;;  %v9318_v29 = vld [vmem:[#allocation53_spill] sm:$0xff] }
 0x279   :  { %v1159_v44 = vpop.f32.mrb[18].mxu0  ;;  %v1230_v41 = vpop.f32.mrb[18].mxu1 }
 0x27a   :  { %v1239_v22 = vrot.slane %v1159_v44, 7  ;;  %v1243_v6 = vrot.slane %v1159_v44, 1  ;;  %v1247_v48 = vrot.slane %v1159_v44, 2  ;;  %v1251_v37 = vrot.slane %v1159_v44, 3  ;;  %v7751_v54 = vpop.f32.mrb[19].mxu0  ;;  %v7753_v13 = vpop.f32.mrb[19].mxu1 }
 0x27b   :  { %v1255_v43 = vrot.slane %v1159_v44, 4  ;;  %v1259_v17 = vrot.slane %v1159_v44, 5  ;;  %v1263_v25 = vrot.slane %v1159_v44, 6  ;;  %v1303_v12 = vadd.f32 %v1159_v44, %v7485_v30 }
 0x27c   :  { %v1299_v9 = vadd.f32 %v1239_v22, %v7477_v1  ;;  %v1307_v11 = vadd.f32 %v1243_v6, %v7493_v34  ;;  %v1311_v24 = vadd.f32 %v1247_v48, %v9318_v29  ;;  %v1315_v60 = vadd.f32 %v1251_v37, %v9319_v59 }
 0x27d   :  { %v1319_v21 = vadd.f32 %v1255_v43, %v9320_v19  ;;  %v1323_v16 = vadd.f32 %v1259_v17, %v9321_v52  ;;  %v1327_v0 = vadd.f32 %v1263_v25, %v9322_v42  ;;  %v1335_v58 = vadd.f32 %v1303_v12, %v7544_v10 }
 0x27e   :  { %v1331_v14 = vadd.f32 %v1299_v9, %v7544_v10  ;;  %v1339_v44 = vadd.f32 %v1307_v11, %v7544_v10  ;;  %v1343_v22 = vadd.f32 %v1311_v24, %v7544_v10  ;;  %v1347_v6 = vadd.f32 %v1315_v60, %v7544_v10 }
 0x27f   :  { %v1351_v48 = vadd.f32 %v1319_v21, %v7544_v10  ;;  %v1355_v37 = vadd.f32 %v1323_v16, %v7544_v10  ;;  %v1359_v43 = vadd.f32 %v1327_v0, %v7544_v10  ;;  %v5211_v19 = vmul.f32 -1.442695, %v1335_v58 }
 0x280   :  { %v5209_v17 = vmul.f32 -1.442695, %v1331_v14  ;;  %v5213_v52 = vmul.f32 -1.442695, %v1339_v44  ;;  %v5215_v25 = vmul.f32 -1.442695, %v1343_v22  ;;  %v1305_v12 = vadd.f32 %v1230_v41, %v7487_v31 }
 0x281   :  { %6203 = vpow2.f32 %v5211_v19  ;;  %v5217_v9 = vmul.f32 -1.442695, %v1347_v6  ;;  %v5219_v42 = vmul.f32 -1.442695, %v1351_v48  ;;  %v5221_v11 = vmul.f32 -1.442695, %v1355_v37 }
 0x282   :  { %6205 = vpow2.f32 %v5209_v17  ;;  %v5223_v24 = vmul.f32 -1.442695, %v1359_v43  ;;  %v1241_v59 = vrot.slane %v1230_v41, 7  ;;  %v1245_v60 = vrot.slane %v1230_v41, 1  ;;  %v9323_v37 = vld [vmem:[#allocation69_spill] sm:$0xff] }
 0x283   :  { %6207 = vpow2.f32 %v5213_v52  ;;  %v1249_v21 = vrot.slane %v1230_v41, 2  ;;  %v1253_v29 = vrot.slane %v1230_v41, 3  ;;  %v1257_v16 = vrot.slane %v1230_v41, 4 }
 0x284   :  { %6209 = vpow2.f32 %v5215_v25  ;;  %v1261_v0 = vrot.slane %v1230_v41, 5  ;;  %v1265_v58 = vrot.slane %v1230_v41, 6  ;;  %v1301_v14 = vadd.f32 %v1241_v59, %v7479_v23 }
 0x285   :  { %6211 = vpow2.f32 %v5217_v9  ;;  %v1309_v44 = vadd.f32 %v1245_v60, %v7495_v35  ;;  %v1313_v19 = vadd.f32 %v1249_v21, %v7503_v45  ;;  %v1317_v22 = vadd.f32 %v1253_v29, %v7511_v49 }
 0x286   :  { %6213 = vpow2.f32 %v5219_v42  ;;  %v1321_v6 = vadd.f32 %v1257_v16, %v7519_v63  ;;  %v1325_v52 = vadd.f32 %v1261_v0, %v7527_v8  ;;  %v1329_v48 = vadd.f32 %v1265_v58, %v7535_v20  ;;  %v9325_v8 = vld [vmem:[#allocation61_spill] sm:$0xff] }
 0x287   :  { %6215 = vpow2.f32 %v5221_v11  ;;  %v1333_v43 = vadd.f32 %v1301_v14, %v9323_v37  ;;  %v1337_v41 = vadd.f32 %v1305_v12, %v9323_v37  ;;  %v1341_v59 = vadd.f32 %v1309_v44, %v9323_v37 }
 0x288   :  { %6217 = vpow2.f32 %v5223_v24  ;;  %v1345_v17 = vadd.f32 %v1313_v19, %v9323_v37  ;;  %v1349_v25 = vadd.f32 %v1317_v22, %v9323_v37  ;;  %v7785_v42 = vadd.f32 %v1321_v6, %v9323_v37 }
 0x289   :  { %v7788_v29 = vadd.f32 %v1325_v52, %v9323_v37  ;;  %v7791_v9 = vadd.f32 %v1329_v48, %v9323_v37  ;;  %6219 = vtanh.f32 %v1333_v43  ;;  %v1240_v11 = vrot.slane %v7751_v54, 7  ;;  %v9324_v37 = vld [vmem:[#allocation58_spill] sm:$0xff] }
 0x28a   :  { %6221 = vtanh.f32 %v1337_v41  ;;  %v1244_v12 = vrot.slane %v7751_v54, 1  ;;  %v1248_v24 = vrot.slane %v7751_v54, 2  ;;  %v1252_v60 = vrot.slane %v7751_v54, 3 }
 0x28b   :  { %v6204_v21 = vpop.eup %6203  ;;  %6223 = vtanh.f32 %v1341_v59  ;;  %v1256_v16 = vrot.slane %v7751_v54, 4  ;;  %v1260_v0 = vrot.slane %v7751_v54, 5  ;;  %v1264_v58 = vrot.slane %v7751_v54, 6 }
 0x28c   :  { %v6206_v14 = vpop.eup %6205  ;;  %v1413_v44 = vadd.f32 1.0, %v6204_v21  ;;  %6225 = vtanh.f32 %v1345_v17  ;;  %v1300_v19 = vadd.f32 %v1240_v11, %v7481_v26  ;;  %v1304_v22 = vadd.f32 %v7751_v54, %v7489_v32  ;;  %v9326_v11 = vld [vmem:[#allocation64_spill] sm:$0xff]  ;;  %v9327_v54 = vld [vmem:[#allocation67_spill] sm:$0xff] }
 0x28d   :  { %v6208_v6 = vpop.eup %6207  ;;  %v1411_v52 = vadd.f32 1.0, %v6206_v14  ;;  %6227 = vtanh.f32 %v1349_v25  ;;  %v1308_v48 = vadd.f32 %v1244_v12, %v7497_v36  ;;  %v1312_v43 = vadd.f32 %v1248_v24, %v7505_v46  ;;  %v9328_v12 = vld [vmem:[#allocation70_spill] sm:$0xff] }
 0x28e   :  { %v6210_v41 = vpop.eup %6209  ;;  %v1415_v59 = vadd.f32 1.0, %v6208_v6  ;;  %6229 = vrcp.f32 %v1413_v44  ;;  %v1316_v20 = vadd.f32 %v1252_v60, %v9324_v37  ;;  %v1320_v21 = vadd.f32 %v1256_v16, %v9325_v8 }
 0x28f   :  { %v6212_v17 = vpop.eup %6211  ;;  %v1417_v63 = vadd.f32 1.0, %v6210_v41  ;;  %6231 = vrcp.f32 %v1411_v52  ;;  %v1324_v26 = vadd.f32 %v1260_v0, %v9326_v11  ;;  %v1328_v32 = vadd.f32 %v1264_v58, %v9327_v54 }
 0x290   :  { %v6214_v14 = vpop.eup %6213  ;;  %v1419_v25 = vadd.f32 1.0, %v6212_v17  ;;  %6233 = vrcp.f32 %v1415_v59  ;;  %v1332_v36 = vadd.f32 %v1300_v19, %v9328_v12  ;;  %v1336_v24 = vadd.f32 %v1304_v22, %v9328_v12 }
 0x291   :  { %v6216_v6 = vpop.eup %6215  ;;  %v1421_v44 = vadd.f32 1.0, %v6214_v14  ;;  %6235 = vrcp.f32 %v1417_v63  ;;  %v1340_v60 = vadd.f32 %v1308_v48, %v9328_v12  ;;  %v1344_v16 = vadd.f32 %v1312_v43, %v9328_v12 }
 0x292   :  { %v6218_v41 = vpop.eup %6217  ;;  %v1423_v52 = vadd.f32 1.0, %v6216_v6  ;;  %6237 = vrcp.f32 %v1419_v25  ;;  %v1348_v0 = vadd.f32 %v1316_v20, %v9328_v12  ;;  %v1352_v58 = vadd.f32 %v1320_v21, %v9328_v12 }
 0x293   :  { %v6220_v17 = vpop.eup %6219  ;;  %v1425_v59 = vadd.f32 1.0, %v6218_v41  ;;  %6239 = vrcp.f32 %v1421_v44  ;;  %v1356_v19 = vadd.f32 %v1324_v26, %v9328_v12  ;;  %v1360_v22 = vadd.f32 %v1328_v32, %v9328_v12 }
 0x294   :  { %v6222_v14 = vpop.eup %6221  ;;  %6241 = vrcp.f32 %v1423_v52  ;;  %v5210_v63 = vmul.f32 -1.442695, %v1332_v36  ;;  %v5212_v48 = vmul.f32 -1.442695, %v1336_v24  ;;  %v5214_v54 = vmul.f32 -1.442695, %v1340_v60 }
 0x295   :  { %v6224_v43 = vpop.eup %6223  ;;  %6243 = vrcp.f32 %v1425_v59  ;;  %v5216_v6 = vmul.f32 -1.442695, %v1344_v16  ;;  %v5218_v25 = vmul.f32 -1.442695, %v1348_v0  ;;  %v5220_v11 = vmul.f32 -1.442695, %v1352_v58 }
 0x296   :  { %v6226_v20 = vpop.eup %6225  ;;  %6245 = vtanh.f32 %v7785_v42  ;;  %v5222_v21 = vmul.f32 -1.442695, %v1356_v19  ;;  %v5224_v41 = vmul.f32 -1.442695, %v1360_v22  ;;  %v1242_v44 = vrot.slane %v7753_v13, 7 }
 0x297   :  { %v6228_v26 = vpop.eup %6227  ;;  %6247 = vtanh.f32 %v7788_v29  ;;  %v1246_v32 = vrot.slane %v7753_v13, 1  ;;  %v1250_v36 = vrot.slane %v7753_v13, 2  ;;  %v1254_v24 = vrot.slane %v7753_v13, 3 }
 0x298   :  { %v6230_v60 = vpop.eup %6229  ;;  %6249 = vtanh.f32 %v7791_v9  ;;  %v1258_v16 = vrot.slane %v7753_v13, 4  ;;  %v1262_v42 = vrot.slane %v7753_v13, 5  ;;  %v1266_v52 = vrot.slane %v7753_v13, 6 }
 0x299   :  { %v6232_v0 = vpop.eup %6231  ;;  %v7827_v58 = vmul.f32 %v6230_v60, %v6222_v14  ;;  %6251 = vpow2.f32 %v5210_v63  ;;  %v1302_v29 = vadd.f32 %v1242_v44, %v7483_v27  ;;  %v1306_v59 = vadd.f32 %v7753_v13, %v7491_v33 }
 0x29a   :  { %v6234_v19 = vpop.eup %6233  ;;  %v7832_v22 = vmul.f32 %v6232_v0, %v6220_v17  ;;  %6253 = vpow2.f32 %v5212_v48  ;;  %v1310_v9 = vadd.f32 %v1246_v32, %v7499_v39  ;;  %v1314_v12 = vadd.f32 %v1250_v36, %v7507_v47 }
 0x29b   :  { %v6236_v8 = vpop.eup %6235  ;;  %v7836_v37 = vmul.f32 %v6234_v19, %v6224_v43  ;;  %6255 = vpow2.f32 %v5214_v54  ;;  %v1318_v14 = vadd.f32 %v1254_v24, %v7515_v57  ;;  %v1322_v63 = vadd.f32 %v1258_v16, %v7523_v5 }
 0x29c   :  { %v6238_v44 = vpop.eup %6237  ;;  %6257 = vpow2.f32 %v5216_v6  ;;  %v1326_v13 = vadd.f32 %v1262_v42, %v7531_v18  ;;  %v1330_v17 = vadd.f32 %v1266_v52, %v7539_v40  ;;  %v1334_v48 = vadd.f32 %v1302_v29, %v7550_v53 }
 0x29d   :  { %v6240_v60 = vpop.eup %6239  ;;  %6259 = vpow2.f32 %v5218_v25  ;;  %v1338_v32 = vadd.f32 %v1306_v59, %v7550_v53  ;;  %v1342_v43 = vadd.f32 %v1310_v9, %v7550_v53  ;;  %v1346_v54 = vadd.f32 %v1314_v12, %v7550_v53 }
 0x29e   :  { %v6242_v36 = vpop.eup %6241  ;;  %6261 = vpow2.f32 %v5220_v11  ;;  %v1350_v24 = vadd.f32 %v1318_v14, %v7550_v53  ;;  %v5225_v6 = vmul.f32 -1.442695, %v1334_v48  ;;  %v7847_v9 = vmul.f32 %v6236_v8, %v6226_v20 }
 0x29f   :  { %v6244_v16 = vpop.eup %6243  ;;  %6263 = vpow2.f32 %v5222_v21  ;;  %v5226_v42 = vmul.f32 -1.442695, %v1338_v32  ;;  %v5227_v52 = vmul.f32 -1.442695, %v1342_v43  ;;  %v5228_v29 = vmul.f32 -1.442695, %v1346_v54 }
 0x2a0   :  { %v6246_v0 = vpop.eup %6245  ;;  %6265 = vpow2.f32 %v5224_v41  ;;  %v5229_v25 = vmul.f32 -1.442695, %v1350_v24  ;;  %v7849_v12 = vmul.f32 %v6238_v44, %v6228_v26  ;;  %v1354_v8 = vadd.f32 %v1322_v63, %v7550_v53 }
 0x2a1   :  { %v6248_v19 = vpop.eup %6247  ;;  %6267 = vpow2.f32 %v5225_v6  ;;  %v7851_v11 = vmul.f32 %v6246_v0, %v6240_v60  ;;  %v1358_v44 = vadd.f32 %v1326_v13, %v7550_v53 }
 0x2a2   :  { %v6250_v59 = vpop.eup %6249  ;;  %6269 = vpow2.f32 %v5226_v42  ;;  %v7853_v21 = vmul.f32 %v6248_v19, %v6242_v36 }
 0x2a3   :  { %v6252_v14 = vpop.eup %6251  ;;  %6271 = vpow2.f32 %v5227_v52  ;;  %v7855_v48 = vmul.f32 %v6250_v59, %v6244_v16  ;;  %v5231_v59 = vmul.f32 -1.442695, %v1358_v44  ;;  %v1524_v44 = vrot.slane %v7675_v38, 7 }
 0x2a4   :  { %v6254_v41 = vpop.eup %6253  ;;  %v1412_v32 = vadd.f32 1.0, %v6252_v14  ;;  %6273 = vpow2.f32 %v5228_v29  ;;  %v5230_v29 = vmul.f32 -1.442695, %v1354_v8  ;;  %v1362_v14 = vadd.f32 %v1330_v17, %v7550_v53 }
 0x2a5   :  { %v6256_v43 = vpop.eup %6255  ;;  %v1414_v54 = vadd.f32 1.0, %v6254_v41  ;;  %6275 = vpow2.f32 %v5229_v25 }
 0x2a6   :  { %v6258_v24 = vpop.eup %6257  ;;  %v1416_v6 = vadd.f32 1.0, %v6256_v43  ;;  %6277 = vrcp.f32 %v1412_v32 }
 0x2a7   :  { %v6260_v20 = vpop.eup %6259  ;;  %v1418_v26 = vadd.f32 1.0, %v6258_v24  ;;  %6279 = vrcp.f32 %v1414_v54 }
 0x2a8   :  { %v6262_v60 = vpop.eup %6261  ;;  %v1420_v36 = vadd.f32 1.0, %v6260_v20  ;;  %6281 = vrcp.f32 %v1416_v6  ;;  %v1523_v6 = vrot.slane %v7671_v28, 7  ;;  %v9331_v28 = vld [vmem:[#allocation73_spill] sm:$0xff] }
 0x2a9   :  { %v6264_v16 = vpop.eup %6263  ;;  %v1422_v42 = vadd.f32 1.0, %v6262_v60  ;;  %6283 = vrcp.f32 %v1418_v26  ;;  %v5232_v26 = vmul.f32 -1.442695, %v1362_v14 }
 0x2aa   :  { %v6266_v0 = vpop.eup %6265  ;;  %v1424_v52 = vadd.f32 1.0, %v6264_v16  ;;  %6285 = vrcp.f32 %v1420_v36  ;;  %v9329_v36 = vld [vmem:[#allocation71_spill] sm:$0xff] }
 0x2ab   :  { %v6268_v19 = vpop.eup %6267  ;;  %v1426_v25 = vadd.f32 1.0, %v6266_v0  ;;  %6287 = vrcp.f32 %v1422_v42  ;;  %v1525_v17 = vrot.slane %v9329_v36, 7 }
 0x2ac   :  { %v6270_v63 = vpop.eup %6269  ;;  %6289 = vrcp.f32 %v1424_v52  ;;  %v1491_v41 = vadd.f32 1.0, %v6268_v19  ;;  %v9330_v52 = vld [vmem:[#allocation72_spill] sm:$0xff] }
 0x2ad   :  { %v6272_v13 = vpop.eup %6271  ;;  %6291 = vrcp.f32 %v1426_v25  ;;  %v1492_v32 = vadd.f32 1.0, %v6270_v63 }
 0x2ae   :  { %v6274_v43 = vpop.eup %6273  ;;  %6293 = vpow2.f32 %v5230_v29  ;;  %v1493_v54 = vadd.f32 1.0, %v6272_v13  ;;  %v1526_v29 = vrot.slane %v9330_v52, 7 }
 0x2af   :  { %v6276_v24 = vpop.eup %6275  ;;  %6295 = vpow2.f32 %v5231_v59  ;;  %v1494_v8 = vadd.f32 1.0, %v6274_v43  ;;  %v1527_v59 = vrot.slane %v9331_v28, 7 }
 0x2b0   :  { %v6278_v20 = vpop.eup %6277  ;;  %6297 = vrcp.f32 %v1491_v41  ;;  %v1495_v16 = vadd.f32 1.0, %v6276_v24  ;;  %v9332_v41 = vld [vmem:[#allocation74_spill] sm:$0xff] }
 0x2b1   :  { %v6280_v60 = vpop.eup %6279  ;;  %6299 = vrcp.f32 %v1492_v32  ;;  %v1539_v42 = vmul.f32 %v6278_v20, %v1523_v6  ;;  %v1528_v13 = vrot.slane %v9332_v41, 7  ;;  %v9333_v6 = vld [vmem:[#allocation75_spill] sm:$0xff] }
 0x2b2   :  { %v6282_v0 = vpop.eup %6281  ;;  %6301 = vrcp.f32 %v1493_v54  ;;  %v1540_v19 = vmul.f32 %v6280_v60, %v1524_v44  ;;  %v1529_v54 = vrot.slane %v9333_v6, 7  ;;  %v9334_v60 = vld [vmem:[#allocation76_spill] sm:$0xff] }
 0x2b3   :  { %v6284_v25 = vpop.eup %6283  ;;  %6303 = vrcp.f32 %v1494_v8  ;;  %v1541_v63 = vmul.f32 %v6282_v0, %v1525_v17  ;;  %v7866_v14 = vadd.f32 %v7832_v22, %v1539_v42  ;;  %v1530_v22 = vrot.slane %v9334_v60, 7 }
 0x2b4   :  { %v6286_v38 = vpop.eup %6285  ;;  %6305 = vpow2.f32 %v5232_v26  ;;  %v1542_v43 = vmul.f32 %v6284_v25, %v1526_v29  ;;  %v7870_v32 = vadd.f32 %v7827_v58, %v1540_v19 }
 0x2b5   :  { %v6288_v24 = vpop.eup %6287  ;;  %6307 = vrcp.f32 %v1495_v16  ;;  %v1543_v20 = vmul.f32 %v6286_v38, %v1527_v59  ;;  %v7874_v44 = vadd.f32 %v7836_v37, %v1541_v63 }
 0x2b6   :  { %v6290_v8 = vpop.eup %6289  ;;  %v1544_v36 = vmul.f32 %v6288_v24, %v1528_v13  ;;  %v7878_v17 = vadd.f32 %v7847_v9, %v1542_v43  ;;  %6309 = vtanh.f32 %v7866_v14 }
 0x2b7   :  { %v6292_v26 = vpop.eup %6291  ;;  %v1545_v58 = vmul.f32 %v6290_v8, %v1529_v54  ;;  %v7882_v42 = vadd.f32 %v7849_v12, %v1543_v20  ;;  %6311 = vtanh.f32 %v7870_v32 }
 0x2b8   :  { %v6294_v16 = vpop.eup %6293  ;;  %v1546_v0 = vmul.f32 %v6292_v26, %v1530_v22  ;;  %v7886_v37 = vadd.f32 %v7851_v11, %v1544_v36  ;;  %6313 = vtanh.f32 %v7874_v44 }
 0x2b9   :  { %v6296_v52 = vpop.eup %6295  ;;  %v1496_v29 = vadd.f32 1.0, %v6294_v16  ;;  %v7890_v9 = vadd.f32 %v7853_v21, %v1545_v58  ;;  %6315 = vtanh.f32 %v7878_v17 }
 0x2ba   :  { %9335 = vst [vmem:[#allocation20_spill] sm:$0xff] %v7886_v37  ;;  %v6298_v19 = vpop.eup %6297  ;;  %v1497_v25 = vadd.f32 1.0, %v6296_v52  ;;  %v7894_v12 = vadd.f32 %v7855_v48, %v1546_v0  ;;  %6317 = vtanh.f32 %v7882_v42 }
 0x2bb   :  { %9336 = vst [vmem:[#allocation21_spill] sm:$0xff] %v7890_v9  ;;  %v6300_v28 = vpop.eup %6299  ;;  %6319 = vrcp.f32 %v1496_v29 }
 0x2bc   :  { %9337 = vst [vmem:[#allocation22_spill] sm:$0xff] %v7894_v12  ;;  %v6302_v11 = vpop.eup %6301  ;;  %6321 = vrcp.f32 %v1497_v25 }
 0x2bd   :  { %v6304_v59 = vpop.eup %6303  ;;  %6323 = vtanh.f32 %v7886_v37 }
 0x2be   :  { %v6306_v63 = vpop.eup %6305  ;;  %6325 = vtanh.f32 %v7890_v9 }
 0x2bf   :  { %v6308_v21 = vpop.eup %6307  ;;  %v1498_v38 = vadd.f32 1.0, %v6306_v63  ;;  %6327 = vtanh.f32 %v7894_v12 }
 0x2c0   :  { %v6310_v41 = vpop.eup %6309 }
 0x2c1   :  { %v6312_v13 = vpop.eup %6311  ;;  %6329 = vrcp.f32 %v1498_v38  ;;  %v1571_v48 = vmul.f32 %v6310_v41, %v6298_v19 }
 0x2c2   :  { %v6314_v43 = vpop.eup %6313  ;;  %v1572_v24 = vmul.f32 %v6312_v13, %v6300_v28 }
 0x2c3   :  { %v6316_v6 = vpop.eup %6315  ;;  %v1573_v54 = vmul.f32 %v6314_v43, %v6302_v11  ;;  %v5441_v20 = vpack.c.bf16 %v1571_v48, %v1571_v48  ;;  %v1645_v8 = vrot.slane %v1571_v48, 1 }
 0x2c4   :  { %v6318_v60 = vpop.eup %6317  ;;  %v1574_v22 = vmul.f32 %v6316_v6, %v6304_v59  ;;  %v5442_v36 = vpack.c.bf16 %v1572_v24, %v1572_v24 }
 0x2c5   :  { %v6320_v26 = vpop.eup %6319  ;;  %v1575_v58 = vmul.f32 %v6318_v60, %v6308_v21  ;;  %v5443_v16 = vpack.c.bf16 %v1573_v54, %v1573_v54  ;;  %v1611_v0 = vunpack.c.l.b16 %v5441_v20  ;;  %v1646_v52 = vsel %vm1047_vm0, %v1572_v24, %v1645_v8 }
 0x2c6   :  { %v6322_v29 = vpop.eup %6321  ;;  %v5444_v25 = vpack.c.bf16 %v1574_v22, %v1574_v22  ;;  %v1612_v63 = vunpack.c.l.b16 %v5442_v36  ;;  %v1647_v38 = vrot.slane %v1573_v54, 7  ;;  %v1649_v11 = vrot.slane %v1574_v22, 6 }
 0x2c7   :  { %v6324_v19 = vpop.eup %6323  ;;  %v5445_v41 = vpack.c.bf16 %v1575_v58, %v1575_v58  ;;  %v1613_v28 = vunpack.c.l.b16 %v5443_v16  ;;  %v1619_v13 = vrot.slane %v1611_v0, 1  ;;  %v1651_v6 = vrot.slane %v1575_v58, 5 }
 0x2c8   :  { %v6326_v43 = vpop.eup %6325  ;;  %v1576_v48 = vmul.f32 %v6324_v19, %v6320_v26  ;;  %v1614_v12 = vunpack.c.l.b16 %v5444_v25  ;;  %v1648_v59 = vsel %vm1050_vm1, %v1647_v38, %v1646_v52 }
 0x2c9   :  { %v6328_v21 = vpop.eup %6327  ;;  %v1577_v60 = vmul.f32 %v6326_v43, %v6322_v29  ;;  %v1615_v20 = vunpack.c.l.b16 %v5445_v41  ;;  %v1620_v24 = vsel %vm1047_vm0, %v1612_v63, %v1619_v13  ;;  %v1621_v8 = vrot.slane %v1613_v28, 7 }
 0x2ca   :  { %v5446_v9 = vpack.c.bf16 %v1576_v48, %v1576_v48  ;;  %v1623_v36 = vrot.slane %v1614_v12, 6  ;;  %v1650_v54 = vsel %vm1053_vm2, %v1649_v11, %v1648_v59  ;;  %v1653_v37 = vrot.slane %v1576_v48, 4 }
 0x2cb   :  { %v6330_v16 = vpop.eup %6329  ;;  %v5447_v0 = vpack.c.bf16 %v1577_v60, %v1577_v60  ;;  %v1622_v22 = vsel %vm1050_vm1, %v1621_v8, %v1620_v24  ;;  %v1625_v26 = vrot.slane %v1615_v20, 5  ;;  %v1652_v25 = vsel %vm1056_vm3, %v1651_v6, %v1650_v54  ;;  %v9338_v24 = vld [vmem:[#allocation24_spill] sm:$0xff]  ;;  %v9339_v8 = vld [vmem:[#allocation25_spill] sm:$0xff]  ;;  %v9341_v54 = vld [vmem:[#allocation27_spill] sm:$0xff] }
 0x2cc   :  { %v1578_v52 = vmul.f32 %v6330_v16, %v6328_v21  ;;  %v1616_v58 = vunpack.c.l.b16 %v5446_v9  ;;  %v1624_v29 = vsel %vm1053_vm2, %v1623_v36, %v1622_v22  ;;  %v1654_v38 = vsel %vm1059_vm4, %v1653_v37, %v1652_v25  ;;  %v9340_v36 = vld [vmem:[#allocation26_spill] sm:$0xff]  ;;  %v9342_v16 = vld [vmem:[#allocation28_spill] sm:$0xff] }
 0x2cd   :  { %v1617_v63 = vunpack.c.l.b16 %v5447_v0  ;;  %v1626_v19 = vsel %vm1056_vm3, %v1625_v26, %v1624_v29  ;;  %v1655_v12 = vrot.slane %v1577_v60, 3  ;;  %v7918_v60 = vld [vmem:[#allocation2] sm:$0xff]  ;;  %v9343_v0 = vld [vmem:[#allocation29_spill] sm:$0xff]  ;;  %v9345_v26 = vld [vmem:[#allocation31_spill] sm:$0xff] }
 0x2ce   :  { %v5448_v41 = vpack.c.bf16 %v1578_v52, %v1578_v52  ;;  %v1627_v28 = vrot.slane %v1616_v58, 4  ;;  %v1657_v13 = vrot.slane %v1578_v52, 2  ;;  %v9344_v22 = vld [vmem:[#allocation30_spill] sm:$0xff]  ;;  %v9346_v25 = vld [vmem:[#allocation32_spill] sm:$0xff]  ;;  %v9347_v52 = vld [vmem:[#allocation33_spill] sm:$0xff] }
 0x2cf   :  { %v1629_v11 = vrot.slane %v1617_v63, 3  ;;  %v1656_v43 = vsel %vm1062_vm5, %v1655_v12, %v1654_v38  ;;  %v9348_v58 = vld [vmem:[#allocation34_spill] sm:$0xff]  ;;  %v9349_v29 = vld [vmem:[#allocation35_spill] sm:$0xff]  ;;  %v9350_v38 = vld [vmem:[#allocation36_spill] sm:$0xff] }
 0x2d0   :  { %v1618_v48 = vunpack.c.l.b16 %v5448_v41  ;;  %v1628_v59 = vsel %vm1059_vm4, %v1627_v28, %v1626_v19  ;;  %v1658_v6 = vsel %vm1065_vm6, %v1657_v13, %v1656_v43  ;;  %v9351_v63 = vld [vmem:[#allocation37_spill] sm:$0xff]  ;;  %v9352_v19 = vld [vmem:[#allocation38_spill] sm:$0xff]  ;;  %v9353_v12 = vld [vmem:[#allocation39_spill] sm:$0xff] }
 0x2d1   :  { %v1630_v9 = vsel %vm1062_vm5, %v1629_v11, %v1628_v59  ;;  %1725 = vmatmul.mubr.f32.vlgmr.msra.gmra.mrb[20].mxu0 %v1658_v6  ;;  %1796 = vmatmul.mubr.f32.vlgmr.msra.gmra.mrb[20].mxu1 %v1658_v6  ;;  %v9354_v41 = vld [vmem:[#allocation40_spill] sm:$0xff]  ;;  %v9355_v28 = vld [vmem:[#allocation41_spill] sm:$0xff]  ;;  %v9356_v13 = vld [vmem:[#allocation42_spill] sm:$0xff] }
 0x2d2   :  { %v1631_v37 = vrot.slane %v1618_v48, 2  ;;  %5692 = vmatpush1.bf16.msra.mxu0 %v7339_v50  ;;  %5724 = vmatpush1.bf16.msra.mxu1 %v7341_v51  ;;  %v9357_v11 = vld [vmem:[#allocation18_spill] sm:$0xff]  ;;  %v9358_v43 = vld [vmem:[#allocation19_spill] sm:$0xff] }
 0x2d3   :  { %5694 = vmatprep.subr.bf16.mxu0 %v7345_v55  ;;  %5726 = vmatprep.subr.bf16.mxu1 %v7347_v56 }
 0x2d4   :  { %v1632_v21 = vsel %vm1065_vm6, %v1631_v37, %v1630_v9  ;;  %2291 = vmatprep.mubr.f32.mxu0 %v7918_v60  ;;  %2362 = vmatprep.mubr.f32.mxu1 %v7918_v60 }
 0x2d5   :  { %v1633_v20 = vpack.c.b16 %v1632_v21, %v1632_v21 }
 0x2d6   :  { %5696 = vmatpush1.bf16.msra.mxu0 %v7351_v61  ;;  %5728 = vmatpush1.bf16.msra.mxu1 %v7353_v62 }
 0x2d7   :  { %1636 = vst [vmem:[#allocation10 + $0x4] sm:$0xf] %v1633_v20  ;;  %5698 = vmatprep.subr.bf16.mxu0 %v7357_v3  ;;  %5730 = vmatprep.subr.bf16.mxu1 %v9293_v2 }
 0x2da   :  { %5700 = vmatpush1.bf16.msra.mxu0 %v9294_v15  ;;  %5732 = vmatpush1.bf16.msra.mxu1 %v9295_v4 }
 0x2db   :  { %5702 = vmatprep.subr.bf16.mxu0 %v9296_v7  ;;  %5734 = vmatprep.subr.bf16.mxu1 %v9338_v24 }
 0x2de   :  { %5704 = vmatpush1.bf16.msra.mxu0 %v9339_v8  ;;  %5736 = vmatpush1.bf16.msra.mxu1 %v9340_v36 }
 0x2df   :  { %5706 = vmatprep.subr.bf16.mxu0 %v9341_v54  ;;  %5738 = vmatprep.subr.bf16.mxu1 %v9342_v16 }
 0x2e2   :  { %5708 = vmatpush1.bf16.msra.mxu0 %v9343_v0  ;;  %5740 = vmatpush1.bf16.msra.mxu1 %v9344_v22  ;;  %v9363_v0 = vld [vmem:[#allocation65_spill] sm:$0xff] }
 0x2e3   :  { %5710 = vmatprep.subr.bf16.mxu0 %v9345_v26  ;;  %5742 = vmatprep.subr.bf16.mxu1 %v9346_v25  ;;  %v9362_v26 = vld [vmem:[#allocation62_spill] sm:$0xff] }
 0x2e6   :  { %5712 = vmatpush1.bf16.msra.mxu0 %v9347_v52  ;;  %5744 = vmatpush1.bf16.msra.mxu1 %v9348_v58  ;;  %v9361_v52 = vld [vmem:[#allocation59_spill] sm:$0xff] }
 0x2e7   :  { %5714 = vmatprep.subr.bf16.mxu0 %v9349_v29  ;;  %5746 = vmatprep.subr.bf16.mxu1 %v9350_v38  ;;  %v9360_v29 = vld [vmem:[#allocation56_spill] sm:$0xff] }
 0x2ea   :  { %5716 = vmatpush1.bf16.msra.mxu0 %v9351_v63  ;;  %5748 = vmatpush1.bf16.msra.mxu1 %v9352_v19 }
 0x2eb   :  { %5718 = vmatprep.subr.bf16.mxu0 %v9353_v12  ;;  %5750 = vmatprep.subr.bf16.mxu1 %v9354_v41 }
 0x2ee   :  { %5720 = vmatpush1.bf16.msra.mxu0 %v9355_v28  ;;  %5752 = vmatpush1.bf16.msra.mxu1 %v9356_v13 }
 0x2ef   :  { %5754 = vmatprep.subr.bf16.mxu0 %v9357_v11  ;;  %5786 = vmatprep.subr.bf16.mxu1 %v9358_v43  ;;  %v9359_v43 = vld [vmem:[#allocation53_spill] sm:$0xff] }
 0x3a4   :  { %v1726_v48 = vpop.f32.mrb[20].mxu0  ;;  %v1797_v59 = vpop.f32.mrb[20].mxu1 }
 0x3a5   :  { %v1806_v6 = vrot.slane %v1726_v48, 6  ;;  %v1810_v9 = vrot.slane %v1726_v48, 7  ;;  %v1814_v37 = vrot.slane %v1726_v48, 1  ;;  %v1818_v21 = vrot.slane %v1726_v48, 2  ;;  %v7950_v20 = vpop.f32.mrb[21].mxu0  ;;  %v7952_v19 = vpop.f32.mrb[21].mxu1 }
 0x3a6   :  { %v1822_v12 = vrot.slane %v1726_v48, 3  ;;  %v1826_v41 = vrot.slane %v1726_v48, 4  ;;  %v1830_v63 = vrot.slane %v1726_v48, 5  ;;  %v1874_v28 = vadd.f32 %v1726_v48, %v7493_v34 }
 0x3a7   :  { %v1866_v13 = vadd.f32 %v1806_v6, %v7477_v1  ;;  %v1870_v11 = vadd.f32 %v1810_v9, %v7485_v30  ;;  %v1878_v38 = vadd.f32 %v1814_v37, %v9359_v43  ;;  %v1882_v58 = vadd.f32 %v1818_v21, %v9360_v29 }
 0x3a8   :  { %v1886_v25 = vadd.f32 %v1822_v12, %v9361_v52  ;;  %v1890_v22 = vadd.f32 %v1826_v41, %v9362_v26  ;;  %v1894_v16 = vadd.f32 %v1830_v63, %v9363_v0  ;;  %v1906_v54 = vadd.f32 %v1874_v28, %v7544_v10 }
 0x3a9   :  { %v1898_v36 = vadd.f32 %v1866_v13, %v7544_v10  ;;  %v1902_v48 = vadd.f32 %v1870_v11, %v7544_v10  ;;  %v1910_v6 = vadd.f32 %v1878_v38, %v7544_v10  ;;  %v1914_v9 = vadd.f32 %v1882_v58, %v7544_v10 }
 0x3aa   :  { %v1918_v37 = vadd.f32 %v1886_v25, %v7544_v10  ;;  %v1922_v21 = vadd.f32 %v1890_v22, %v7544_v10  ;;  %v1926_v12 = vadd.f32 %v1894_v16, %v7544_v10  ;;  %v5245_v52 = vmul.f32 -1.442695, %v1906_v54 }
 0x3ab   :  { %v5241_v41 = vmul.f32 -1.442695, %v1898_v36  ;;  %v5243_v26 = vmul.f32 -1.442695, %v1902_v48  ;;  %v5247_v63 = vmul.f32 -1.442695, %v1910_v6  ;;  %v1876_v28 = vadd.f32 %v1797_v59, %v7495_v35 }
 0x3ac   :  { %6331 = vpow2.f32 %v5245_v52  ;;  %v5249_v13 = vmul.f32 -1.442695, %v1914_v9  ;;  %v5251_v0 = vmul.f32 -1.442695, %v1918_v37  ;;  %v5253_v11 = vmul.f32 -1.442695, %v1922_v21 }
 0x3ad   :  { %6333 = vpow2.f32 %v5241_v41  ;;  %v5255_v38 = vmul.f32 -1.442695, %v1926_v12  ;;  %v1808_v29 = vrot.slane %v1797_v59, 6  ;;  %v1812_v58 = vrot.slane %v1797_v59, 7  ;;  %v9364_v9 = vld [vmem:[#allocation60_spill] sm:$0xff]  ;;  %v9365_v21 = vld [vmem:[#allocation63_spill] sm:$0xff] }
 0x3ae   :  { %6335 = vpow2.f32 %v5243_v26  ;;  %v1816_v25 = vrot.slane %v1797_v59, 1  ;;  %v1820_v34 = vrot.slane %v1797_v59, 2  ;;  %v1824_v22 = vrot.slane %v1797_v59, 3  ;;  %v9366_v12 = vld [vmem:[#allocation66_spill] sm:$0xff] }
 0x3af   :  { %6337 = vpow2.f32 %v5247_v63  ;;  %v1828_v16 = vrot.slane %v1797_v59, 4  ;;  %v1832_v54 = vrot.slane %v1797_v59, 5  ;;  %v1868_v36 = vadd.f32 %v1808_v29, %v7479_v23  ;;  %v9367_v63 = vld [vmem:[#allocation69_spill] sm:$0xff] }
 0x3b0   :  { %6339 = vpow2.f32 %v5249_v13  ;;  %v1872_v48 = vadd.f32 %v1812_v58, %v7487_v31  ;;  %v1880_v52 = vadd.f32 %v1816_v25, %v7503_v45  ;;  %v1884_v6 = vadd.f32 %v1820_v34, %v7511_v49  ;;  %v9371_v31 = vld [vmem:[#allocation58_spill] sm:$0xff]  ;;  %v9372_v45 = vld [vmem:[#allocation61_spill] sm:$0xff] }
 0x3b1   :  { %6341 = vpow2.f32 %v5251_v0  ;;  %v1888_v37 = vadd.f32 %v1824_v22, %v9364_v9  ;;  %v1892_v26 = vadd.f32 %v1828_v16, %v9365_v21  ;;  %v1896_v41 = vadd.f32 %v1832_v54, %v9366_v12  ;;  %v9370_v12 = vld [vmem:[#allocation52_spill] sm:$0xff] }
 0x3b2   :  { %6343 = vpow2.f32 %v5253_v11  ;;  %v1900_v35 = vadd.f32 %v1868_v36, %v9367_v63  ;;  %v1904_v59 = vadd.f32 %v1872_v48, %v9367_v63  ;;  %v1908_v29 = vadd.f32 %v1876_v28, %v9367_v63 }
 0x3b3   :  { %6345 = vpow2.f32 %v5255_v38  ;;  %v1912_v13 = vadd.f32 %v1880_v52, %v9367_v63  ;;  %v1916_v58 = vadd.f32 %v1884_v6, %v9367_v63  ;;  %v7984_v34 = vadd.f32 %v1888_v37, %v9367_v63 }
 0x3b4   :  { %v7987_v0 = vadd.f32 %v1892_v26, %v9367_v63  ;;  %v7990_v25 = vadd.f32 %v1896_v41, %v9367_v63  ;;  %6347 = vtanh.f32 %v1900_v35  ;;  %v1807_v11 = vrot.slane %v7950_v20, 6  ;;  %v9368_v35 = vld [vmem:[#allocation45_spill] sm:$0xff]  ;;  %v9369_v26 = vld [vmem:[#allocation48_spill] sm:$0xff] }
 0x3b5   :  { %6349 = vtanh.f32 %v1904_v59  ;;  %v1811_v28 = vrot.slane %v7950_v20, 7  ;;  %v1815_v38 = vrot.slane %v7950_v20, 1  ;;  %v1819_v22 = vrot.slane %v7950_v20, 2 }
 0x3b6   :  { %v6332_v16 = vpop.eup %6331  ;;  %6351 = vtanh.f32 %v1908_v29  ;;  %v1823_v54 = vrot.slane %v7950_v20, 3  ;;  %v1827_v36 = vrot.slane %v7950_v20, 4  ;;  %v1831_v48 = vrot.slane %v7950_v20, 5 }
 0x3b7   :  { %v6334_v52 = vpop.eup %6333  ;;  %v1982_v6 = vadd.f32 1.0, %v6332_v16  ;;  %6353 = vtanh.f32 %v1912_v13  ;;  %v1867_v37 = vadd.f32 %v1807_v11, %v9368_v35  ;;  %v1871_v41 = vadd.f32 %v1811_v28, %v9369_v26  ;;  %v9373_v11 = vld [vmem:[#allocation64_spill] sm:$0xff]  ;;  %v9374_v26 = vld [vmem:[#allocation67_spill] sm:$0xff] }
 0x3b8   :  { %v6336_v59 = vpop.eup %6335  ;;  %v1978_v63 = vadd.f32 1.0, %v6334_v52  ;;  %6355 = vtanh.f32 %v1916_v58  ;;  %v1875_v21 = vadd.f32 %v7950_v20, %v9370_v12  ;;  %v1879_v29 = vadd.f32 %v1815_v38, %v7505_v46  ;;  %v9375_v20 = vld [vmem:[#allocation70_spill] sm:$0xff] }
 0x3b9   :  { %v6338_v9 = vpop.eup %6337  ;;  %v1980_v49 = vadd.f32 1.0, %v6336_v59  ;;  %6357 = vrcp.f32 %v1982_v6  ;;  %v1883_v23 = vadd.f32 %v1819_v22, %v9371_v31  ;;  %v1887_v16 = vadd.f32 %v1823_v54, %v9372_v45 }
 0x3ba   :  { %v6340_v13 = vpop.eup %6339  ;;  %v1984_v10 = vadd.f32 1.0, %v6338_v9  ;;  %6359 = vrcp.f32 %v1978_v63  ;;  %v1891_v28 = vadd.f32 %v1827_v36, %v9373_v11  ;;  %v1895_v52 = vadd.f32 %v1831_v48, %v9374_v26 }
 0x3bb   :  { %v6342_v58 = vpop.eup %6341  ;;  %v1986_v35 = vadd.f32 1.0, %v6340_v13  ;;  %6361 = vrcp.f32 %v1980_v49  ;;  %v1899_v12 = vadd.f32 %v1867_v37, %v9375_v20  ;;  %v1903_v38 = vadd.f32 %v1871_v41, %v9375_v20 }
 0x3bc   :  { %v6344_v59 = vpop.eup %6343  ;;  %v1988_v6 = vadd.f32 1.0, %v6342_v58  ;;  %6363 = vrcp.f32 %v1984_v10  ;;  %v1907_v22 = vadd.f32 %v1875_v21, %v9375_v20  ;;  %v1911_v54 = vadd.f32 %v1879_v29, %v9375_v20 }
 0x3bd   :  { %v6346_v9 = vpop.eup %6345  ;;  %v1990_v63 = vadd.f32 1.0, %v6344_v59  ;;  %6365 = vrcp.f32 %v1986_v35  ;;  %v1915_v36 = vadd.f32 %v1883_v23, %v9375_v20  ;;  %v1919_v48 = vadd.f32 %v1887_v16, %v9375_v20 }
 0x3be   :  { %v6348_v13 = vpop.eup %6347  ;;  %v1992_v49 = vadd.f32 1.0, %v6346_v9  ;;  %6367 = vrcp.f32 %v1988_v6  ;;  %v1923_v37 = vadd.f32 %v1891_v28, %v9375_v20  ;;  %v1927_v41 = vadd.f32 %v1895_v52, %v9375_v20 }
 0x3bf   :  { %v6350_v58 = vpop.eup %6349  ;;  %6369 = vrcp.f32 %v1990_v63  ;;  %v5242_v10 = vmul.f32 -1.442695, %v1899_v12  ;;  %v5244_v21 = vmul.f32 -1.442695, %v1903_v38  ;;  %v5246_v26 = vmul.f32 -1.442695, %v1907_v22 }
 0x3c0   :  { %v6352_v29 = vpop.eup %6351  ;;  %6371 = vrcp.f32 %v1992_v49  ;;  %v5248_v59 = vmul.f32 -1.442695, %v1911_v54  ;;  %v5250_v35 = vmul.f32 -1.442695, %v1915_v36  ;;  %v5252_v11 = vmul.f32 -1.442695, %v1919_v48 }
 0x3c1   :  { %v6354_v23 = vpop.eup %6353  ;;  %6373 = vtanh.f32 %v7984_v34  ;;  %v5254_v16 = vmul.f32 -1.442695, %v1923_v37  ;;  %v5256_v9 = vmul.f32 -1.442695, %v1927_v41  ;;  %v1809_v6 = vrot.slane %v7952_v19, 6 }
 0x3c2   :  { %v6356_v28 = vpop.eup %6355  ;;  %6375 = vtanh.f32 %v7987_v0  ;;  %v1813_v52 = vrot.slane %v7952_v19, 7  ;;  %v1817_v12 = vrot.slane %v7952_v19, 1  ;;  %v1821_v38 = vrot.slane %v7952_v19, 2 }
 0x3c3   :  { %v6358_v22 = vpop.eup %6357  ;;  %6377 = vtanh.f32 %v7990_v25  ;;  %v1825_v54 = vrot.slane %v7952_v19, 3  ;;  %v1829_v34 = vrot.slane %v7952_v19, 4  ;;  %v1833_v63 = vrot.slane %v7952_v19, 5 }
 0x3c4   :  { %v6360_v36 = vpop.eup %6359  ;;  %v8026_v48 = vmul.f32 %v6358_v22, %v6352_v29  ;;  %6379 = vpow2.f32 %v5242_v10  ;;  %v1869_v0 = vadd.f32 %v1809_v6, %v7483_v27  ;;  %v1873_v49 = vadd.f32 %v1813_v52, %v7491_v33 }
 0x3c5   :  { %v6362_v37 = vpop.eup %6361  ;;  %v8030_v41 = vmul.f32 %v6360_v36, %v6348_v13  ;;  %6381 = vpow2.f32 %v5244_v21  ;;  %v1877_v25 = vadd.f32 %v7952_v19, %v7499_v39  ;;  %v1881_v20 = vadd.f32 %v1817_v12, %v7507_v47 }
 0x3c6   :  { %v6364_v45 = vpop.eup %6363  ;;  %v8035_v31 = vmul.f32 %v6362_v37, %v6350_v58  ;;  %6383 = vpow2.f32 %v5246_v26  ;;  %v1885_v29 = vadd.f32 %v1821_v38, %v7515_v57  ;;  %v1889_v10 = vadd.f32 %v1825_v54, %v7523_v5 }
 0x3c7   :  { %v6366_v6 = vpop.eup %6365  ;;  %6385 = vpow2.f32 %v5248_v59  ;;  %v1893_v52 = vadd.f32 %v1829_v34, %v7531_v18  ;;  %v1897_v13 = vadd.f32 %v1833_v63, %v7539_v40  ;;  %v1901_v21 = vadd.f32 %v1869_v0, %v7550_v53 }
 0x3c8   :  { %v6368_v22 = vpop.eup %6367  ;;  %6387 = vpow2.f32 %v5250_v35  ;;  %v1905_v19 = vadd.f32 %v1873_v49, %v7550_v53  ;;  %v1909_v58 = vadd.f32 %v1877_v25, %v7550_v53  ;;  %v1913_v26 = vadd.f32 %v1881_v20, %v7550_v53 }
 0x3c9   :  { %v6370_v12 = vpop.eup %6369  ;;  %6389 = vpow2.f32 %v5252_v11  ;;  %v1917_v38 = vadd.f32 %v1885_v29, %v7550_v53  ;;  %v5257_v59 = vmul.f32 -1.442695, %v1901_v21  ;;  %v8046_v25 = vmul.f32 %v6364_v45, %v6354_v23 }
 0x3ca   :  { %v6372_v54 = vpop.eup %6371  ;;  %6391 = vpow2.f32 %v5254_v16  ;;  %v5258_v34 = vmul.f32 -1.442695, %v1905_v19  ;;  %v5259_v63 = vmul.f32 -1.442695, %v1909_v58  ;;  %v5260_v0 = vmul.f32 -1.442695, %v1913_v26 }
 0x3cb   :  { %v6374_v36 = vpop.eup %6373  ;;  %6393 = vpow2.f32 %v5256_v9  ;;  %v5261_v35 = vmul.f32 -1.442695, %v1917_v38  ;;  %v8048_v20 = vmul.f32 %v6366_v6, %v6356_v28  ;;  %v1921_v45 = vadd.f32 %v1889_v10, %v7550_v53 }
 0x3cc   :  { %v6376_v37 = vpop.eup %6375  ;;  %6395 = vpow2.f32 %v5257_v59  ;;  %v8050_v11 = vmul.f32 %v6374_v36, %v6368_v22  ;;  %v1925_v6 = vadd.f32 %v1893_v52, %v7550_v53 }
 0x3cd   :  { %v6378_v49 = vpop.eup %6377  ;;  %6397 = vpow2.f32 %v5258_v34  ;;  %v8052_v16 = vmul.f32 %v6376_v37, %v6370_v12 }
 0x3ce   :  { %v6380_v29 = vpop.eup %6379  ;;  %6399 = vpow2.f32 %v5259_v63  ;;  %v8054_v21 = vmul.f32 %v6378_v49, %v6372_v54  ;;  %v5263_v49 = vmul.f32 -1.442695, %v1925_v6 }
 0x3cf   :  { %v6382_v9 = vpop.eup %6381  ;;  %v1979_v19 = vadd.f32 1.0, %v6380_v29  ;;  %6401 = vpow2.f32 %v5260_v0  ;;  %v5262_v0 = vmul.f32 -1.442695, %v1921_v45  ;;  %v1929_v29 = vadd.f32 %v1897_v13, %v7550_v53 }
 0x3d0   :  { %v6384_v58 = vpop.eup %6383  ;;  %v1981_v26 = vadd.f32 1.0, %v6382_v9  ;;  %6403 = vpow2.f32 %v5261_v35  ;;  %v2092_v13 = vrot.slane %v7874_v44, 7 }
 0x3d1   :  { %v6386_v38 = vpop.eup %6385  ;;  %v1983_v59 = vadd.f32 1.0, %v6384_v58  ;;  %6405 = vrcp.f32 %v1979_v19  ;;  %v5264_v6 = vmul.f32 -1.442695, %v1929_v29 }
 0x3d2   :  { %v6388_v23 = vpop.eup %6387  ;;  %v1985_v28 = vadd.f32 1.0, %v6386_v38  ;;  %6407 = vrcp.f32 %v1981_v26 }
 0x3d3   :  { %v6390_v22 = vpop.eup %6389  ;;  %v1987_v12 = vadd.f32 1.0, %v6388_v23  ;;  %6409 = vrcp.f32 %v1983_v59  ;;  %v2090_v59 = vrot.slane %v7866_v14, 7  ;;  %v2094_v14 = vrot.slane %v7882_v42, 7 }
 0x3d4   :  { %v6392_v54 = vpop.eup %6391  ;;  %v1989_v34 = vadd.f32 1.0, %v6390_v22  ;;  %6411 = vrcp.f32 %v1985_v28  ;;  %v2091_v28 = vrot.slane %v7870_v32, 7 }
 0x3d5   :  { %v6394_v36 = vpop.eup %6393  ;;  %v1991_v63 = vadd.f32 1.0, %v6392_v54  ;;  %6413 = vrcp.f32 %v1987_v12 }
 0x3d6   :  { %v6396_v37 = vpop.eup %6395  ;;  %v1993_v35 = vadd.f32 1.0, %v6394_v36  ;;  %6415 = vrcp.f32 %v1989_v34  ;;  %v2093_v36 = vrot.slane %v7878_v17, 7  ;;  %v9377_v17 = vld [vmem:[#allocation21_spill] sm:$0xff] }
 0x3d7   :  { %v6398_v10 = vpop.eup %6397  ;;  %6417 = vrcp.f32 %v1991_v63  ;;  %v2058_v9 = vadd.f32 1.0, %v6396_v37 }
 0x3d8   :  { %v6400_v52 = vpop.eup %6399  ;;  %6419 = vrcp.f32 %v1993_v35  ;;  %v2059_v19 = vadd.f32 1.0, %v6398_v10 }
 0x3d9   :  { %v6402_v58 = vpop.eup %6401  ;;  %6421 = vpow2.f32 %v5262_v0  ;;  %v2060_v26 = vadd.f32 1.0, %v6400_v52  ;;  %v2096_v52 = vrot.slane %v9377_v17, 7 }
 0x3da   :  { %v6404_v38 = vpop.eup %6403  ;;  %6423 = vpow2.f32 %v5263_v49  ;;  %v2061_v45 = vadd.f32 1.0, %v6402_v58  ;;  %v9376_v49 = vld [vmem:[#allocation20_spill] sm:$0xff] }
 0x3db   :  { %v6406_v23 = vpop.eup %6405  ;;  %6425 = vrcp.f32 %v2058_v9  ;;  %v2062_v12 = vadd.f32 1.0, %v6404_v38  ;;  %v2095_v10 = vrot.slane %v9376_v49, 7 }
 0x3dc   :  { %v6408_v22 = vpop.eup %6407  ;;  %6427 = vrcp.f32 %v2059_v19  ;;  %v2106_v54 = vmul.f32 %v6406_v23, %v2090_v59 }
 0x3dd   :  { %v6410_v34 = vpop.eup %6409  ;;  %6429 = vrcp.f32 %v2060_v26  ;;  %v2107_v63 = vmul.f32 %v6408_v22, %v2091_v28  ;;  %v9378_v26 = vld [vmem:[#allocation22_spill] sm:$0xff] }
 0x3de   :  { %v6412_v0 = vpop.eup %6411  ;;  %6431 = vrcp.f32 %v2061_v45  ;;  %v2108_v37 = vmul.f32 %v6410_v34, %v2092_v13  ;;  %v8065_v32 = vadd.f32 %v8030_v41, %v2106_v54  ;;  %v2097_v41 = vrot.slane %v9378_v26, 7 }
 0x3df   :  { %v6414_v35 = vpop.eup %6413  ;;  %6433 = vpow2.f32 %v5264_v6  ;;  %v2109_v29 = vmul.f32 %v6412_v0, %v2093_v36  ;;  %v8069_v44 = vadd.f32 %v8035_v31, %v2107_v63 }
 0x3e0   :  { %v6416_v9 = vpop.eup %6415  ;;  %6435 = vrcp.f32 %v2062_v12  ;;  %v2110_v19 = vmul.f32 %v6414_v35, %v2094_v14  ;;  %v8073_v42 = vadd.f32 %v8026_v48, %v2108_v37 }
 0x3e1   :  { %v6418_v58 = vpop.eup %6417  ;;  %v2111_v38 = vmul.f32 %v6416_v9, %v2095_v10  ;;  %v8077_v59 = vadd.f32 %v8046_v25, %v2109_v29  ;;  %6437 = vtanh.f32 %v8065_v32 }
 0x3e2   :  { %v6420_v45 = vpop.eup %6419  ;;  %v2112_v31 = vmul.f32 %v6418_v58, %v2096_v52  ;;  %v8081_v23 = vadd.f32 %v8048_v20, %v2110_v19  ;;  %6439 = vtanh.f32 %v8069_v44 }
 0x3e3   :  { %v6422_v28 = vpop.eup %6421  ;;  %v2113_v6 = vmul.f32 %v6420_v45, %v2097_v41  ;;  %v8085_v48 = vadd.f32 %v8050_v11, %v2111_v38  ;;  %6441 = vtanh.f32 %v8073_v42 }
 0x3e4   :  { %v6424_v22 = vpop.eup %6423  ;;  %v2063_v12 = vadd.f32 1.0, %v6422_v28  ;;  %v8089_v25 = vadd.f32 %v8052_v16, %v2112_v31  ;;  %6443 = vtanh.f32 %v8077_v59 }
 0x3e5   :  { %v6426_v13 = vpop.eup %6425  ;;  %v2064_v54 = vadd.f32 1.0, %v6424_v22  ;;  %v8093_v20 = vadd.f32 %v8054_v21, %v2113_v6  ;;  %6445 = vtanh.f32 %v8081_v23 }
 0x3e6   :  { %v6428_v34 = vpop.eup %6427  ;;  %6447 = vrcp.f32 %v2063_v12 }
 0x3e7   :  { %v6430_v11 = vpop.eup %6429  ;;  %6449 = vrcp.f32 %v2064_v54 }
 0x3e8   :  { %v6432_v36 = vpop.eup %6431  ;;  %6451 = vtanh.f32 %v8085_v48 }
 0x3e9   :  { %v6434_v63 = vpop.eup %6433  ;;  %6453 = vtanh.f32 %v8089_v25 }
 0x3ea   :  { %v6436_v16 = vpop.eup %6435  ;;  %v2065_v0 = vadd.f32 1.0, %v6434_v63  ;;  %6455 = vtanh.f32 %v8093_v20 }
 0x3eb   :  { %v6438_v14 = vpop.eup %6437 }
 0x3ec   :  { %v6440_v37 = vpop.eup %6439  ;;  %6457 = vrcp.f32 %v2065_v0  ;;  %v2138_v21 = vmul.f32 %v6438_v14, %v6426_v13 }
 0x3ed   :  { %v6442_v35 = vpop.eup %6441  ;;  %v2139_v49 = vmul.f32 %v6440_v37, %v6428_v34 }
 0x3ee   :  { %v6444_v10 = vpop.eup %6443  ;;  %v2140_v29 = vmul.f32 %v6442_v35, %v6430_v11  ;;  %v5449_v9 = vpack.c.bf16 %v2138_v21, %v2138_v21  ;;  %v2212_v17 = vrot.slane %v2138_v21, 2 }
 0x3ef   :  { %v6446_v52 = vpop.eup %6445  ;;  %v2141_v19 = vmul.f32 %v6444_v10, %v6432_v36  ;;  %v5450_v58 = vpack.c.bf16 %v2139_v49, %v2139_v49  ;;  %v2213_v26 = vrot.slane %v2139_v49, 1 }
 0x3f0   :  { %v6448_v41 = vpop.eup %6447  ;;  %v2142_v38 = vmul.f32 %v6446_v52, %v6436_v16  ;;  %v5451_v45 = vpack.c.bf16 %v2140_v29, %v2140_v29  ;;  %v2178_v31 = vunpack.c.l.b16 %v5449_v9 }
 0x3f1   :  { %v6450_v28 = vpop.eup %6449  ;;  %v5452_v6 = vpack.c.bf16 %v2141_v19, %v2141_v19  ;;  %v2179_v22 = vunpack.c.l.b16 %v5450_v58  ;;  %v2214_v12 = vsel %vm1047_vm0, %v2213_v26, %v2212_v17  ;;  %v2216_v13 = vrot.slane %v2141_v19, 7 }
 0x3f2   :  { %v6452_v54 = vpop.eup %6451  ;;  %v5453_v34 = vpack.c.bf16 %v2142_v38, %v2142_v38  ;;  %v2186_v63 = vrot.slane %v2178_v31, 2  ;;  %v2215_v11 = vsel %vm1050_vm1, %v2140_v29, %v2214_v12  ;;  %v2180_v49 = vunpack.c.l.b16 %v5451_v45 }
 0x3f3   :  { %v6454_v0 = vpop.eup %6453  ;;  %v2143_v14 = vmul.f32 %v6452_v54, %v6448_v41  ;;  %v2181_v36 = vunpack.c.l.b16 %v5452_v6  ;;  %v2187_v37 = vrot.slane %v2179_v22, 1  ;;  %v2217_v21 = vsel %vm1053_vm2, %v2216_v13, %v2215_v11 }
 0x3f4   :  { %v6456_v16 = vpop.eup %6455  ;;  %v2144_v35 = vmul.f32 %v6454_v0, %v6450_v28  ;;  %v2182_v10 = vunpack.c.l.b16 %v5453_v34  ;;  %v2218_v9 = vrot.slane %v2142_v38, 6 }
 0x3f5   :  { %v5454_v52 = vpack.c.bf16 %v2143_v14, %v2143_v14  ;;  %v2188_v17 = vsel %vm1047_vm0, %v2187_v37, %v2186_v63  ;;  %v2190_v19 = vrot.slane %v2181_v36, 7  ;;  %v2220_v58 = vrot.slane %v2143_v14, 5 }
 0x3f6   :  { %v6458_v26 = vpop.eup %6457  ;;  %v5455_v31 = vpack.c.bf16 %v2144_v35, %v2144_v35  ;;  %v2189_v29 = vsel %vm1050_vm1, %v2180_v49, %v2188_v17  ;;  %v2192_v12 = vrot.slane %v2182_v10, 6  ;;  %v2219_v41 = vsel %vm1056_vm3, %v2218_v9, %v2217_v21  ;;  %v9380_v9 = vld [vmem:[#allocation27_spill] sm:$0xff]  ;;  %v9382_v17 = vld [vmem:[#allocation29_spill] sm:$0xff] }
 0x3f7   :  { %v2145_v6 = vmul.f32 %v6458_v26, %v6456_v16  ;;  %v2183_v22 = vunpack.c.l.b16 %v5454_v52  ;;  %v2191_v13 = vsel %vm1053_vm2, %v2190_v19, %v2189_v29  ;;  %v2221_v45 = vsel %vm1059_vm4, %v2220_v58, %v2219_v41  ;;  %v9381_v52 = vld [vmem:[#allocation28_spill] sm:$0xff]  ;;  %v9383_v19 = vld [vmem:[#allocation30_spill] sm:$0xff]  ;;  %v9384_v58 = vld [vmem:[#allocation31_spill] sm:$0xff] }
 0x3f8   :  { %v2184_v28 = vunpack.c.l.b16 %v5455_v31  ;;  %v2193_v38 = vsel %vm1056_vm3, %v2192_v12, %v2191_v13  ;;  %v2222_v54 = vrot.slane %v2144_v35, 4  ;;  %v9385_v26 = vld [vmem:[#allocation32_spill] sm:$0xff]  ;;  %v9386_v31 = vld [vmem:[#allocation33_spill] sm:$0xff]  ;;  %v9387_v29 = vld [vmem:[#allocation34_spill] sm:$0xff] }
 0x3f9   :  { %v5456_v34 = vpack.c.bf16 %v2145_v6, %v2145_v6  ;;  %v2194_v63 = vrot.slane %v2183_v22, 5  ;;  %v2224_v11 = vrot.slane %v2145_v6, 3  ;;  %v9388_v12 = vld [vmem:[#allocation35_spill] sm:$0xff]  ;;  %v9389_v41 = vld [vmem:[#allocation36_spill] sm:$0xff]  ;;  %v9390_v6 = vld [vmem:[#allocation37_spill] sm:$0xff] }
 0x3fa   :  { %v2196_v0 = vrot.slane %v2184_v28, 4  ;;  %v2223_v14 = vsel %vm1062_vm5, %v2222_v54, %v2221_v45  ;;  %v9391_v22 = vld [vmem:[#allocation38_spill] sm:$0xff]  ;;  %v9392_v13 = vld [vmem:[#allocation39_spill] sm:$0xff]  ;;  %v9393_v45 = vld [vmem:[#allocation40_spill] sm:$0xff] }
 0x3fb   :  { %v2185_v36 = vunpack.c.l.b16 %v5456_v34  ;;  %v2195_v37 = vsel %vm1059_vm4, %v2194_v63, %v2193_v38  ;;  %v2225_v21 = vsel %vm1065_vm6, %v2224_v11, %v2223_v14  ;;  %v9394_v28 = vld [vmem:[#allocation41_spill] sm:$0xff]  ;;  %v9395_v38 = vld [vmem:[#allocation42_spill] sm:$0xff]  ;;  %v9397_v34 = vld [vmem:[#allocation19_spill] sm:$0xff] }
 0x3fc   :  { %v2197_v16 = vsel %vm1062_vm5, %v2196_v0, %v2195_v37  ;;  %2292 = vmatmul.mubr.f32.vlgmr.msra.gmra.mrb[22].mxu0 %v2225_v21  ;;  %2363 = vmatmul.mubr.f32.vlgmr.msra.gmra.mrb[22].mxu1 %v2225_v21  ;;  %v9396_v54 = vld [vmem:[#allocation18_spill] sm:$0xff] }
 0x3fd   :  { %v2198_v49 = vrot.slane %v2185_v36, 3  ;;  %5756 = vmatpush1.bf16.msra.mxu0 %v7339_v50  ;;  %5788 = vmatpush1.bf16.msra.mxu1 %v7341_v51 }
 0x3fe   :  { %5758 = vmatprep.subr.bf16.mxu0 %v7345_v55  ;;  %5790 = vmatprep.subr.bf16.mxu1 %v7347_v56 }
 0x3ff   :  { %v2199_v35 = vsel %vm1065_vm6, %v2198_v49, %v2197_v16  ;;  %2858 = vmatprep.mubr.f32.mxu0 %v7918_v60  ;;  %2929 = vmatprep.mubr.f32.mxu1 %v7918_v60  ;;  %v9379_v60 = vld [vmem:[#allocation26_spill] sm:$0xff] }
 0x400   :  { %v2200_v10 = vpack.c.b16 %v2199_v35, %v2199_v35 }
 0x401   :  { %5760 = vmatpush1.bf16.msra.mxu0 %v7351_v61  ;;  %5792 = vmatpush1.bf16.msra.mxu1 %v7353_v62 }
 0x402   :  { %2203 = vst [vmem:[#allocation10 + $0x8] sm:$0xf] %v2200_v10  ;;  %5762 = vmatprep.subr.bf16.mxu0 %v7357_v3  ;;  %5794 = vmatprep.subr.bf16.mxu1 %v9293_v2 }
 0x405   :  { %5764 = vmatpush1.bf16.msra.mxu0 %v9294_v15  ;;  %5796 = vmatpush1.bf16.msra.mxu1 %v9295_v4 }
 0x406   :  { %5766 = vmatprep.subr.bf16.mxu0 %v9296_v7  ;;  %5798 = vmatprep.subr.bf16.mxu1 %v9338_v24 }
 0x409   :  { %5768 = vmatpush1.bf16.msra.mxu0 %v9339_v8  ;;  %5800 = vmatpush1.bf16.msra.mxu1 %v9379_v60 }
 0x40a   :  { %5770 = vmatprep.subr.bf16.mxu0 %v9380_v9  ;;  %5802 = vmatprep.subr.bf16.mxu1 %v9381_v52 }
 0x40d   :  { %5772 = vmatpush1.bf16.msra.mxu0 %v9382_v17  ;;  %5804 = vmatpush1.bf16.msra.mxu1 %v9383_v19 }
 0x40e   :  { %5774 = vmatprep.subr.bf16.mxu0 %v9384_v58  ;;  %5806 = vmatprep.subr.bf16.mxu1 %v9385_v26  ;;  %v9403_v58 = vld [vmem:[#allocation68_spill] sm:$0xff] }
 0x411   :  { %5776 = vmatpush1.bf16.msra.mxu0 %v9386_v31  ;;  %5808 = vmatpush1.bf16.msra.mxu1 %v9387_v29  ;;  %v9402_v31 = vld [vmem:[#allocation65_spill] sm:$0xff] }
 0x412   :  { %5778 = vmatprep.subr.bf16.mxu0 %v9388_v12  ;;  %5810 = vmatprep.subr.bf16.mxu1 %v9389_v41  ;;  %v9401_v12 = vld [vmem:[#allocation62_spill] sm:$0xff] }
 0x415   :  { %5780 = vmatpush1.bf16.msra.mxu0 %v9390_v6  ;;  %5812 = vmatpush1.bf16.msra.mxu1 %v9391_v22  ;;  %v9400_v6 = vld [vmem:[#allocation59_spill] sm:$0xff] }
 0x416   :  { %5782 = vmatprep.subr.bf16.mxu0 %v9392_v13  ;;  %5814 = vmatprep.subr.bf16.mxu1 %v9393_v45  ;;  %v9399_v13 = vld [vmem:[#allocation56_spill] sm:$0xff] }
 0x419   :  { %5784 = vmatpush1.bf16.msra.mxu0 %v9394_v28  ;;  %5816 = vmatpush1.bf16.msra.mxu1 %v9395_v38 }
 0x41a   :  { %5818 = vmatprep.subr.bf16.mxu0 %v9396_v54  ;;  %5850 = vmatprep.subr.bf16.mxu1 %v9397_v34  ;;  %v9398_v34 = vld [vmem:[#allocation50_spill] sm:$0xff] }
 0x4cf   :  { %v2293_v63 = vpop.f32.mrb[22].mxu0  ;;  %v2364_v11 = vpop.f32.mrb[22].mxu1 }
 0x4d0   :  { %v2373_v0 = vrot.slane %v2293_v63, 5  ;;  %v2377_v14 = vrot.slane %v2293_v63, 6  ;;  %v2381_v36 = vrot.slane %v2293_v63, 7  ;;  %v2385_v37 = vrot.slane %v2293_v63, 1  ;;  %v8147_v21 = vpop.f32.mrb[23].mxu0  ;;  %v8149_v16 = vpop.f32.mrb[23].mxu1 }
 0x4d1   :  { %v2389_v49 = vrot.slane %v2293_v63, 2  ;;  %v2393_v35 = vrot.slane %v2293_v63, 3  ;;  %v2397_v10 = vrot.slane %v2293_v63, 4  ;;  %v2445_v28 = vadd.f32 %v2293_v63, %v9359_v43 }
 0x4d2   :  { %v2433_v38 = vadd.f32 %v2373_v0, %v7477_v1  ;;  %v2437_v54 = vadd.f32 %v2377_v14, %v7485_v30  ;;  %v2441_v45 = vadd.f32 %v2381_v36, %v9398_v34  ;;  %v2449_v22 = vadd.f32 %v2385_v37, %v9399_v13  ;;  %v9411_v1 = vld [vmem:[#allocation66_spill] sm:$0xff] }
 0x4d3   :  { %v2453_v41 = vadd.f32 %v2389_v49, %v9400_v6  ;;  %v2457_v29 = vadd.f32 %v2393_v35, %v9401_v12  ;;  %v2461_v26 = vadd.f32 %v2397_v10, %v9402_v31  ;;  %v2477_v19 = vadd.f32 %v2445_v28, %v9403_v58  ;;  %v9404_v31 = vld [vmem:[#allocation54_spill] sm:$0xff] }
 0x4d4   :  { %v2465_v17 = vadd.f32 %v2433_v38, %v9403_v58  ;;  %v2469_v63 = vadd.f32 %v2437_v54, %v9403_v58  ;;  %v2473_v0 = vadd.f32 %v2441_v45, %v9403_v58  ;;  %v2481_v14 = vadd.f32 %v2449_v22, %v9403_v58 }
 0x4d5   :  { %v2485_v36 = vadd.f32 %v2453_v41, %v9403_v58  ;;  %v2489_v37 = vadd.f32 %v2457_v29, %v9403_v58  ;;  %v2493_v49 = vadd.f32 %v2461_v26, %v9403_v58  ;;  %v5279_v6 = vmul.f32 -1.442695, %v2477_v19  ;;  %v9410_v58 = vld [vmem:[#allocation63_spill] sm:$0xff] }
 0x4d6   :  { %v5273_v35 = vmul.f32 -1.442695, %v2465_v17  ;;  %v5275_v12 = vmul.f32 -1.442695, %v2469_v63  ;;  %v5277_v10 = vmul.f32 -1.442695, %v2473_v0  ;;  %v2447_v28 = vadd.f32 %v2364_v11, %v9404_v31 }
 0x4d7   :  { %6459 = vpow2.f32 %v5279_v6  ;;  %v5281_v38 = vmul.f32 -1.442695, %v2481_v14  ;;  %v5283_v43 = vmul.f32 -1.442695, %v2485_v36  ;;  %v5285_v54 = vmul.f32 -1.442695, %v2489_v37 }
 0x4d8   :  { %6461 = vpow2.f32 %v5273_v35  ;;  %v5287_v45 = vmul.f32 -1.442695, %v2493_v49  ;;  %v2375_v34 = vrot.slane %v2364_v11, 5  ;;  %v2379_v22 = vrot.slane %v2364_v11, 6  ;;  %v9405_v17 = vld [vmem:[#allocation44_spill] sm:$0xff]  ;;  %v9406_v0 = vld [vmem:[#allocation47_spill] sm:$0xff] }
 0x4d9   :  { %6463 = vpow2.f32 %v5275_v12  ;;  %v2383_v41 = vrot.slane %v2364_v11, 7  ;;  %v2387_v30 = vrot.slane %v2364_v11, 1  ;;  %v2391_v29 = vrot.slane %v2364_v11, 2  ;;  %v9407_v6 = vld [vmem:[#allocation51_spill] sm:$0xff]  ;;  %v9408_v36 = vld [vmem:[#allocation57_spill] sm:$0xff]  ;;  %v9409_v49 = vld [vmem:[#allocation60_spill] sm:$0xff] }
 0x4da   :  { %6465 = vpow2.f32 %v5277_v10  ;;  %v2395_v26 = vrot.slane %v2364_v11, 3  ;;  %v2399_v19 = vrot.slane %v2364_v11, 4  ;;  %v2435_v63 = vadd.f32 %v2375_v34, %v9405_v17  ;;  %v9412_v10 = vld [vmem:[#allocation69_spill] sm:$0xff] }
 0x4db   :  { %6467 = vpow2.f32 %v5281_v38  ;;  %v2439_v31 = vadd.f32 %v2379_v22, %v9406_v0  ;;  %v2443_v14 = vadd.f32 %v2383_v41, %v9407_v6  ;;  %v2451_v37 = vadd.f32 %v2387_v30, %v9408_v36  ;;  %v9416_v0 = vld [vmem:[#allocation58_spill] sm:$0xff]  ;;  %v9417_v36 = vld [vmem:[#allocation61_spill] sm:$0xff] }
 0x4dc   :  { %6469 = vpow2.f32 %v5283_v43  ;;  %v2455_v35 = vadd.f32 %v2391_v29, %v9409_v49  ;;  %v2459_v12 = vadd.f32 %v2395_v26, %v9410_v58  ;;  %v2463_v13 = vadd.f32 %v2399_v19, %v9411_v1  ;;  %v9415_v1 = vld [vmem:[#allocation52_spill] sm:$0xff] }
 0x4dd   :  { %6471 = vpow2.f32 %v5285_v54  ;;  %v2467_v52 = vadd.f32 %v2435_v63, %v9412_v10  ;;  %v2471_v11 = vadd.f32 %v2439_v31, %v9412_v10  ;;  %v2475_v34 = vadd.f32 %v2443_v14, %v9412_v10 }
 0x4de   :  { %6473 = vpow2.f32 %v5287_v45  ;;  %v2479_v38 = vadd.f32 %v2447_v28, %v9412_v10  ;;  %v2483_v22 = vadd.f32 %v2451_v37, %v9412_v10  ;;  %v8181_v30 = vadd.f32 %v2455_v35, %v9412_v10  ;;  %v9414_v35 = vld [vmem:[#allocation48_spill] sm:$0xff] }
 0x4df   :  { %v8184_v43 = vadd.f32 %v2459_v12, %v9412_v10  ;;  %v8187_v41 = vadd.f32 %v2463_v13, %v9412_v10  ;;  %6475 = vtanh.f32 %v2467_v52  ;;  %v2374_v54 = vrot.slane %v8147_v21, 5  ;;  %v9413_v52 = vld [vmem:[#allocation45_spill] sm:$0xff] }
 0x4e0   :  { %6477 = vtanh.f32 %v2471_v11  ;;  %v2378_v31 = vrot.slane %v8147_v21, 6  ;;  %v2382_v45 = vrot.slane %v8147_v21, 7  ;;  %v2386_v28 = vrot.slane %v8147_v21, 1 }
 0x4e1   :  { %v6460_v29 = vpop.eup %6459  ;;  %6479 = vtanh.f32 %v2475_v34  ;;  %v2390_v26 = vrot.slane %v8147_v21, 2  ;;  %v2394_v19 = vrot.slane %v8147_v21, 3  ;;  %v2398_v63 = vrot.slane %v8147_v21, 4 }
 0x4e2   :  { %v6462_v13 = vpop.eup %6461  ;;  %v2551_v14 = vadd.f32 1.0, %v6460_v29  ;;  %6481 = vtanh.f32 %v2479_v38  ;;  %v2434_v37 = vadd.f32 %v2374_v54, %v9413_v52  ;;  %v2438_v12 = vadd.f32 %v2378_v31, %v9414_v35  ;;  %v9418_v54 = vld [vmem:[#allocation64_spill] sm:$0xff]  ;;  %v9419_v35 = vld [vmem:[#allocation67_spill] sm:$0xff] }
 0x4e3   :  { %v6464_v11 = vpop.eup %6463  ;;  %v2545_v10 = vadd.f32 1.0, %v6462_v13  ;;  %6483 = vtanh.f32 %v2483_v22  ;;  %v2442_v58 = vadd.f32 %v2382_v45, %v9415_v1  ;;  %v2446_v34 = vadd.f32 %v8147_v21, %v7505_v46  ;;  %v9420_v45 = vld [vmem:[#allocation70_spill] sm:$0xff] }
 0x4e4   :  { %v6466_v49 = vpop.eup %6465  ;;  %v2547_v6 = vadd.f32 1.0, %v6464_v11  ;;  %6485 = vrcp.f32 %v2551_v14  ;;  %v2450_v17 = vadd.f32 %v2386_v28, %v9416_v0  ;;  %v2454_v29 = vadd.f32 %v2390_v26, %v9417_v36 }
 0x4e5   :  { %v6468_v38 = vpop.eup %6467  ;;  %v2549_v9 = vadd.f32 1.0, %v6466_v49  ;;  %6487 = vrcp.f32 %v2545_v10  ;;  %v2458_v31 = vadd.f32 %v2394_v19, %v9418_v54  ;;  %v2462_v13 = vadd.f32 %v2398_v63, %v9419_v35 }
 0x4e6   :  { %v6470_v22 = vpop.eup %6469  ;;  %v2553_v52 = vadd.f32 1.0, %v6468_v38  ;;  %6489 = vrcp.f32 %v2547_v6  ;;  %v2466_v1 = vadd.f32 %v2434_v37, %v9420_v45  ;;  %v2470_v21 = vadd.f32 %v2438_v12, %v9420_v45 }
 0x4e7   :  { %v6472_v11 = vpop.eup %6471  ;;  %v2555_v14 = vadd.f32 1.0, %v6470_v22  ;;  %6491 = vrcp.f32 %v2549_v9  ;;  %v2474_v28 = vadd.f32 %v2442_v58, %v9420_v45  ;;  %v2478_v26 = vadd.f32 %v2446_v34, %v9420_v45 }
 0x4e8   :  { %v6474_v49 = vpop.eup %6473  ;;  %v2557_v10 = vadd.f32 1.0, %v6472_v11  ;;  %6493 = vrcp.f32 %v2553_v52  ;;  %v2482_v19 = vadd.f32 %v2450_v17, %v9420_v45  ;;  %v2486_v63 = vadd.f32 %v2454_v29, %v9420_v45 }
 0x4e9   :  { %v6476_v38 = vpop.eup %6475  ;;  %v2559_v6 = vadd.f32 1.0, %v6474_v49  ;;  %6495 = vrcp.f32 %v2555_v14  ;;  %v2490_v37 = vadd.f32 %v2458_v31, %v9420_v45  ;;  %v2494_v12 = vadd.f32 %v2462_v13, %v9420_v45 }
 0x4ea   :  { %v6478_v22 = vpop.eup %6477  ;;  %6497 = vrcp.f32 %v2557_v10  ;;  %v5274_v9 = vmul.f32 -1.442695, %v2466_v1  ;;  %v5276_v58 = vmul.f32 -1.442695, %v2470_v21  ;;  %v5278_v35 = vmul.f32 -1.442695, %v2474_v28 }
 0x4eb   :  { %v6480_v34 = vpop.eup %6479  ;;  %6499 = vrcp.f32 %v2559_v6  ;;  %v5280_v11 = vmul.f32 -1.442695, %v2478_v26  ;;  %v5282_v52 = vmul.f32 -1.442695, %v2482_v19  ;;  %v5284_v54 = vmul.f32 -1.442695, %v2486_v63 }
 0x4ec   :  { %v6482_v17 = vpop.eup %6481  ;;  %6501 = vtanh.f32 %v8181_v30  ;;  %v5286_v29 = vmul.f32 -1.442695, %v2490_v37  ;;  %v5288_v49 = vmul.f32 -1.442695, %v2494_v12  ;;  %v2376_v14 = vrot.slane %v8149_v16, 5 }
 0x4ed   :  { %v6484_v31 = vpop.eup %6483  ;;  %6503 = vtanh.f32 %v8184_v43  ;;  %v2380_v13 = vrot.slane %v8149_v16, 6  ;;  %v2384_v1 = vrot.slane %v8149_v16, 7  ;;  %v2388_v21 = vrot.slane %v8149_v16, 1 }
 0x4ee   :  { %v6486_v28 = vpop.eup %6485  ;;  %6505 = vtanh.f32 %v8187_v41  ;;  %v2392_v26 = vrot.slane %v8149_v16, 2  ;;  %v2396_v30 = vrot.slane %v8149_v16, 3  ;;  %v2400_v10 = vrot.slane %v8149_v16, 4 }
 0x4ef   :  { %v6488_v19 = vpop.eup %6487  ;;  %6507 = vpow2.f32 %v5274_v9  ;;  %v2436_v63 = vadd.f32 %v2376_v14, %v7483_v27  ;;  %v2440_v43 = vadd.f32 %v2380_v13, %v7491_v33  ;;  %v2444_v6 = vadd.f32 %v2384_v1, %v7499_v39 }
 0x4f0   :  { %v6490_v37 = vpop.eup %6489  ;;  %v8226_v12 = vmul.f32 %v6488_v19, %v6476_v38  ;;  %6509 = vpow2.f32 %v5276_v58  ;;  %v2448_v41 = vadd.f32 %v8149_v16, %v7507_v47  ;;  %v2452_v45 = vadd.f32 %v2388_v21, %v7515_v57 }
 0x4f1   :  { %v6492_v36 = vpop.eup %6491  ;;  %v8231_v0 = vmul.f32 %v6490_v37, %v6478_v22  ;;  %6511 = vpow2.f32 %v5278_v35  ;;  %v2456_v9 = vadd.f32 %v2392_v26, %v7523_v5  ;;  %v2460_v14 = vadd.f32 %v2396_v30, %v7531_v18 }
 0x4f2   :  { %v6494_v13 = vpop.eup %6493  ;;  %v8235_v33 = vmul.f32 %v6492_v36, %v6480_v34  ;;  %6513 = vpow2.f32 %v5280_v11  ;;  %v2464_v38 = vadd.f32 %v2400_v10, %v7539_v40  ;;  %v2468_v58 = vadd.f32 %v2436_v63, %v7550_v53 }
 0x4f3   :  { %v6496_v1 = vpop.eup %6495  ;;  %6515 = vpow2.f32 %v5282_v52  ;;  %v2472_v16 = vadd.f32 %v2440_v43, %v7550_v53  ;;  %v2476_v22 = vadd.f32 %v2444_v6, %v7550_v53  ;;  %v2480_v35 = vadd.f32 %v2448_v41, %v7550_v53 }
 0x4f4   :  { %v6498_v21 = vpop.eup %6497  ;;  %6517 = vpow2.f32 %v5284_v54  ;;  %v2484_v26 = vadd.f32 %v2452_v45, %v7550_v53  ;;  %v5289_v36 = vmul.f32 -1.442695, %v2468_v58  ;;  %v8243_v6 = vmul.f32 %v6486_v28, %v6482_v17 }
 0x4f5   :  { %v6500_v30 = vpop.eup %6499  ;;  %6519 = vpow2.f32 %v5286_v29  ;;  %v5290_v34 = vmul.f32 -1.442695, %v2472_v16  ;;  %v5291_v10 = vmul.f32 -1.442695, %v2476_v22  ;;  %v5292_v19 = vmul.f32 -1.442695, %v2480_v35 }
 0x4f6   :  { %v6502_v11 = vpop.eup %6501  ;;  %6521 = vpow2.f32 %v5288_v49  ;;  %v5293_v52 = vmul.f32 -1.442695, %v2484_v26  ;;  %v8245_v37 = vmul.f32 %v6494_v13, %v6484_v31  ;;  %v2488_v17 = vadd.f32 %v2456_v9, %v7550_v53 }
 0x4f7   :  { %v6504_v63 = vpop.eup %6503  ;;  %6523 = vpow2.f32 %v5289_v36  ;;  %v8247_v54 = vmul.f32 %v6502_v11, %v6496_v1  ;;  %v2492_v13 = vadd.f32 %v2460_v14, %v7550_v53 }
 0x4f8   :  { %v6506_v43 = vpop.eup %6505  ;;  %6525 = vpow2.f32 %v5290_v34  ;;  %v8249_v29 = vmul.f32 %v6504_v63, %v6498_v21 }
 0x4f9   :  { %v6508_v45 = vpop.eup %6507  ;;  %6527 = vpow2.f32 %v5291_v10  ;;  %v8251_v41 = vmul.f32 %v6506_v43, %v6500_v30  ;;  %v5294_v10 = vmul.f32 -1.442695, %v2488_v17  ;;  %v2496_v43 = vadd.f32 %v2464_v38, %v7550_v53 }
 0x4fa   :  { %v6510_v49 = vpop.eup %6509  ;;  %v2546_v58 = vadd.f32 1.0, %v6508_v45  ;;  %6529 = vpow2.f32 %v5292_v19  ;;  %v2659_v38 = vrot.slane %v8073_v42, 7 }
 0x4fb   :  { %v6512_v16 = vpop.eup %6511  ;;  %v2548_v22 = vadd.f32 1.0, %v6510_v49  ;;  %6531 = vpow2.f32 %v5293_v52  ;;  %v5295_v52 = vmul.f32 -1.442695, %v2492_v13 }
 0x4fc   :  { %v6514_v35 = vpop.eup %6513  ;;  %v2550_v26 = vadd.f32 1.0, %v6512_v16  ;;  %6533 = vrcp.f32 %v2546_v58 }
 0x4fd   :  { %v6516_v31 = vpop.eup %6515  ;;  %v2552_v28 = vadd.f32 1.0, %v6514_v35  ;;  %6535 = vrcp.f32 %v2548_v22  ;;  %v2657_v35 = vrot.slane %v8065_v32, 7  ;;  %v2661_v32 = vrot.slane %v8081_v23, 7 }
 0x4fe   :  { %v6518_v1 = vpop.eup %6517  ;;  %v2554_v21 = vadd.f32 1.0, %v6516_v31  ;;  %6537 = vrcp.f32 %v2550_v26  ;;  %v2658_v31 = vrot.slane %v8069_v44, 7 }
 0x4ff   :  { %v6520_v30 = vpop.eup %6519  ;;  %v2556_v36 = vadd.f32 1.0, %v6518_v1  ;;  %6539 = vrcp.f32 %v2552_v28  ;;  %v5296_v28 = vmul.f32 -1.442695, %v2496_v43 }
 0x500   :  { %v6522_v34 = vpop.eup %6521  ;;  %v2558_v11 = vadd.f32 1.0, %v6520_v30  ;;  %6541 = vrcp.f32 %v2554_v21 }
 0x501   :  { %v6524_v19 = vpop.eup %6523  ;;  %v2560_v63 = vadd.f32 1.0, %v6522_v34  ;;  %6543 = vrcp.f32 %v2556_v36  ;;  %v2660_v36 = vrot.slane %v8077_v59, 7  ;;  %v2663_v59 = vrot.slane %v8089_v25, 7 }
 0x502   :  { %v6526_v9 = vpop.eup %6525  ;;  %6545 = vrcp.f32 %v2558_v11  ;;  %v2625_v45 = vadd.f32 1.0, %v6524_v19 }
 0x503   :  { %v6528_v14 = vpop.eup %6527  ;;  %6547 = vrcp.f32 %v2560_v63  ;;  %v2626_v49 = vadd.f32 1.0, %v6526_v9  ;;  %v2662_v63 = vrot.slane %v8085_v48, 7 }
 0x504   :  { %v6530_v58 = vpop.eup %6529  ;;  %6549 = vpow2.f32 %v5294_v10  ;;  %v2627_v16 = vadd.f32 1.0, %v6528_v14 }
 0x505   :  { %v6532_v22 = vpop.eup %6531  ;;  %6551 = vpow2.f32 %v5295_v52  ;;  %v2628_v26 = vadd.f32 1.0, %v6530_v58 }
 0x506   :  { %v6534_v17 = vpop.eup %6533  ;;  %6553 = vrcp.f32 %v2625_v45  ;;  %v2629_v1 = vadd.f32 1.0, %v6532_v22 }
 0x507   :  { %v6536_v13 = vpop.eup %6535  ;;  %6555 = vrcp.f32 %v2626_v49  ;;  %v2673_v21 = vmul.f32 %v6534_v17, %v2657_v35 }
 0x508   :  { %v6538_v30 = vpop.eup %6537  ;;  %6557 = vrcp.f32 %v2627_v16  ;;  %v2674_v34 = vmul.f32 %v6536_v13, %v2658_v31 }
 0x509   :  { %v6540_v11 = vpop.eup %6539  ;;  %6559 = vrcp.f32 %v2628_v26  ;;  %v2675_v10 = vmul.f32 %v6538_v30, %v2659_v38  ;;  %v8262_v44 = vadd.f32 %v8226_v12, %v2673_v21  ;;  %v2664_v12 = vrot.slane %v8093_v20, 7 }
 0x50a   :  { %v6542_v19 = vpop.eup %6541  ;;  %6561 = vpow2.f32 %v5296_v28  ;;  %v2676_v42 = vmul.f32 %v6540_v11, %v2660_v36  ;;  %v8266_v52 = vadd.f32 %v8231_v0, %v2674_v34 }
 0x50b   :  { %v6544_v9 = vpop.eup %6543  ;;  %6563 = vrcp.f32 %v2629_v1  ;;  %v2677_v43 = vmul.f32 %v6542_v19, %v2661_v32  ;;  %v8270_v23 = vadd.f32 %v8235_v33, %v2675_v10 }
 0x50c   :  { %v6546_v45 = vpop.eup %6545  ;;  %v2678_v14 = vmul.f32 %v6544_v9, %v2662_v63  ;;  %v8274_v49 = vadd.f32 %v8243_v6, %v2676_v42  ;;  %6565 = vtanh.f32 %v8262_v44 }
 0x50d   :  { %v6548_v48 = vpop.eup %6547  ;;  %v2679_v0 = vmul.f32 %v6546_v45, %v2663_v59  ;;  %v8278_v58 = vadd.f32 %v8245_v37, %v2677_v43  ;;  %6567 = vtanh.f32 %v8266_v52 }
 0x50e   :  { %v6550_v25 = vpop.eup %6549  ;;  %v2680_v16 = vmul.f32 %v6548_v48, %v2664_v12  ;;  %v8282_v33 = vadd.f32 %v8247_v54, %v2678_v14  ;;  %6569 = vtanh.f32 %v8270_v23 }
 0x50f   :  { %v6552_v20 = vpop.eup %6551  ;;  %v2630_v22 = vadd.f32 1.0, %v6550_v25  ;;  %v8286_v6 = vadd.f32 %v8249_v29, %v2679_v0  ;;  %6571 = vtanh.f32 %v8274_v49 }
 0x510   :  { %v6554_v35 = vpop.eup %6553  ;;  %v2631_v26 = vadd.f32 1.0, %v6552_v20  ;;  %v8290_v37 = vadd.f32 %v8251_v41, %v2680_v16  ;;  %6573 = vtanh.f32 %v8278_v58 }
 0x511   :  { %v6556_v17 = vpop.eup %6555  ;;  %6575 = vrcp.f32 %v2630_v22 }
 0x512   :  { %v6558_v54 = vpop.eup %6557  ;;  %6577 = vrcp.f32 %v2631_v26 }
 0x513   :  { %v6560_v31 = vpop.eup %6559  ;;  %6579 = vtanh.f32 %v8282_v33 }
 0x514   :  { %v6562_v28 = vpop.eup %6561  ;;  %6581 = vtanh.f32 %v8286_v6 }
 0x515   :  { %v6564_v29 = vpop.eup %6563  ;;  %v2632_v13 = vadd.f32 1.0, %v6562_v28  ;;  %6583 = vtanh.f32 %v8290_v37 }
 0x516   :  { %v6566_v38 = vpop.eup %6565 }
 0x517   :  { %v6568_v1 = vpop.eup %6567  ;;  %6585 = vrcp.f32 %v2632_v13  ;;  %v2705_v41 = vmul.f32 %v6566_v38, %v6554_v35 }
 0x518   :  { %v6570_v21 = vpop.eup %6569  ;;  %v2706_v30 = vmul.f32 %v6568_v1, %v6556_v17 }
 0x519   :  { %v6572_v36 = vpop.eup %6571  ;;  %v2707_v34 = vmul.f32 %v6570_v21, %v6558_v54  ;;  %v5457_v11 = vpack.c.bf16 %v2705_v41, %v2705_v41  ;;  %v2779_v32 = vrot.slane %v2705_v41, 3 }
 0x51a   :  { %v6574_v10 = vpop.eup %6573  ;;  %v2708_v19 = vmul.f32 %v6572_v36, %v6560_v31  ;;  %v5458_v63 = vpack.c.bf16 %v2706_v30, %v2706_v30  ;;  %v2780_v42 = vrot.slane %v2706_v30, 2 }
 0x51b   :  { %v6576_v9 = vpop.eup %6575  ;;  %v2709_v59 = vmul.f32 %v6574_v10, %v6564_v29  ;;  %v5459_v43 = vpack.c.bf16 %v2707_v34, %v2707_v34  ;;  %v2745_v45 = vunpack.c.l.b16 %v5457_v11  ;;  %v2782_v12 = vrot.slane %v2707_v34, 1 }
 0x51c   :  { %v6578_v14 = vpop.eup %6577  ;;  %v5460_v48 = vpack.c.bf16 %v2708_v19, %v2708_v19  ;;  %v2746_v0 = vunpack.c.l.b16 %v5458_v63  ;;  %v2781_v25 = vsel %vm1047_vm0, %v2780_v42, %v2779_v32 }
 0x51d   :  { %v6580_v16 = vpop.eup %6579  ;;  %v5461_v20 = vpack.c.bf16 %v2709_v59, %v2709_v59  ;;  %v2747_v22 = vunpack.c.l.b16 %v5459_v43  ;;  %v2753_v35 = vrot.slane %v2745_v45, 3  ;;  %v2783_v26 = vsel %vm1050_vm1, %v2782_v12, %v2781_v25 }
 0x51e   :  { %v6582_v17 = vpop.eup %6581  ;;  %v2710_v54 = vmul.f32 %v6580_v16, %v6576_v9  ;;  %v2754_v31 = vrot.slane %v2746_v0, 2  ;;  %v2784_v28 = vsel %vm1053_vm2, %v2708_v19, %v2783_v26  ;;  %v2785_v41 = vrot.slane %v2709_v59, 7 }
 0x51f   :  { %v6584_v29 = vpop.eup %6583  ;;  %v2711_v13 = vmul.f32 %v6582_v17, %v6578_v14  ;;  %v2749_v38 = vunpack.c.l.b16 %v5461_v20  ;;  %v2756_v1 = vrot.slane %v2747_v22, 1  ;;  %v2748_v30 = vunpack.c.l.b16 %v5460_v48 }
 0x520   :  { %v5462_v21 = vpack.c.bf16 %v2710_v54, %v2710_v54  ;;  %v2755_v36 = vsel %vm1047_vm0, %v2754_v31, %v2753_v35  ;;  %v2787_v34 = vrot.slane %v2710_v54, 6  ;;  %v2786_v42 = vsel %vm1056_vm3, %v2785_v41, %v2784_v28  ;;  %v8314_v28 = vld [vmem:[#allocation2] sm:$0xff] }
 0x521   :  { %v6586_v11 = vpop.eup %6585  ;;  %v5463_v32 = vpack.c.bf16 %v2711_v13, %v2711_v13  ;;  %v2757_v10 = vsel %vm1050_vm1, %v2756_v1, %v2755_v36  ;;  %v2759_v63 = vrot.slane %v2749_v38, 7  ;;  %v2789_v14 = vrot.slane %v2711_v13, 5  ;;  %v9421_v13 = vld [vmem:[#allocation27_spill] sm:$0xff]  ;;  %v9422_v38 = vld [vmem:[#allocation28_spill] sm:$0xff]  ;;  %v9423_v1 = vld [vmem:[#allocation29_spill] sm:$0xff] }
 0x522   :  { %v2712_v9 = vmul.f32 %v6586_v11, %v6584_v29  ;;  %v2750_v43 = vunpack.c.l.b16 %v5462_v21  ;;  %v2758_v19 = vsel %vm1053_vm2, %v2748_v30, %v2757_v10  ;;  %v2788_v45 = vsel %vm1059_vm4, %v2787_v34, %v2786_v42  ;;  %v9424_v41 = vld [vmem:[#allocation30_spill] sm:$0xff]  ;;  %v9425_v21 = vld [vmem:[#allocation31_spill] sm:$0xff]  ;;  %v9426_v30 = vld [vmem:[#allocation32_spill] sm:$0xff] }
 0x523   :  { %v2751_v12 = vunpack.c.l.b16 %v5463_v32  ;;  %v2760_v59 = vsel %vm1056_vm3, %v2759_v63, %v2758_v19  ;;  %v2790_v20 = vsel %vm1062_vm5, %v2789_v14, %v2788_v45  ;;  %v9427_v36 = vld [vmem:[#allocation33_spill] sm:$0xff]  ;;  %v9428_v34 = vld [vmem:[#allocation34_spill] sm:$0xff]  ;;  %v9429_v11 = vld [vmem:[#allocation35_spill] sm:$0xff] }
 0x524   :  { %v5464_v48 = vpack.c.bf16 %v2712_v9, %v2712_v9  ;;  %v2761_v0 = vrot.slane %v2750_v43, 6  ;;  %v2791_v25 = vrot.slane %v2712_v9, 4  ;;  %v9430_v32 = vld [vmem:[#allocation36_spill] sm:$0xff]  ;;  %v9431_v10 = vld [vmem:[#allocation37_spill] sm:$0xff]  ;;  %v9432_v63 = vld [vmem:[#allocation38_spill] sm:$0xff] }
 0x525   :  { %v2763_v16 = vrot.slane %v2751_v12, 5  ;;  %v9433_v42 = vld [vmem:[#allocation39_spill] sm:$0xff]  ;;  %v9434_v9 = vld [vmem:[#allocation40_spill] sm:$0xff]  ;;  %v9435_v43 = vld [vmem:[#allocation41_spill] sm:$0xff] }
 0x526   :  { %v2752_v22 = vunpack.c.l.b16 %v5464_v48  ;;  %v2762_v35 = vsel %vm1059_vm4, %v2761_v0, %v2760_v59  ;;  %v2792_v26 = vsel %vm1065_vm6, %v2791_v25, %v2790_v20  ;;  %v9436_v19 = vld [vmem:[#allocation42_spill] sm:$0xff]  ;;  %v9438_v12 = vld [vmem:[#allocation19_spill] sm:$0xff] }
 0x527   :  { %v2764_v17 = vsel %vm1062_vm5, %v2763_v16, %v2762_v35  ;;  %2859 = vmatmul.mubr.f32.vlgmr.msra.gmra.mrb[24].mxu0 %v2792_v26  ;;  %2930 = vmatmul.mubr.f32.vlgmr.msra.gmra.mrb[24].mxu1 %v2792_v26  ;;  %v9437_v45 = vld [vmem:[#allocation18_spill] sm:$0xff] }
 0x528   :  { %v2765_v54 = vrot.slane %v2752_v22, 4  ;;  %5820 = vmatpush1.bf16.msra.mxu0 %v7339_v50  ;;  %5852 = vmatpush1.bf16.msra.mxu1 %v7341_v51 }
 0x529   :  { %5822 = vmatprep.subr.bf16.mxu0 %v7345_v55  ;;  %5854 = vmatprep.subr.bf16.mxu1 %v7347_v56 }
 0x52a   :  { %v2766_v31 = vsel %vm1065_vm6, %v2765_v54, %v2764_v17  ;;  %3425 = vmatprep.mubr.f32.mxu0 %v8314_v28  ;;  %3496 = vmatprep.mubr.f32.mxu1 %v8314_v28  ;;  %v9439_v54 = vld [vmem:[#allocation56_spill] sm:$0xff] }
 0x52b   :  { %v2767_v29 = vpack.c.b16 %v2766_v31, %v2766_v31 }
 0x52c   :  { %5824 = vmatpush1.bf16.msra.mxu0 %v7351_v61  ;;  %5856 = vmatpush1.bf16.msra.mxu1 %v7353_v62 }
 0x52d   :  { %2770 = vst [vmem:[#allocation10 + $0xc] sm:$0xf] %v2767_v29  ;;  %5826 = vmatprep.subr.bf16.mxu0 %v7357_v3  ;;  %5858 = vmatprep.subr.bf16.mxu1 %v9293_v2  ;;  %v9440_v29 = vld [vmem:[#allocation43_spill] sm:$0xff] }
 0x530   :  { %5828 = vmatpush1.bf16.msra.mxu0 %v9294_v15  ;;  %5860 = vmatpush1.bf16.msra.mxu1 %v9295_v4 }
 0x531   :  { %5830 = vmatprep.subr.bf16.mxu0 %v9296_v7  ;;  %5862 = vmatprep.subr.bf16.mxu1 %v9338_v24 }
 0x534   :  { %5832 = vmatpush1.bf16.msra.mxu0 %v9339_v8  ;;  %5864 = vmatpush1.bf16.msra.mxu1 %v9379_v60 }
 0x535   :  { %5834 = vmatprep.subr.bf16.mxu0 %v9421_v13  ;;  %5866 = vmatprep.subr.bf16.mxu1 %v9422_v38 }
 0x538   :  { %5836 = vmatpush1.bf16.msra.mxu0 %v9423_v1  ;;  %5868 = vmatpush1.bf16.msra.mxu1 %v9424_v41 }
 0x539   :  { %5838 = vmatprep.subr.bf16.mxu0 %v9425_v21  ;;  %5870 = vmatprep.subr.bf16.mxu1 %v9426_v30  ;;  %v9447_v21 = vld [vmem:[#allocation68_spill] sm:$0xff] }
 0x53c   :  { %5840 = vmatpush1.bf16.msra.mxu0 %v9427_v36  ;;  %5872 = vmatpush1.bf16.msra.mxu1 %v9428_v34  ;;  %v9446_v36 = vld [vmem:[#allocation65_spill] sm:$0xff] }
 0x53d   :  { %5842 = vmatprep.subr.bf16.mxu0 %v9429_v11  ;;  %5874 = vmatprep.subr.bf16.mxu1 %v9430_v32  ;;  %v9445_v11 = vld [vmem:[#allocation62_spill] sm:$0xff] }
 0x540   :  { %5844 = vmatpush1.bf16.msra.mxu0 %v9431_v10  ;;  %5876 = vmatpush1.bf16.msra.mxu1 %v9432_v63  ;;  %v9444_v10 = vld [vmem:[#allocation59_spill] sm:$0xff] }
 0x541   :  { %5846 = vmatprep.subr.bf16.mxu0 %v9433_v42  ;;  %5878 = vmatprep.subr.bf16.mxu1 %v9434_v9  ;;  %v9443_v42 = vld [vmem:[#allocation53_spill] sm:$0xff] }
 0x544   :  { %5848 = vmatpush1.bf16.msra.mxu0 %v9435_v43  ;;  %5880 = vmatpush1.bf16.msra.mxu1 %v9436_v19 }
 0x545   :  { %5882 = vmatprep.subr.bf16.mxu0 %v9437_v45  ;;  %5914 = vmatprep.subr.bf16.mxu1 %v9438_v12  ;;  %v9441_v45 = vld [vmem:[#allocation46_spill] sm:$0xff] }
 0x546   :  { %v9442_v12 = vld [vmem:[#allocation50_spill] sm:$0xff] }
 0x5fa   :  { %v2860_v59 = vpop.f32.mrb[24].mxu0  ;;  %v2931_v14 = vpop.f32.mrb[24].mxu1 }
 0x5fb   :  { %v2940_v48 = vrot.slane %v2860_v59, 4  ;;  %v2944_v0 = vrot.slane %v2860_v59, 5  ;;  %v2948_v25 = vrot.slane %v2860_v59, 6  ;;  %v2952_v16 = vrot.slane %v2860_v59, 7  ;;  %v8346_v20 = vpop.f32.mrb[25].mxu0  ;;  %v8348_v22 = vpop.f32.mrb[25].mxu1 }
 0x5fc   :  { %v2956_v35 = vrot.slane %v2860_v59, 1  ;;  %v2960_v26 = vrot.slane %v2860_v59, 2  ;;  %v2964_v17 = vrot.slane %v2860_v59, 3  ;;  %v3016_v31 = vadd.f32 %v2860_v59, %v9439_v54 }
 0x5fd   :  { %v3000_v19 = vadd.f32 %v2940_v48, %v9440_v29  ;;  %v3004_v43 = vadd.f32 %v2944_v0, %v9441_v45  ;;  %v3008_v9 = vadd.f32 %v2948_v25, %v9442_v12  ;;  %v3012_v63 = vadd.f32 %v2952_v16, %v9443_v42  ;;  %v9455_v29 = vld [vmem:[#allocation66_spill] sm:$0xff] }
 0x5fe   :  { %v3020_v32 = vadd.f32 %v2956_v35, %v9444_v10  ;;  %v3024_v34 = vadd.f32 %v2960_v26, %v9445_v11  ;;  %v3028_v30 = vadd.f32 %v2964_v17, %v9446_v36  ;;  %v3048_v41 = vadd.f32 %v3016_v31, %v9447_v21  ;;  %v9448_v36 = vld [vmem:[#allocation57_spill] sm:$0xff] }
 0x5ff   :  { %v3032_v1 = vadd.f32 %v3000_v19, %v9447_v21  ;;  %v3036_v59 = vadd.f32 %v3004_v43, %v9447_v21  ;;  %v3040_v48 = vadd.f32 %v3008_v9, %v9447_v21  ;;  %v3044_v0 = vadd.f32 %v3012_v63, %v9447_v21 }
 0x600   :  { %v3052_v25 = vadd.f32 %v3020_v32, %v9447_v21  ;;  %v3056_v16 = vadd.f32 %v3024_v34, %v9447_v21  ;;  %v3060_v35 = vadd.f32 %v3028_v30, %v9447_v21  ;;  %v5313_v54 = vmul.f32 -1.442695, %v3048_v41  ;;  %v9454_v21 = vld [vmem:[#allocation63_spill] sm:$0xff] }
 0x601   :  { %v5305_v26 = vmul.f32 -1.442695, %v3032_v1  ;;  %v5307_v11 = vmul.f32 -1.442695, %v3036_v59  ;;  %v5309_v17 = vmul.f32 -1.442695, %v3040_v48  ;;  %v3018_v31 = vadd.f32 %v2931_v14, %v9448_v36 }
 0x602   :  { %v5311_v42 = vmul.f32 -1.442695, %v3044_v0  ;;  %6587 = vpow2.f32 %v5313_v54  ;;  %v5315_v19 = vmul.f32 -1.442695, %v3052_v25  ;;  %v5317_v43 = vmul.f32 -1.442695, %v3056_v16 }
 0x603   :  { %6589 = vpow2.f32 %v5305_v26  ;;  %v5319_v9 = vmul.f32 -1.442695, %v3060_v35  ;;  %v2942_v12 = vrot.slane %v2931_v14, 4  ;;  %v2946_v63 = vrot.slane %v2931_v14, 5  ;;  %v9449_v1 = vld [vmem:[#allocation44_spill] sm:$0xff]  ;;  %v9450_v48 = vld [vmem:[#allocation47_spill] sm:$0xff] }
 0x604   :  { %6591 = vpow2.f32 %v5307_v11  ;;  %v2950_v32 = vrot.slane %v2931_v14, 6  ;;  %v2954_v45 = vrot.slane %v2931_v14, 7  ;;  %v2958_v34 = vrot.slane %v2931_v14, 1  ;;  %v9451_v0 = vld [vmem:[#allocation51_spill] sm:$0xff]  ;;  %v9452_v25 = vld [vmem:[#allocation54_spill] sm:$0xff]  ;;  %v9453_v35 = vld [vmem:[#allocation60_spill] sm:$0xff] }
 0x605   :  { %6593 = vpow2.f32 %v5309_v17  ;;  %v2962_v30 = vrot.slane %v2931_v14, 2  ;;  %v2966_v41 = vrot.slane %v2931_v14, 3  ;;  %v3002_v59 = vadd.f32 %v2942_v12, %v9449_v1  ;;  %v9456_v17 = vld [vmem:[#allocation69_spill] sm:$0xff] }
 0x606   :  { %6595 = vpow2.f32 %v5311_v42  ;;  %v3006_v36 = vadd.f32 %v2946_v63, %v9450_v48  ;;  %v3010_v54 = vadd.f32 %v2950_v32, %v9451_v0  ;;  %v3014_v16 = vadd.f32 %v2954_v45, %v9452_v25  ;;  %v9460_v48 = vld [vmem:[#allocation58_spill] sm:$0xff] }
 0x607   :  { %6597 = vpow2.f32 %v5315_v19  ;;  %v3022_v26 = vadd.f32 %v2958_v34, %v9453_v35  ;;  %v3026_v11 = vadd.f32 %v2962_v30, %v9454_v21  ;;  %v3030_v10 = vadd.f32 %v2966_v41, %v9455_v29  ;;  %v9459_v29 = vld [vmem:[#allocation52_spill] sm:$0xff]  ;;  %v9461_v35 = vld [vmem:[#allocation61_spill] sm:$0xff] }
 0x608   :  { %6599 = vpow2.f32 %v5317_v43  ;;  %v3034_v38 = vadd.f32 %v3002_v59, %v9456_v17  ;;  %v3038_v14 = vadd.f32 %v3006_v36, %v9456_v17  ;;  %v3042_v42 = vadd.f32 %v3010_v54, %v9456_v17 }
 0x609   :  { %6601 = vpow2.f32 %v5319_v9  ;;  %v3046_v12 = vadd.f32 %v3014_v16, %v9456_v17  ;;  %v3050_v63 = vadd.f32 %v3018_v31, %v9456_v17  ;;  %v8380_v45 = vadd.f32 %v3022_v26, %v9456_v17  ;;  %v9458_v26 = vld [vmem:[#allocation48_spill] sm:$0xff] }
 0x60a   :  { %v8383_v19 = vadd.f32 %v3026_v11, %v9456_v17  ;;  %v8386_v32 = vadd.f32 %v3030_v10, %v9456_v17  ;;  %6603 = vtanh.f32 %v3034_v38  ;;  %v2941_v43 = vrot.slane %v8346_v20, 4  ;;  %v9457_v38 = vld [vmem:[#allocation45_spill] sm:$0xff] }
 0x60b   :  { %6605 = vtanh.f32 %v3038_v14  ;;  %v2945_v36 = vrot.slane %v8346_v20, 5  ;;  %v2949_v9 = vrot.slane %v8346_v20, 6  ;;  %v2953_v34 = vrot.slane %v8346_v20, 7 }
 0x60c   :  { %v6588_v31 = vpop.eup %6587  ;;  %6607 = vtanh.f32 %v3042_v42  ;;  %v2957_v30 = vrot.slane %v8346_v20, 1  ;;  %v2961_v41 = vrot.slane %v8346_v20, 2  ;;  %v2965_v59 = vrot.slane %v8346_v20, 3 }
 0x60d   :  { %v6590_v10 = vpop.eup %6589  ;;  %v3120_v54 = vadd.f32 1.0, %v6588_v31  ;;  %6609 = vtanh.f32 %v3046_v12  ;;  %v3001_v16 = vadd.f32 %v2941_v43, %v9457_v38  ;;  %v3005_v11 = vadd.f32 %v2945_v36, %v9458_v26  ;;  %v9462_v43 = vld [vmem:[#allocation64_spill] sm:$0xff]  ;;  %v9463_v26 = vld [vmem:[#allocation67_spill] sm:$0xff] }
 0x60e   :  { %v6592_v14 = vpop.eup %6591  ;;  %v3112_v17 = vadd.f32 1.0, %v6590_v10  ;;  %6611 = vtanh.f32 %v3050_v63  ;;  %v3009_v21 = vadd.f32 %v2949_v9, %v9459_v29  ;;  %v3013_v42 = vadd.f32 %v2953_v34, %v7505_v46  ;;  %v9464_v9 = vld [vmem:[#allocation70_spill] sm:$0xff] }
 0x60f   :  { %v6594_v25 = vpop.eup %6593  ;;  %v3114_v0 = vadd.f32 1.0, %v6592_v14  ;;  %6613 = vrcp.f32 %v3120_v54  ;;  %v3017_v1 = vadd.f32 %v8346_v20, %v9460_v48  ;;  %v3021_v31 = vadd.f32 %v2957_v30, %v9461_v35 }
 0x610   :  { %v6596_v12 = vpop.eup %6595  ;;  %v3116_v13 = vadd.f32 1.0, %v6594_v25  ;;  %6615 = vrcp.f32 %v3112_v17  ;;  %v3025_v36 = vadd.f32 %v2961_v41, %v9462_v43  ;;  %v3029_v10 = vadd.f32 %v2965_v59, %v9463_v26 }
 0x611   :  { %v6598_v63 = vpop.eup %6597  ;;  %v3118_v38 = vadd.f32 1.0, %v6596_v12  ;;  %6617 = vrcp.f32 %v3114_v0  ;;  %v3033_v34 = vadd.f32 %v3001_v16, %v9464_v9  ;;  %v3037_v14 = vadd.f32 %v3005_v11, %v9464_v9 }
 0x612   :  { %v6600_v54 = vpop.eup %6599  ;;  %v3122_v46 = vadd.f32 1.0, %v6598_v63  ;;  %6619 = vrcp.f32 %v3116_v13  ;;  %v3041_v20 = vadd.f32 %v3009_v21, %v9464_v9  ;;  %v3045_v30 = vadd.f32 %v3013_v42, %v9464_v9 }
 0x613   :  { %v6602_v25 = vpop.eup %6601  ;;  %v3124_v17 = vadd.f32 1.0, %v6600_v54  ;;  %6621 = vrcp.f32 %v3118_v38  ;;  %v3049_v41 = vadd.f32 %v3017_v1, %v9464_v9  ;;  %v3053_v59 = vadd.f32 %v3021_v31, %v9464_v9 }
 0x614   :  { %v6604_v12 = vpop.eup %6603  ;;  %v3126_v0 = vadd.f32 1.0, %v6602_v25  ;;  %6623 = vrcp.f32 %v3122_v46  ;;  %v3057_v16 = vadd.f32 %v3025_v36, %v9464_v9  ;;  %v3061_v11 = vadd.f32 %v3029_v10, %v9464_v9 }
 0x615   :  { %v6606_v63 = vpop.eup %6605  ;;  %6625 = vrcp.f32 %v3124_v17  ;;  %v5306_v13 = vmul.f32 -1.442695, %v3033_v34  ;;  %v5308_v21 = vmul.f32 -1.442695, %v3037_v14  ;;  %v5310_v26 = vmul.f32 -1.442695, %v3041_v20 }
 0x616   :  { %v6608_v42 = vpop.eup %6607  ;;  %6627 = vrcp.f32 %v3126_v0  ;;  %v5312_v54 = vmul.f32 -1.442695, %v3045_v30  ;;  %v5314_v38 = vmul.f32 -1.442695, %v3049_v41  ;;  %v5316_v43 = vmul.f32 -1.442695, %v3053_v59 }
 0x617   :  { %v6610_v1 = vpop.eup %6609  ;;  %6629 = vtanh.f32 %v8380_v45  ;;  %v5318_v31 = vmul.f32 -1.442695, %v3057_v16  ;;  %v5320_v25 = vmul.f32 -1.442695, %v3061_v11  ;;  %v2943_v46 = vrot.slane %v8348_v22, 4 }
 0x618   :  { %v6612_v36 = vpop.eup %6611  ;;  %6631 = vtanh.f32 %v8383_v19  ;;  %v2947_v10 = vrot.slane %v8348_v22, 5  ;;  %v2951_v34 = vrot.slane %v8348_v22, 6  ;;  %v2955_v14 = vrot.slane %v8348_v22, 7  ;;  %v9465_v19 = vld [vmem:[#allocation49_spill] sm:$0xff] }
 0x619   :  { %v6614_v20 = vpop.eup %6613  ;;  %6633 = vtanh.f32 %v8386_v32  ;;  %v2959_v30 = vrot.slane %v8348_v22, 1  ;;  %v2963_v45 = vrot.slane %v8348_v22, 2  ;;  %v2967_v17 = vrot.slane %v8348_v22, 3 }
 0x61a   :  { %v6616_v41 = vpop.eup %6615  ;;  %6635 = vpow2.f32 %v5306_v13  ;;  %v3003_v59 = vadd.f32 %v2943_v46, %v7483_v27  ;;  %v3007_v0 = vadd.f32 %v2947_v10, %v9465_v19  ;;  %v3011_v16 = vadd.f32 %v2951_v34, %v7499_v39 }
 0x61b   :  { %v6618_v11 = vpop.eup %6617  ;;  %v8425_v9 = vmul.f32 %v6616_v41, %v6604_v12  ;;  %6637 = vpow2.f32 %v5308_v21  ;;  %v3015_v32 = vadd.f32 %v2955_v14, %v7507_v47  ;;  %v3019_v35 = vadd.f32 %v8348_v22, %v7515_v57 }
 0x61c   :  { %v6620_v48 = vpop.eup %6619  ;;  %v8430_v29 = vmul.f32 %v6618_v11, %v6606_v63  ;;  %6639 = vpow2.f32 %v5310_v26  ;;  %v3023_v13 = vadd.f32 %v2959_v30, %v7523_v5  ;;  %v3027_v46 = vadd.f32 %v2963_v45, %v7531_v18 }
 0x61d   :  { %v6622_v10 = vpop.eup %6621  ;;  %v8434_v19 = vmul.f32 %v6620_v48, %v6608_v42  ;;  %6641 = vpow2.f32 %v5312_v54  ;;  %v3031_v12 = vadd.f32 %v2967_v17, %v7539_v40  ;;  %v3035_v21 = vadd.f32 %v3003_v59, %v7550_v53 }
 0x61e   :  { %v6624_v34 = vpop.eup %6623  ;;  %6643 = vpow2.f32 %v5314_v38  ;;  %v3039_v22 = vadd.f32 %v3007_v0, %v7550_v53  ;;  %v3043_v63 = vadd.f32 %v3011_v16, %v7550_v53  ;;  %v3047_v26 = vadd.f32 %v3015_v32, %v7550_v53 }
 0x61f   :  { %v6626_v14 = vpop.eup %6625  ;;  %6645 = vpow2.f32 %v5316_v43  ;;  %v3051_v30 = vadd.f32 %v3019_v35, %v7550_v53  ;;  %v5321_v48 = vmul.f32 -1.442695, %v3035_v21  ;;  %v8442_v16 = vmul.f32 %v6622_v10, %v6610_v1 }
 0x620   :  { %v6628_v45 = vpop.eup %6627  ;;  %6647 = vpow2.f32 %v5318_v31  ;;  %v5322_v42 = vmul.f32 -1.442695, %v3039_v22  ;;  %v5323_v17 = vmul.f32 -1.442695, %v3043_v63  ;;  %v5324_v41 = vmul.f32 -1.442695, %v3047_v26 }
 0x621   :  { %v6630_v54 = vpop.eup %6629  ;;  %6649 = vpow2.f32 %v5320_v25  ;;  %v5325_v38 = vmul.f32 -1.442695, %v3051_v30  ;;  %v8444_v11 = vmul.f32 %v6614_v20, %v6612_v36  ;;  %v3055_v1 = vadd.f32 %v3023_v13, %v7550_v53 }
 0x622   :  { %v6632_v59 = vpop.eup %6631  ;;  %6651 = vpow2.f32 %v5321_v48  ;;  %v8446_v43 = vmul.f32 %v6630_v54, %v6624_v34  ;;  %v3059_v10 = vadd.f32 %v3027_v46, %v7550_v53 }
 0x623   :  { %v6634_v0 = vpop.eup %6633  ;;  %6653 = vpow2.f32 %v5322_v42  ;;  %v8448_v31 = vmul.f32 %v6632_v59, %v6626_v14 }
 0x624   :  { %v6636_v35 = vpop.eup %6635  ;;  %6655 = vpow2.f32 %v5323_v17  ;;  %v8450_v32 = vmul.f32 %v6634_v0, %v6628_v45  ;;  %v5326_v17 = vmul.f32 -1.442695, %v3055_v1  ;;  %v3063_v0 = vadd.f32 %v3031_v12, %v7550_v53 }
 0x625   :  { %v6638_v25 = vpop.eup %6637  ;;  %v3113_v21 = vadd.f32 1.0, %v6636_v35  ;;  %6657 = vpow2.f32 %v5324_v41  ;;  %v3226_v12 = vrot.slane %v8270_v23, 7 }
 0x626   :  { %v6640_v22 = vpop.eup %6639  ;;  %v3115_v63 = vadd.f32 1.0, %v6638_v25  ;;  %6659 = vpow2.f32 %v5325_v38  ;;  %v5327_v38 = vmul.f32 -1.442695, %v3059_v10 }
 0x627   :  { %v6642_v26 = vpop.eup %6641  ;;  %v3117_v30 = vadd.f32 1.0, %v6640_v22  ;;  %6661 = vrcp.f32 %v3113_v21 }
 0x628   :  { %v6644_v36 = vpop.eup %6643  ;;  %v3119_v20 = vadd.f32 1.0, %v6642_v26  ;;  %6663 = vrcp.f32 %v3115_v63  ;;  %v3224_v26 = vrot.slane %v8262_v44, 7  ;;  %v3228_v44 = vrot.slane %v8278_v58, 7 }
 0x629   :  { %v6646_v34 = vpop.eup %6645  ;;  %v3121_v14 = vadd.f32 1.0, %v6644_v36  ;;  %6665 = vrcp.f32 %v3117_v30  ;;  %v3225_v36 = vrot.slane %v8266_v52, 7 }
 0x62a   :  { %v6648_v45 = vpop.eup %6647  ;;  %v3123_v48 = vadd.f32 1.0, %v6646_v34  ;;  %6667 = vrcp.f32 %v3119_v20  ;;  %v5328_v20 = vmul.f32 -1.442695, %v3063_v0 }
 0x62b   :  { %v6650_v42 = vpop.eup %6649  ;;  %v3125_v54 = vadd.f32 1.0, %v6648_v45  ;;  %6669 = vrcp.f32 %v3121_v14 }
 0x62c   :  { %v6652_v41 = vpop.eup %6651  ;;  %v3127_v59 = vadd.f32 1.0, %v6650_v42  ;;  %6671 = vrcp.f32 %v3123_v48  ;;  %v3227_v48 = vrot.slane %v8274_v49, 7  ;;  %v3230_v49 = vrot.slane %v8286_v6, 7 }
 0x62d   :  { %v6654_v13 = vpop.eup %6653  ;;  %6673 = vrcp.f32 %v3125_v54  ;;  %v3192_v35 = vadd.f32 1.0, %v6652_v41 }
 0x62e   :  { %v6656_v46 = vpop.eup %6655  ;;  %6675 = vrcp.f32 %v3127_v59  ;;  %v3193_v25 = vadd.f32 1.0, %v6654_v13  ;;  %v3229_v59 = vrot.slane %v8282_v33, 7 }
 0x62f   :  { %v6658_v21 = vpop.eup %6657  ;;  %6677 = vpow2.f32 %v5326_v17  ;;  %v3194_v22 = vadd.f32 1.0, %v6656_v46 }
 0x630   :  { %v6660_v63 = vpop.eup %6659  ;;  %6679 = vpow2.f32 %v5327_v38  ;;  %v3195_v30 = vadd.f32 1.0, %v6658_v21 }
 0x631   :  { %v6662_v1 = vpop.eup %6661  ;;  %6681 = vrcp.f32 %v3192_v35  ;;  %v3196_v34 = vadd.f32 1.0, %v6660_v63 }
 0x632   :  { %v6664_v10 = vpop.eup %6663  ;;  %6683 = vrcp.f32 %v3193_v25  ;;  %v3240_v14 = vmul.f32 %v6662_v1, %v3224_v26 }
 0x633   :  { %v6666_v45 = vpop.eup %6665  ;;  %6685 = vrcp.f32 %v3194_v22  ;;  %v3241_v42 = vmul.f32 %v6664_v10, %v3225_v36 }
 0x634   :  { %v6668_v54 = vpop.eup %6667  ;;  %6687 = vrcp.f32 %v3195_v30  ;;  %v3242_v17 = vmul.f32 %v6666_v45, %v3226_v12  ;;  %v8461_v52 = vadd.f32 %v8425_v9, %v3240_v14  ;;  %v3231_v9 = vrot.slane %v8290_v37, 7 }
 0x635   :  { %v6670_v41 = vpop.eup %6669  ;;  %6689 = vpow2.f32 %v5328_v20  ;;  %v3243_v23 = vmul.f32 %v6668_v54, %v3227_v48  ;;  %v8465_v38 = vadd.f32 %v8430_v29, %v3241_v42 }
 0x636   :  { %v6672_v13 = vpop.eup %6671  ;;  %6691 = vrcp.f32 %v3196_v34  ;;  %v3244_v0 = vmul.f32 %v6670_v41, %v3228_v44  ;;  %v8469_v35 = vadd.f32 %v8434_v19, %v3242_v17 }
 0x637   :  { %v6674_v58 = vpop.eup %6673  ;;  %v3245_v46 = vmul.f32 %v6672_v13, %v3229_v59  ;;  %v8473_v25 = vadd.f32 %v8442_v16, %v3243_v23  ;;  %6693 = vtanh.f32 %v8461_v52 }
 0x638   :  { %v6676_v33 = vpop.eup %6675  ;;  %v3246_v29 = vmul.f32 %v6674_v58, %v3230_v49  ;;  %v8477_v21 = vadd.f32 %v8444_v11, %v3244_v0  ;;  %6695 = vtanh.f32 %v8465_v38 }
 0x639   :  { %v6678_v6 = vpop.eup %6677  ;;  %v3247_v22 = vmul.f32 %v6676_v33, %v3231_v9  ;;  %v8481_v19 = vadd.f32 %v8446_v43, %v3245_v46  ;;  %6697 = vtanh.f32 %v8469_v35 }
 0x63a   :  { %v6680_v37 = vpop.eup %6679  ;;  %v3197_v63 = vadd.f32 1.0, %v6678_v6  ;;  %v8485_v16 = vadd.f32 %v8448_v31, %v3246_v29  ;;  %6699 = vtanh.f32 %v8473_v25 }
 0x63b   :  { %v6682_v26 = vpop.eup %6681  ;;  %v3198_v30 = vadd.f32 1.0, %v6680_v37  ;;  %v8489_v11 = vadd.f32 %v8450_v32, %v3247_v22  ;;  %6701 = vtanh.f32 %v8477_v21 }
 0x63c   :  { %v6684_v1 = vpop.eup %6683  ;;  %6703 = vrcp.f32 %v3197_v63 }
 0x63d   :  { %v6686_v43 = vpop.eup %6685  ;;  %6705 = vrcp.f32 %v3198_v30 }
 0x63e   :  { %v6688_v36 = vpop.eup %6687  ;;  %6707 = vtanh.f32 %v8481_v19 }
 0x63f   :  { %v6690_v20 = vpop.eup %6689  ;;  %6709 = vtanh.f32 %v8485_v16 }
 0x640   :  { %v6692_v31 = vpop.eup %6691  ;;  %v3199_v10 = vadd.f32 1.0, %v6690_v20  ;;  %6711 = vtanh.f32 %v8489_v11 }
 0x641   :  { %v6694_v12 = vpop.eup %6693 }
 0x642   :  { %v6696_v34 = vpop.eup %6695  ;;  %6713 = vrcp.f32 %v3199_v10  ;;  %v3272_v32 = vmul.f32 %v6694_v12, %v6682_v26 }
 0x643   :  { %v6698_v14 = vpop.eup %6697  ;;  %v3273_v45 = vmul.f32 %v6696_v34, %v6684_v1 }
 0x644   :  { %v6700_v48 = vpop.eup %6699  ;;  %v3274_v42 = vmul.f32 %v6698_v14, %v6686_v43  ;;  %v5465_v54 = vpack.c.bf16 %v3272_v32, %v3272_v32  ;;  %v3346_v44 = vrot.slane %v3272_v32, 4 }
 0x645   :  { %v6702_v17 = vpop.eup %6701  ;;  %v3275_v41 = vmul.f32 %v6700_v48, %v6688_v36  ;;  %v5466_v59 = vpack.c.bf16 %v3273_v45, %v3273_v45  ;;  %v3347_v23 = vrot.slane %v3273_v45, 3 }
 0x646   :  { %v6704_v13 = vpop.eup %6703  ;;  %v3276_v49 = vmul.f32 %v6702_v17, %v6692_v31  ;;  %v5467_v0 = vpack.c.bf16 %v3274_v42, %v3274_v42  ;;  %v3312_v58 = vunpack.c.l.b16 %v5465_v54  ;;  %v3349_v9 = vrot.slane %v3274_v42, 2 }
 0x647   :  { %v6706_v46 = vpop.eup %6705  ;;  %v5468_v33 = vpack.c.bf16 %v3275_v41, %v3275_v41  ;;  %v3313_v29 = vunpack.c.l.b16 %v5466_v59  ;;  %v3348_v6 = vsel %vm1047_vm0, %v3347_v23, %v3346_v44  ;;  %v3351_v22 = vrot.slane %v3275_v41, 1 }
 0x648   :  { %v6708_v37 = vpop.eup %6707  ;;  %v5469_v63 = vpack.c.bf16 %v3276_v49, %v3276_v49  ;;  %v3314_v26 = vunpack.c.l.b16 %v5467_v0  ;;  %v3320_v30 = vrot.slane %v3312_v58, 4  ;;  %v3350_v1 = vsel %vm1050_vm1, %v3349_v9, %v3348_v6 }
 0x649   :  { %v6710_v43 = vpop.eup %6709  ;;  %v3277_v36 = vmul.f32 %v6708_v37, %v6704_v13  ;;  %v3315_v20 = vunpack.c.l.b16 %v5468_v33  ;;  %v3321_v10 = vrot.slane %v3313_v29, 3  ;;  %v3352_v31 = vsel %vm1053_vm2, %v3351_v22, %v3350_v1 }
 0x64a   :  { %v6712_v12 = vpop.eup %6711  ;;  %v3278_v34 = vmul.f32 %v6710_v43, %v6706_v46  ;;  %v3323_v32 = vrot.slane %v3314_v26, 2  ;;  %v3353_v14 = vsel %vm1056_vm3, %v3276_v49, %v3352_v31  ;;  %v3316_v41 = vunpack.c.l.b16 %v5469_v63  ;;  %v9468_v31 = vld [vmem:[#allocation29_spill] sm:$0xff] }
 0x64b   :  { %v5470_v45 = vpack.c.bf16 %v3277_v36, %v3277_v36  ;;  %v3322_v48 = vsel %vm1047_vm0, %v3321_v10, %v3320_v30  ;;  %v3325_v42 = vrot.slane %v3315_v20, 1  ;;  %v3354_v54 = vrot.slane %v3277_v36, 7  ;;  %v9467_v10 = vld [vmem:[#allocation28_spill] sm:$0xff] }
 0x64c   :  { %v6714_v44 = vpop.eup %6713  ;;  %v5471_v17 = vpack.c.bf16 %v3278_v34, %v3278_v34  ;;  %v3324_v59 = vsel %vm1050_vm1, %v3323_v32, %v3322_v48  ;;  %v3356_v23 = vrot.slane %v3278_v34, 6  ;;  %v9470_v34 = vld [vmem:[#allocation31_spill] sm:$0xff]  ;;  %v9471_v32 = vld [vmem:[#allocation32_spill] sm:$0xff] }
 0x64d   :  { %v3279_v13 = vmul.f32 %v6714_v44, %v6712_v12  ;;  %v3317_v0 = vunpack.c.l.b16 %v5470_v45  ;;  %v3326_v58 = vsel %vm1053_vm2, %v3325_v42, %v3324_v59  ;;  %v3355_v9 = vsel %vm1059_vm4, %v3354_v54, %v3353_v14  ;;  %v9469_v12 = vld [vmem:[#allocation30_spill] sm:$0xff]  ;;  %v9472_v14 = vld [vmem:[#allocation33_spill] sm:$0xff]  ;;  %v9474_v48 = vld [vmem:[#allocation35_spill] sm:$0xff] }
 0x64e   :  { %v3318_v46 = vunpack.c.l.b16 %v5471_v17  ;;  %v3327_v49 = vsel %vm1056_vm3, %v3316_v41, %v3326_v58  ;;  %v3357_v33 = vsel %vm1062_vm5, %v3356_v23, %v3355_v9  ;;  %v9473_v45 = vld [vmem:[#allocation34_spill] sm:$0xff]  ;;  %v9475_v42 = vld [vmem:[#allocation36_spill] sm:$0xff]  ;;  %v9476_v54 = vld [vmem:[#allocation37_spill] sm:$0xff] }
 0x64f   :  { %v5472_v29 = vpack.c.bf16 %v3279_v13, %v3279_v13  ;;  %v3328_v6 = vrot.slane %v3317_v0, 7  ;;  %v3358_v22 = vrot.slane %v3279_v13, 5  ;;  %v9477_v44 = vld [vmem:[#allocation38_spill] sm:$0xff]  ;;  %v9478_v17 = vld [vmem:[#allocation39_spill] sm:$0xff]  ;;  %v9479_v41 = vld [vmem:[#allocation40_spill] sm:$0xff] }
 0x650   :  { %v3330_v37 = vrot.slane %v3318_v46, 6  ;;  %v9480_v59 = vld [vmem:[#allocation41_spill] sm:$0xff]  ;;  %v9481_v23 = vld [vmem:[#allocation42_spill] sm:$0xff]  ;;  %v9483_v0 = vld [vmem:[#allocation19_spill] sm:$0xff] }
 0x651   :  { %v3319_v26 = vunpack.c.l.b16 %v5472_v29  ;;  %v3329_v63 = vsel %vm1059_vm4, %v3328_v6, %v3327_v49  ;;  %v3359_v30 = vsel %vm1065_vm6, %v3358_v22, %v3357_v33  ;;  %v9482_v13 = vld [vmem:[#allocation18_spill] sm:$0xff] }
 0x652   :  { %v3331_v1 = vsel %vm1062_vm5, %v3330_v37, %v3329_v63  ;;  %3426 = vmatmul.mubr.f32.vlgmr.msra.gmra.mrb[26].mxu0 %v3359_v30  ;;  %3497 = vmatmul.mubr.f32.vlgmr.msra.gmra.mrb[26].mxu1 %v3359_v30  ;;  %v9484_v30 = vld [vmem:[#allocation59_spill] sm:$0xff] }
 0x653   :  { %v3332_v43 = vrot.slane %v3319_v26, 5  ;;  %5884 = vmatpush1.bf16.msra.mxu0 %v7339_v50  ;;  %5916 = vmatpush1.bf16.msra.mxu1 %v7341_v51 }
 0x654   :  { %5886 = vmatprep.subr.bf16.mxu0 %v7345_v55  ;;  %5918 = vmatprep.subr.bf16.mxu1 %v7347_v56 }
 0x655   :  { %v3333_v36 = vsel %vm1065_vm6, %v3332_v43, %v3331_v1  ;;  %3992 = vmatprep.mubr.f32.mxu0 %v8314_v28  ;;  %4063 = vmatprep.mubr.f32.mxu1 %v8314_v28  ;;  %v9466_v28 = vld [vmem:[#allocation27_spill] sm:$0xff] }
 0x656   :  { %v3334_v20 = vpack.c.b16 %v3333_v36, %v3333_v36  ;;  %v9485_v43 = vld [vmem:[#allocation43_spill] sm:$0xff] }
 0x657   :  { %5888 = vmatpush1.bf16.msra.mxu0 %v7351_v61  ;;  %5920 = vmatpush1.bf16.msra.mxu1 %v7353_v62 }
 0x658   :  { %3337 = vst [vmem:[#allocation10 + $0x10] sm:$0xf] %v3334_v20  ;;  %5890 = vmatprep.subr.bf16.mxu0 %v7357_v3  ;;  %5922 = vmatprep.subr.bf16.mxu1 %v9293_v2  ;;  %v9486_v20 = vld [vmem:[#allocation46_spill] sm:$0xff] }
 0x65b   :  { %5892 = vmatpush1.bf16.msra.mxu0 %v9294_v15  ;;  %5924 = vmatpush1.bf16.msra.mxu1 %v9295_v4 }
 0x65c   :  { %5894 = vmatprep.subr.bf16.mxu0 %v9296_v7  ;;  %5926 = vmatprep.subr.bf16.mxu1 %v9338_v24 }
 0x65f   :  { %5896 = vmatpush1.bf16.msra.mxu0 %v9339_v8  ;;  %5928 = vmatpush1.bf16.msra.mxu1 %v9379_v60 }
 0x660   :  { %5898 = vmatprep.subr.bf16.mxu0 %v9466_v28  ;;  %5930 = vmatprep.subr.bf16.mxu1 %v9467_v10 }
 0x663   :  { %5900 = vmatpush1.bf16.msra.mxu0 %v9468_v31  ;;  %5932 = vmatpush1.bf16.msra.mxu1 %v9469_v12  ;;  %v9507_v31 = vld [vmem:[#allocation61_spill] sm:$0xff] }
 0x664   :  { %5902 = vmatprep.subr.bf16.mxu0 %v9470_v34  ;;  %5934 = vmatprep.subr.bf16.mxu1 %v9471_v32 }
 0x667   :  { %5904 = vmatpush1.bf16.msra.mxu0 %v9472_v14  ;;  %5936 = vmatpush1.bf16.msra.mxu1 %v9473_v45  ;;  %v9492_v14 = vld [vmem:[#allocation68_spill] sm:$0xff] }
 0x668   :  { %5906 = vmatprep.subr.bf16.mxu0 %v9474_v48  ;;  %5938 = vmatprep.subr.bf16.mxu1 %v9475_v42  ;;  %v9491_v48 = vld [vmem:[#allocation65_spill] sm:$0xff] }
 0x66b   :  { %5908 = vmatpush1.bf16.msra.mxu0 %v9476_v54  ;;  %5940 = vmatpush1.bf16.msra.mxu1 %v9477_v44  ;;  %v9490_v54 = vld [vmem:[#allocation62_spill] sm:$0xff] }
 0x66c   :  { %5910 = vmatprep.subr.bf16.mxu0 %v9478_v17  ;;  %5942 = vmatprep.subr.bf16.mxu1 %v9479_v41  ;;  %v9489_v17 = vld [vmem:[#allocation56_spill] sm:$0xff] }
 0x66f   :  { %5912 = vmatpush1.bf16.msra.mxu0 %v9480_v59  ;;  %5944 = vmatpush1.bf16.msra.mxu1 %v9481_v23  ;;  %v9488_v59 = vld [vmem:[#allocation53_spill] sm:$0xff] }
 0x670   :  { %5946 = vmatprep.subr.bf16.mxu0 %v9482_v13  ;;  %5978 = vmatprep.subr.bf16.mxu1 %v9483_v0  ;;  %v9487_v0 = vld [vmem:[#allocation50_spill] sm:$0xff] }
 0x725   :  { %v3427_v58 = vpop.f32.mrb[26].mxu0  ;;  %v3498_v9 = vpop.f32.mrb[26].mxu1 }
 0x726   :  { %v3507_v46 = vrot.slane %v3427_v58, 3  ;;  %v3511_v49 = vrot.slane %v3427_v58, 4  ;;  %v3515_v33 = vrot.slane %v3427_v58, 5  ;;  %v3519_v29 = vrot.slane %v3427_v58, 6  ;;  %v8543_v6 = vpop.f32.mrb[27].mxu0  ;;  %v8545_v22 = vpop.f32.mrb[27].mxu1 }
 0x727   :  { %v3523_v37 = vrot.slane %v3427_v58, 7  ;;  %v3527_v26 = vrot.slane %v3427_v58, 1  ;;  %v3531_v63 = vrot.slane %v3427_v58, 2  ;;  %v3587_v1 = vadd.f32 %v3427_v58, %v9484_v30 }
 0x728   :  { %v3567_v36 = vadd.f32 %v3507_v46, %v9485_v43  ;;  %v3571_v13 = vadd.f32 %v3511_v49, %v9486_v20  ;;  %v3575_v23 = vadd.f32 %v3515_v33, %v9487_v0  ;;  %v3579_v41 = vadd.f32 %v3519_v29, %v9488_v59  ;;  %v9500_v43 = vld [vmem:[#allocation66_spill] sm:$0xff] }
 0x729   :  { %v3583_v44 = vadd.f32 %v3523_v37, %v9489_v17  ;;  %v3591_v42 = vadd.f32 %v3527_v26, %v9490_v54  ;;  %v3595_v45 = vadd.f32 %v3531_v63, %v9491_v48  ;;  %v3619_v32 = vadd.f32 %v3587_v1, %v9492_v14  ;;  %v9493_v48 = vld [vmem:[#allocation60_spill] sm:$0xff] }
 0x72a   :  { %v3599_v34 = vadd.f32 %v3567_v36, %v9492_v14  ;;  %v3603_v58 = vadd.f32 %v3571_v13, %v9492_v14  ;;  %v3607_v46 = vadd.f32 %v3575_v23, %v9492_v14  ;;  %v3611_v49 = vadd.f32 %v3579_v41, %v9492_v14 }
 0x72b   :  { %v3615_v33 = vadd.f32 %v3583_v44, %v9492_v14  ;;  %v3623_v29 = vadd.f32 %v3591_v42, %v9492_v14  ;;  %v3627_v37 = vadd.f32 %v3595_v45, %v9492_v14  ;;  %v5347_v30 = vmul.f32 -1.442695, %v3619_v32  ;;  %v9499_v14 = vld [vmem:[#allocation63_spill] sm:$0xff] }
 0x72c   :  { %v5337_v26 = vmul.f32 -1.442695, %v3599_v34  ;;  %v5339_v17 = vmul.f32 -1.442695, %v3603_v58  ;;  %v5341_v63 = vmul.f32 -1.442695, %v3607_v46  ;;  %v3589_v1 = vadd.f32 %v3498_v9, %v9493_v48 }
 0x72d   :  { %v5343_v59 = vmul.f32 -1.442695, %v3611_v49  ;;  %v5345_v36 = vmul.f32 -1.442695, %v3615_v33  ;;  %6715 = vpow2.f32 %v5347_v30  ;;  %v5349_v13 = vmul.f32 -1.442695, %v3623_v29 }
 0x72e   :  { %6717 = vpow2.f32 %v5337_v26  ;;  %v5351_v23 = vmul.f32 -1.442695, %v3627_v37  ;;  %v3509_v0 = vrot.slane %v3498_v9, 3  ;;  %v3513_v41 = vrot.slane %v3498_v9, 4  ;;  %v9494_v34 = vld [vmem:[#allocation44_spill] sm:$0xff]  ;;  %v9495_v46 = vld [vmem:[#allocation47_spill] sm:$0xff] }
 0x72f   :  { %6719 = vpow2.f32 %v5339_v17  ;;  %v3517_v44 = vrot.slane %v3498_v9, 5  ;;  %v3521_v20 = vrot.slane %v3498_v9, 6  ;;  %v3525_v42 = vrot.slane %v3498_v9, 7  ;;  %v9496_v49 = vld [vmem:[#allocation51_spill] sm:$0xff]  ;;  %v9497_v30 = vld [vmem:[#allocation54_spill] sm:$0xff]  ;;  %v9498_v37 = vld [vmem:[#allocation57_spill] sm:$0xff] }
 0x730   :  { %6721 = vpow2.f32 %v5341_v63  ;;  %v3529_v45 = vrot.slane %v3498_v9, 1  ;;  %v3533_v32 = vrot.slane %v3498_v9, 2  ;;  %v3569_v58 = vadd.f32 %v3509_v0, %v9494_v34  ;;  %v9501_v63 = vld [vmem:[#allocation69_spill] sm:$0xff]  ;;  %v9506_v34 = vld [vmem:[#allocation58_spill] sm:$0xff] }
 0x731   :  { %6723 = vpow2.f32 %v5343_v59  ;;  %v3573_v48 = vadd.f32 %v3513_v41, %v9495_v46  ;;  %v3577_v33 = vadd.f32 %v3517_v44, %v9496_v49  ;;  %v3581_v29 = vadd.f32 %v3521_v20, %v9497_v30  ;;  %v9505_v30 = vld [vmem:[#allocation55_spill] sm:$0xff] }
 0x732   :  { %6725 = vpow2.f32 %v5345_v36  ;;  %v3585_v26 = vadd.f32 %v3525_v42, %v9498_v37  ;;  %v3593_v17 = vadd.f32 %v3529_v45, %v9499_v14  ;;  %v3597_v54 = vadd.f32 %v3533_v32, %v9500_v43  ;;  %v9504_v43 = vld [vmem:[#allocation52_spill] sm:$0xff] }
 0x733   :  { %6727 = vpow2.f32 %v5349_v13  ;;  %v3601_v12 = vadd.f32 %v3569_v58, %v9501_v63  ;;  %v3605_v9 = vadd.f32 %v3573_v48, %v9501_v63  ;;  %v3609_v59 = vadd.f32 %v3577_v33, %v9501_v63 }
 0x734   :  { %6729 = vpow2.f32 %v5351_v23  ;;  %v3613_v0 = vadd.f32 %v3581_v29, %v9501_v63  ;;  %v3617_v41 = vadd.f32 %v3585_v26, %v9501_v63  ;;  %v8577_v20 = vadd.f32 %v3589_v1, %v9501_v63  ;;  %v9503_v26 = vld [vmem:[#allocation48_spill] sm:$0xff] }
 0x735   :  { %v8580_v36 = vadd.f32 %v3593_v17, %v9501_v63  ;;  %v8583_v44 = vadd.f32 %v3597_v54, %v9501_v63  ;;  %6731 = vtanh.f32 %v3601_v12  ;;  %v3508_v13 = vrot.slane %v8543_v6, 3  ;;  %v9502_v12 = vld [vmem:[#allocation45_spill] sm:$0xff] }
 0x736   :  { %6733 = vtanh.f32 %v3605_v9  ;;  %v3512_v48 = vrot.slane %v8543_v6, 4  ;;  %v3516_v23 = vrot.slane %v8543_v6, 5  ;;  %v3520_v42 = vrot.slane %v8543_v6, 6 }
 0x737   :  { %v6716_v45 = vpop.eup %6715  ;;  %6735 = vtanh.f32 %v3609_v59  ;;  %v3524_v1 = vrot.slane %v8543_v6, 7  ;;  %v3528_v32 = vrot.slane %v8543_v6, 1  ;;  %v3532_v58 = vrot.slane %v8543_v6, 2 }
 0x738   :  { %v6718_v54 = vpop.eup %6717  ;;  %v3689_v33 = vadd.f32 1.0, %v6716_v45  ;;  %6737 = vtanh.f32 %v3613_v0  ;;  %v3568_v29 = vadd.f32 %v3508_v13, %v9502_v12  ;;  %v3572_v17 = vadd.f32 %v3512_v48, %v9503_v26  ;;  %v9508_v13 = vld [vmem:[#allocation64_spill] sm:$0xff]  ;;  %v9509_v26 = vld [vmem:[#allocation67_spill] sm:$0xff] }
 0x739   :  { %v6720_v9 = vpop.eup %6719  ;;  %v3679_v63 = vadd.f32 1.0, %v6718_v54  ;;  %6739 = vtanh.f32 %v3617_v41  ;;  %v3576_v37 = vadd.f32 %v3516_v23, %v9504_v43  ;;  %v3580_v59 = vadd.f32 %v3520_v42, %v9505_v30  ;;  %v9510_v23 = vld [vmem:[#allocation70_spill] sm:$0xff] }
 0x73a   :  { %v6722_v49 = vpop.eup %6721  ;;  %v3681_v46 = vadd.f32 1.0, %v6720_v9  ;;  %6741 = vrcp.f32 %v3689_v33  ;;  %v3584_v14 = vadd.f32 %v3524_v1, %v9506_v34  ;;  %v3588_v45 = vadd.f32 %v8543_v6, %v9507_v31 }
 0x73b   :  { %v6724_v0 = vpop.eup %6723  ;;  %v3683_v10 = vadd.f32 1.0, %v6722_v49  ;;  %6743 = vrcp.f32 %v3679_v63  ;;  %v3592_v48 = vadd.f32 %v3528_v32, %v9508_v13  ;;  %v3596_v54 = vadd.f32 %v3532_v58, %v9509_v26 }
 0x73c   :  { %v6726_v41 = vpop.eup %6725  ;;  %v3685_v12 = vadd.f32 1.0, %v6724_v0  ;;  %6745 = vrcp.f32 %v3681_v46  ;;  %v3600_v42 = vadd.f32 %v3568_v29, %v9510_v23  ;;  %v3604_v9 = vadd.f32 %v3572_v17, %v9510_v23 }
 0x73d   :  { %v6728_v33 = vpop.eup %6727  ;;  %v3687_v30 = vadd.f32 1.0, %v6726_v41  ;;  %6747 = vrcp.f32 %v3683_v10  ;;  %v3608_v1 = vadd.f32 %v3576_v37, %v9510_v23  ;;  %v3612_v6 = vadd.f32 %v3580_v59, %v9510_v23 }
 0x73e   :  { %v6730_v49 = vpop.eup %6729  ;;  %v3691_v63 = vadd.f32 1.0, %v6728_v33  ;;  %6749 = vrcp.f32 %v3685_v12  ;;  %v3616_v32 = vadd.f32 %v3584_v14, %v9510_v23  ;;  %v3620_v58 = vadd.f32 %v3588_v45, %v9510_v23 }
 0x73f   :  { %v6732_v0 = vpop.eup %6731  ;;  %v3693_v46 = vadd.f32 1.0, %v6730_v49  ;;  %6751 = vrcp.f32 %v3687_v30  ;;  %v3624_v29 = vadd.f32 %v3592_v48, %v9510_v23  ;;  %v3628_v17 = vadd.f32 %v3596_v54, %v9510_v23 }
 0x740   :  { %v6734_v41 = vpop.eup %6733  ;;  %6753 = vrcp.f32 %v3691_v63  ;;  %v5338_v10 = vmul.f32 -1.442695, %v3600_v42  ;;  %v5340_v37 = vmul.f32 -1.442695, %v3604_v9  ;;  %v5342_v26 = vmul.f32 -1.442695, %v3608_v1 }
 0x741   :  { %v6736_v59 = vpop.eup %6735  ;;  %6755 = vrcp.f32 %v3693_v46  ;;  %v5344_v33 = vmul.f32 -1.442695, %v3612_v6  ;;  %v5346_v12 = vmul.f32 -1.442695, %v3616_v32  ;;  %v5348_v13 = vmul.f32 -1.442695, %v3620_v58 }
 0x742   :  { %v6738_v14 = vpop.eup %6737  ;;  %6757 = vtanh.f32 %v8577_v20  ;;  %v5350_v45 = vmul.f32 -1.442695, %v3624_v29  ;;  %v5352_v49 = vmul.f32 -1.442695, %v3628_v17  ;;  %v3510_v30 = vrot.slane %v8545_v22, 3 }
 0x743   :  { %v6740_v48 = vpop.eup %6739  ;;  %6759 = vtanh.f32 %v8580_v36  ;;  %v3514_v54 = vrot.slane %v8545_v22, 4  ;;  %v3518_v42 = vrot.slane %v8545_v22, 5  ;;  %v3522_v9 = vrot.slane %v8545_v22, 6  ;;  %v9511_v36 = vld [vmem:[#allocation49_spill] sm:$0xff] }
 0x744   :  { %v6742_v1 = vpop.eup %6741  ;;  %6761 = vtanh.f32 %v8583_v44  ;;  %v3526_v6 = vrot.slane %v8545_v22, 7  ;;  %v3530_v20 = vrot.slane %v8545_v22, 1  ;;  %v3534_v63 = vrot.slane %v8545_v22, 2 }
 0x745   :  { %v6744_v32 = vpop.eup %6743  ;;  %6763 = vpow2.f32 %v5338_v10  ;;  %v3570_v58 = vadd.f32 %v3510_v30, %v7483_v27  ;;  %v3574_v46 = vadd.f32 %v3514_v54, %v9511_v36  ;;  %v3578_v29 = vadd.f32 %v3518_v42, %v7499_v39 }
 0x746   :  { %v6746_v17 = vpop.eup %6745  ;;  %v8622_v23 = vmul.f32 %v6744_v32, %v6732_v0  ;;  %6765 = vpow2.f32 %v5340_v37  ;;  %v3582_v44 = vadd.f32 %v3522_v9, %v7507_v47  ;;  %v3586_v31 = vadd.f32 %v3526_v6, %v7515_v57 }
 0x747   :  { %v6748_v34 = vpop.eup %6747  ;;  %v8626_v43 = vmul.f32 %v6746_v17, %v6734_v41  ;;  %6767 = vpow2.f32 %v5342_v26  ;;  %v3590_v10 = vadd.f32 %v8545_v22, %v7523_v5  ;;  %v3594_v30 = vadd.f32 %v3530_v20, %v7531_v18 }
 0x748   :  { %v6750_v54 = vpop.eup %6749  ;;  %v8631_v36 = vmul.f32 %v6748_v34, %v6736_v59  ;;  %6769 = vpow2.f32 %v5344_v33  ;;  %v3598_v0 = vadd.f32 %v3534_v63, %v7539_v40  ;;  %v3602_v37 = vadd.f32 %v3570_v58, %v7550_v53 }
 0x749   :  { %v6752_v42 = vpop.eup %6751  ;;  %6771 = vpow2.f32 %v5346_v12  ;;  %v3606_v9 = vadd.f32 %v3574_v46, %v7550_v53  ;;  %v3610_v41 = vadd.f32 %v3578_v29, %v7550_v53  ;;  %v3614_v26 = vadd.f32 %v3582_v44, %v7550_v53 }
 0x74a   :  { %v6754_v6 = vpop.eup %6753  ;;  %6773 = vpow2.f32 %v5348_v13  ;;  %v3618_v22 = vadd.f32 %v3586_v31, %v7550_v53  ;;  %v5353_v34 = vmul.f32 -1.442695, %v3602_v37  ;;  %v8639_v29 = vmul.f32 %v6750_v54, %v6738_v14 }
 0x74b   :  { %v6756_v20 = vpop.eup %6755  ;;  %6775 = vpow2.f32 %v5350_v45  ;;  %v5354_v59 = vmul.f32 -1.442695, %v3606_v9  ;;  %v5355_v63 = vmul.f32 -1.442695, %v3610_v41  ;;  %v5356_v32 = vmul.f32 -1.442695, %v3614_v26 }
 0x74c   :  { %v6758_v33 = vpop.eup %6757  ;;  %6777 = vpow2.f32 %v5352_v49  ;;  %v5357_v12 = vmul.f32 -1.442695, %v3618_v22  ;;  %v8641_v17 = vmul.f32 %v6752_v42, %v6740_v48  ;;  %v3622_v14 = vadd.f32 %v3590_v10, %v7550_v53 }
 0x74d   :  { %v6760_v58 = vpop.eup %6759  ;;  %6779 = vpow2.f32 %v5353_v34  ;;  %v8643_v13 = vmul.f32 %v6758_v33, %v6742_v1  ;;  %v3626_v54 = vadd.f32 %v3594_v30, %v7550_v53 }
 0x74e   :  { %v6762_v46 = vpop.eup %6761  ;;  %6781 = vpow2.f32 %v5354_v59  ;;  %v8645_v45 = vmul.f32 %v6760_v58, %v6754_v6 }
 0x74f   :  { %v6764_v31 = vpop.eup %6763  ;;  %6783 = vpow2.f32 %v5355_v63  ;;  %v8647_v44 = vmul.f32 %v6762_v46, %v6756_v20  ;;  %v5358_v63 = vmul.f32 -1.442695, %v3622_v14  ;;  %v3630_v46 = vadd.f32 %v3598_v0, %v7550_v53 }
 0x750   :  { %v6766_v49 = vpop.eup %6765  ;;  %v3680_v37 = vadd.f32 1.0, %v6764_v31  ;;  %6785 = vpow2.f32 %v5356_v32  ;;  %v3793_v0 = vrot.slane %v8469_v35, 7  ;;  %v3796_v35 = vrot.slane %v8481_v19, 7 }
 0x751   :  { %v6768_v9 = vpop.eup %6767  ;;  %v3682_v41 = vadd.f32 1.0, %v6766_v49  ;;  %6787 = vpow2.f32 %v5357_v12  ;;  %v5359_v12 = vmul.f32 -1.442695, %v3626_v54 }
 0x752   :  { %v6770_v26 = vpop.eup %6769  ;;  %v3684_v22 = vadd.f32 1.0, %v6768_v9  ;;  %6789 = vrcp.f32 %v3680_v37 }
 0x753   :  { %v6772_v48 = vpop.eup %6771  ;;  %v3686_v1 = vadd.f32 1.0, %v6770_v26  ;;  %6791 = vrcp.f32 %v3682_v41  ;;  %v3791_v26 = vrot.slane %v8461_v52, 7  ;;  %v3795_v52 = vrot.slane %v8477_v21, 7 }
 0x754   :  { %v6774_v42 = vpop.eup %6773  ;;  %v3688_v6 = vadd.f32 1.0, %v6772_v48  ;;  %6793 = vrcp.f32 %v3684_v22  ;;  %v3792_v48 = vrot.slane %v8465_v38, 7 }
 0x755   :  { %v6776_v20 = vpop.eup %6775  ;;  %v3690_v34 = vadd.f32 1.0, %v6774_v42  ;;  %6795 = vrcp.f32 %v3686_v1  ;;  %v5360_v1 = vmul.f32 -1.442695, %v3630_v46 }
 0x756   :  { %v6778_v59 = vpop.eup %6777  ;;  %v3692_v33 = vadd.f32 1.0, %v6776_v20  ;;  %6797 = vrcp.f32 %v3688_v6 }
 0x757   :  { %v6780_v32 = vpop.eup %6779  ;;  %v3694_v58 = vadd.f32 1.0, %v6778_v59  ;;  %6799 = vrcp.f32 %v3690_v34  ;;  %v3794_v34 = vrot.slane %v8473_v25, 7  ;;  %v3797_v25 = vrot.slane %v8485_v16, 7 }
 0x758   :  { %v6782_v10 = vpop.eup %6781  ;;  %6801 = vrcp.f32 %v3692_v33  ;;  %v3759_v31 = vadd.f32 1.0, %v6780_v32 }
 0x759   :  { %v6784_v30 = vpop.eup %6783  ;;  %6803 = vrcp.f32 %v3694_v58  ;;  %v3760_v49 = vadd.f32 1.0, %v6782_v10 }
 0x75a   :  { %v6786_v37 = vpop.eup %6785  ;;  %6805 = vpow2.f32 %v5358_v63  ;;  %v3761_v9 = vadd.f32 1.0, %v6784_v30 }
 0x75b   :  { %v6788_v41 = vpop.eup %6787  ;;  %6807 = vpow2.f32 %v5359_v12  ;;  %v3762_v22 = vadd.f32 1.0, %v6786_v37 }
 0x75c   :  { %v6790_v14 = vpop.eup %6789  ;;  %6809 = vrcp.f32 %v3759_v31  ;;  %v3763_v42 = vadd.f32 1.0, %v6788_v41 }
 0x75d   :  { %v6792_v54 = vpop.eup %6791  ;;  %6811 = vrcp.f32 %v3760_v49  ;;  %v3807_v6 = vmul.f32 %v6790_v14, %v3791_v26 }
 0x75e   :  { %v6794_v20 = vpop.eup %6793  ;;  %6813 = vrcp.f32 %v3761_v9  ;;  %v3808_v59 = vmul.f32 %v6792_v54, %v3792_v48 }
 0x75f   :  { %v6796_v33 = vpop.eup %6795  ;;  %6815 = vrcp.f32 %v3762_v22  ;;  %v3809_v63 = vmul.f32 %v6794_v20, %v3793_v0  ;;  %v8658_v38 = vadd.f32 %v8622_v23, %v3807_v6  ;;  %v3798_v23 = vrot.slane %v8489_v11, 7 }
 0x760   :  { %v6798_v32 = vpop.eup %6797  ;;  %6817 = vpow2.f32 %v5360_v1  ;;  %v3810_v58 = vmul.f32 %v6796_v33, %v3794_v34  ;;  %v8662_v12 = vadd.f32 %v8626_v43, %v3808_v59 }
 0x761   :  { %v6800_v10 = vpop.eup %6799  ;;  %6819 = vrcp.f32 %v3763_v42  ;;  %v3811_v46 = vmul.f32 %v6798_v32, %v3795_v52  ;;  %v8666_v21 = vadd.f32 %v8631_v36, %v3809_v63 }
 0x762   :  { %v6802_v31 = vpop.eup %6801  ;;  %v3812_v30 = vmul.f32 %v6800_v10, %v3796_v35  ;;  %v8670_v49 = vadd.f32 %v8639_v29, %v3810_v58  ;;  %6821 = vtanh.f32 %v8658_v38 }
 0x763   :  { %v6804_v19 = vpop.eup %6803  ;;  %v3813_v43 = vmul.f32 %v6802_v31, %v3797_v25  ;;  %v8674_v37 = vadd.f32 %v8641_v17, %v3811_v46  ;;  %6823 = vtanh.f32 %v8662_v12 }
 0x764   :  { %v6806_v16 = vpop.eup %6805  ;;  %v3814_v9 = vmul.f32 %v6804_v19, %v3798_v23  ;;  %v8678_v36 = vadd.f32 %v8643_v13, %v3812_v30  ;;  %6825 = vtanh.f32 %v8666_v21 }
 0x765   :  { %v6808_v11 = vpop.eup %6807  ;;  %v3764_v41 = vadd.f32 1.0, %v6806_v16  ;;  %v8682_v29 = vadd.f32 %v8645_v45, %v3813_v43  ;;  %6827 = vtanh.f32 %v8670_v49 }
 0x766   :  { %v6810_v26 = vpop.eup %6809  ;;  %v3765_v22 = vadd.f32 1.0, %v6808_v11  ;;  %v8686_v17 = vadd.f32 %v8647_v44, %v3814_v9  ;;  %6829 = vtanh.f32 %v8674_v37 }
 0x767   :  { %v6812_v14 = vpop.eup %6811  ;;  %6831 = vrcp.f32 %v3764_v41 }
 0x768   :  { %v6814_v13 = vpop.eup %6813  ;;  %6833 = vrcp.f32 %v3765_v22 }
 0x769   :  { %v6816_v48 = vpop.eup %6815  ;;  %6835 = vtanh.f32 %v8678_v36 }
 0x76a   :  { %v6818_v1 = vpop.eup %6817  ;;  %6837 = vtanh.f32 %v8682_v29 }
 0x76b   :  { %v6820_v45 = vpop.eup %6819  ;;  %v3766_v54 = vadd.f32 1.0, %v6818_v1  ;;  %6839 = vtanh.f32 %v8686_v17 }
 0x76c   :  { %v6822_v0 = vpop.eup %6821 }
 0x76d   :  { %v6824_v42 = vpop.eup %6823  ;;  %6841 = vrcp.f32 %v3766_v54  ;;  %v3839_v44 = vmul.f32 %v6822_v0, %v6810_v26 }
 0x76e   :  { %v6826_v6 = vpop.eup %6825  ;;  %v3840_v20 = vmul.f32 %v6824_v42, %v6812_v14 }
 0x76f   :  { %v6828_v34 = vpop.eup %6827  ;;  %v3841_v59 = vmul.f32 %v6826_v6, %v6814_v13  ;;  %v5473_v33 = vpack.c.bf16 %v3839_v44, %v3839_v44  ;;  %v3913_v52 = vrot.slane %v3839_v44, 5 }
 0x770   :  { %v6830_v63 = vpop.eup %6829  ;;  %v3842_v32 = vmul.f32 %v6828_v34, %v6816_v48  ;;  %v5474_v35 = vpack.c.bf16 %v3840_v20, %v3840_v20  ;;  %v3914_v58 = vrot.slane %v3840_v20, 4 }
 0x771   :  { %v6832_v10 = vpop.eup %6831  ;;  %v3843_v25 = vmul.f32 %v6830_v63, %v6820_v45  ;;  %v5475_v46 = vpack.c.bf16 %v3841_v59, %v3841_v59  ;;  %v3879_v31 = vunpack.c.l.b16 %v5473_v33  ;;  %v3916_v23 = vrot.slane %v3841_v59, 3 }
 0x772   :  { %v6834_v30 = vpop.eup %6833  ;;  %v5476_v19 = vpack.c.bf16 %v3842_v32, %v3842_v32  ;;  %v3880_v43 = vunpack.c.l.b16 %v5474_v35  ;;  %v3915_v16 = vsel %vm1047_vm0, %v3914_v58, %v3913_v52  ;;  %v3918_v9 = vrot.slane %v3842_v32, 2 }
 0x773   :  { %v6836_v11 = vpop.eup %6835  ;;  %v5477_v41 = vpack.c.bf16 %v3843_v25, %v3843_v25  ;;  %v3881_v26 = vunpack.c.l.b16 %v5475_v46  ;;  %v3887_v22 = vrot.slane %v3879_v31, 5  ;;  %v3917_v14 = vsel %vm1050_vm1, %v3916_v23, %v3915_v16 }
 0x774   :  { %v6838_v13 = vpop.eup %6837  ;;  %v3844_v48 = vmul.f32 %v6836_v11, %v6832_v10  ;;  %v3882_v1 = vunpack.c.l.b16 %v5476_v19  ;;  %v3888_v54 = vrot.slane %v3880_v43, 4  ;;  %v3919_v45 = vsel %vm1053_vm2, %v3918_v9, %v3917_v14 }
 0x775   :  { %v6840_v0 = vpop.eup %6839  ;;  %v3845_v42 = vmul.f32 %v6838_v13, %v6834_v30  ;;  %v3883_v44 = vunpack.c.l.b16 %v5477_v41  ;;  %v3890_v6 = vrot.slane %v3881_v26, 3  ;;  %v3920_v20 = vrot.slane %v3843_v25, 1 }
 0x776   :  { %v5478_v34 = vpack.c.bf16 %v3844_v48, %v3844_v48  ;;  %v3889_v59 = vsel %vm1047_vm0, %v3888_v54, %v3887_v22  ;;  %v3892_v33 = vrot.slane %v3882_v1, 2  ;;  %v7102_v1 = vld [vmem:[#allocation2] sm:$0xff] }
 0x777   :  { %v6842_v52 = vpop.eup %6841  ;;  %v5479_v63 = vpack.c.bf16 %v3845_v42, %v3845_v42  ;;  %v3891_v32 = vsel %vm1050_vm1, %v3890_v6, %v3889_v59  ;;  %v3894_v35 = vrot.slane %v3883_v44, 1  ;;  %v3921_v58 = vsel %vm1056_vm3, %v3920_v20, %v3919_v45 }
 0x778   :  { %v3846_v10 = vmul.f32 %v6842_v52, %v6840_v0  ;;  %v3884_v46 = vunpack.c.l.b16 %v5478_v34  ;;  %v3893_v31 = vsel %vm1053_vm2, %v3892_v33, %v3891_v32  ;;  %v3922_v23 = vsel %vm1059_vm4, %v3844_v48, %v3921_v58  ;;  %v9527_v32 = vld [vmem:[#allocation62_spill] sm:$0xff]  ;;  %v9528_v58 = vld [vmem:[#allocation43_spill] sm:$0xff] }
 0x779   :  { %v3885_v30 = vunpack.c.l.b16 %v5479_v63  ;;  %v3895_v25 = vsel %vm1056_vm3, %v3894_v35, %v3893_v31  ;;  %v3923_v19 = vrot.slane %v3845_v42, 7 }
 0x77a   :  { %v5480_v43 = vpack.c.bf16 %v3846_v10, %v3846_v10  ;;  %v3896_v16 = vsel %vm1059_vm4, %v3884_v46, %v3895_v25  ;;  %v3925_v9 = vrot.slane %v3846_v10, 6  ;;  %v9529_v46 = vld [vmem:[#allocation46_spill] sm:$0xff]  ;;  %v9531_v25 = vld [vmem:[#allocation53_spill] sm:$0xff] }
 0x77b   :  { %v3897_v11 = vrot.slane %v3885_v30, 7  ;;  %v3924_v41 = vsel %vm1062_vm5, %v3923_v19, %v3922_v23  ;;  %v9530_v23 = vld [vmem:[#allocation50_spill] sm:$0xff] }
 0x77c   :  { %v3886_v26 = vunpack.c.l.b16 %v5480_v43  ;;  %v3926_v22 = vsel %vm1065_vm6, %v3925_v9, %v3924_v41  ;;  %v9532_v43 = vld [vmem:[#allocation56_spill] sm:$0xff]  ;;  %v9533_v9 = vld [vmem:[#allocation59_spill] sm:$0xff]  ;;  %v9534_v41 = vld [vmem:[#allocation65_spill] sm:$0xff] }
 0x77d   :  { %v3898_v14 = vsel %vm1062_vm5, %v3897_v11, %v3896_v16  ;;  %3993 = vmatmul.mubr.f32.vlgmr.msra.gmra.mrb[28].mxu0 %v3926_v22  ;;  %4064 = vmatmul.mubr.f32.vlgmr.msra.gmra.mrb[28].mxu1 %v3926_v22  ;;  %v9535_v22 = vld [vmem:[#allocation68_spill] sm:$0xff] }
 0x77e   :  { %v3899_v13 = vrot.slane %v3886_v26, 6  ;;  %5948 = vmatpush1.bf16.msra.mxu0 %v7339_v50  ;;  %5980 = vmatpush1.bf16.msra.mxu1 %v7341_v51  ;;  %v9512_v50 = vld [vmem:[#allocation28_spill] sm:$0xff]  ;;  %v9513_v51 = vld [vmem:[#allocation29_spill] sm:$0xff] }
 0x77f   :  { %5950 = vmatprep.subr.bf16.mxu0 %v7345_v55  ;;  %5982 = vmatprep.subr.bf16.mxu1 %v7347_v56  ;;  %v9514_v55 = vld [vmem:[#allocation30_spill] sm:$0xff]  ;;  %v9515_v56 = vld [vmem:[#allocation31_spill] sm:$0xff] }
 0x780   :  { %v3900_v48 = vsel %vm1065_vm6, %v3899_v13, %v3898_v14  ;;  %4559 = vmatprep.mubr.f32.mxu0 %v7102_v1  ;;  %4630 = vmatprep.mubr.f32.mxu1 %v7102_v1 }
 0x781   :  { %v3901_v54 = vpack.c.b16 %v3900_v48, %v3900_v48 }
 0x782   :  { %5952 = vmatpush1.bf16.msra.mxu0 %v7351_v61  ;;  %5984 = vmatpush1.bf16.msra.mxu1 %v7353_v62  ;;  %v9516_v61 = vld [vmem:[#allocation32_spill] sm:$0xff]  ;;  %v9517_v62 = vld [vmem:[#allocation33_spill] sm:$0xff] }
 0x783   :  { %3904 = vst [vmem:[#allocation10 + $0x14] sm:$0xf] %v3901_v54  ;;  %5954 = vmatprep.subr.bf16.mxu0 %v7357_v3  ;;  %5986 = vmatprep.subr.bf16.mxu1 %v9293_v2  ;;  %v9518_v3 = vld [vmem:[#allocation34_spill] sm:$0xff]  ;;  %v9519_v2 = vld [vmem:[#allocation35_spill] sm:$0xff] }
 0x786   :  { %5956 = vmatpush1.bf16.msra.mxu0 %v9294_v15  ;;  %5988 = vmatpush1.bf16.msra.mxu1 %v9295_v4  ;;  %v9520_v15 = vld [vmem:[#allocation36_spill] sm:$0xff]  ;;  %v9521_v4 = vld [vmem:[#allocation37_spill] sm:$0xff] }
 0x787   :  { %5958 = vmatprep.subr.bf16.mxu0 %v9296_v7  ;;  %5990 = vmatprep.subr.bf16.mxu1 %v9338_v24  ;;  %v9522_v7 = vld [vmem:[#allocation38_spill] sm:$0xff]  ;;  %v9523_v24 = vld [vmem:[#allocation39_spill] sm:$0xff] }
 0x78a   :  { %5960 = vmatpush1.bf16.msra.mxu0 %v9339_v8  ;;  %5992 = vmatpush1.bf16.msra.mxu1 %v9379_v60  ;;  %v9524_v8 = vld [vmem:[#allocation40_spill] sm:$0xff]  ;;  %v9525_v60 = vld [vmem:[#allocation41_spill] sm:$0xff] }
 0x78b   :  { %5962 = vmatprep.subr.bf16.mxu0 %v9466_v28  ;;  %5994 = vmatprep.subr.bf16.mxu1 %v9512_v50  ;;  %v9526_v28 = vld [vmem:[#allocation42_spill] sm:$0xff] }
 0x78e   :  { %5964 = vmatpush1.bf16.msra.mxu0 %v9513_v51  ;;  %5996 = vmatpush1.bf16.msra.mxu1 %v9514_v55 }
 0x78f   :  { %5966 = vmatprep.subr.bf16.mxu0 %v9515_v56  ;;  %5998 = vmatprep.subr.bf16.mxu1 %v9516_v61 }
 0x792   :  { %5968 = vmatpush1.bf16.msra.mxu0 %v9517_v62  ;;  %6000 = vmatpush1.bf16.msra.mxu1 %v9518_v3 }
 0x793   :  { %5970 = vmatprep.subr.bf16.mxu0 %v9519_v2  ;;  %6002 = vmatprep.subr.bf16.mxu1 %v9520_v15  ;;  %v9536_v2 = vld [vmem:[#allocation63_spill] sm:$0xff] }
 0x796   :  { %5972 = vmatpush1.bf16.msra.mxu0 %v9521_v4  ;;  %6004 = vmatpush1.bf16.msra.mxu1 %v9522_v7 }
 0x797   :  { %5974 = vmatprep.subr.bf16.mxu0 %v9523_v24  ;;  %6006 = vmatprep.subr.bf16.mxu1 %v9524_v8 }
 0x79a   :  { %5976 = vmatpush1.bf16.msra.mxu0 %v9525_v60  ;;  %6008 = vmatpush1.bf16.msra.mxu1 %v9526_v28 }
 0x850   :  { %v3994_v45 = vpop.f32.mrb[28].mxu0  ;;  %v4065_v0 = vpop.f32.mrb[28].mxu1 }
 0x851   :  { %v4074_v42 = vrot.slane %v3994_v45, 2  ;;  %v4078_v44 = vrot.slane %v3994_v45, 3  ;;  %v4082_v6 = vrot.slane %v3994_v45, 4  ;;  %v4086_v20 = vrot.slane %v3994_v45, 5  ;;  %v8736_v34 = vpop.f32.mrb[29].mxu0  ;;  %v8738_v59 = vpop.f32.mrb[29].mxu1 }
 0x852   :  { %v4090_v33 = vrot.slane %v3994_v45, 6  ;;  %v4094_v52 = vrot.slane %v3994_v45, 7  ;;  %v4098_v63 = vrot.slane %v3994_v45, 1  ;;  %v4158_v35 = vadd.f32 %v3994_v45, %v9527_v32 }
 0x853   :  { %v4134_v10 = vadd.f32 %v4074_v42, %v9528_v58  ;;  %v4138_v31 = vadd.f32 %v4078_v44, %v9529_v46  ;;  %v4142_v30 = vadd.f32 %v4082_v6, %v9530_v23  ;;  %v4146_v19 = vadd.f32 %v4086_v20, %v9531_v25 }
 0x854   :  { %v4150_v16 = vadd.f32 %v4090_v33, %v9532_v43  ;;  %v4154_v11 = vadd.f32 %v4094_v52, %v9533_v9  ;;  %v4162_v26 = vadd.f32 %v4098_v63, %v9534_v41  ;;  %v4190_v14 = vadd.f32 %v4158_v35, %v9535_v22  ;;  %v9537_v33 = vld [vmem:[#allocation44_spill] sm:$0xff]  ;;  %v9538_v63 = vld [vmem:[#allocation47_spill] sm:$0xff] }
 0x855   :  { %v4166_v13 = vadd.f32 %v4134_v10, %v9535_v22  ;;  %v4170_v48 = vadd.f32 %v4138_v31, %v9535_v22  ;;  %v4174_v1 = vadd.f32 %v4142_v30, %v9535_v22  ;;  %v4178_v54 = vadd.f32 %v4146_v19, %v9535_v22  ;;  %v9539_v10 = vld [vmem:[#allocation51_spill] sm:$0xff]  ;;  %v9540_v30 = vld [vmem:[#allocation54_spill] sm:$0xff] }
 0x856   :  { %v4182_v50 = vadd.f32 %v4150_v16, %v9535_v22  ;;  %v4186_v51 = vadd.f32 %v4154_v11, %v9535_v22  ;;  %v4194_v55 = vadd.f32 %v4162_v26, %v9535_v22  ;;  %v5381_v56 = vmul.f32 -1.442695, %v4190_v14  ;;  %v9541_v16 = vld [vmem:[#allocation57_spill] sm:$0xff]  ;;  %v9542_v26 = vld [vmem:[#allocation60_spill] sm:$0xff] }
 0x857   :  { %v5369_v61 = vmul.f32 -1.442695, %v4166_v13  ;;  %v5371_v62 = vmul.f32 -1.442695, %v4170_v48  ;;  %v5373_v3 = vmul.f32 -1.442695, %v4174_v1  ;;  %v4160_v15 = vadd.f32 %v4065_v0, %v9536_v2 }
 0x858   :  { %v5375_v4 = vmul.f32 -1.442695, %v4178_v54  ;;  %v5377_v7 = vmul.f32 -1.442695, %v4182_v50  ;;  %v5379_v24 = vmul.f32 -1.442695, %v4186_v51  ;;  %6843 = vpow2.f32 %v5381_v56 }
 0x859   :  { %6845 = vpow2.f32 %v5369_v61  ;;  %v5383_v8 = vmul.f32 -1.442695, %v4194_v55  ;;  %v4076_v60 = vrot.slane %v4065_v0, 2  ;;  %v4080_v28 = vrot.slane %v4065_v0, 3  ;;  %v9543_v13 = vld [vmem:[#allocation66_spill] sm:$0xff]  ;;  %v9544_v1 = vld [vmem:[#allocation69_spill] sm:$0xff] }
 0x85a   :  { %6847 = vpow2.f32 %v5371_v62  ;;  %v4084_v45 = vrot.slane %v4065_v0, 4  ;;  %v4088_v42 = vrot.slane %v4065_v0, 5  ;;  %v4092_v44 = vrot.slane %v4065_v0, 6  ;;  %v9550_v2 = vld [vmem:[#allocation61_spill] sm:$0xff] }
 0x85b   :  { %6849 = vpow2.f32 %v5373_v3  ;;  %v4096_v6 = vrot.slane %v4065_v0, 7  ;;  %v4100_v20 = vrot.slane %v4065_v0, 1  ;;  %v4136_v52 = vadd.f32 %v4076_v60, %v9537_v33 }
 0x85c   :  { %6851 = vpow2.f32 %v5375_v4  ;;  %v4140_v35 = vadd.f32 %v4080_v28, %v9538_v63  ;;  %v4144_v31 = vadd.f32 %v4084_v45, %v9539_v10  ;;  %v4148_v19 = vadd.f32 %v4088_v42, %v9540_v30 }
 0x85d   :  { %6853 = vpow2.f32 %v5377_v7  ;;  %v4152_v11 = vadd.f32 %v4092_v44, %v9541_v16  ;;  %v4156_v14 = vadd.f32 %v4096_v6, %v9542_v26  ;;  %v4164_v48 = vadd.f32 %v4100_v20, %v9543_v13  ;;  %v9545_v44 = vld [vmem:[#allocation45_spill] sm:$0xff]  ;;  %v9546_v20 = vld [vmem:[#allocation48_spill] sm:$0xff] }
 0x85e   :  { %6855 = vpow2.f32 %v5379_v24  ;;  %v4168_v54 = vadd.f32 %v4136_v52, %v9544_v1  ;;  %v4172_v0 = vadd.f32 %v4140_v35, %v9544_v1  ;;  %v4176_v50 = vadd.f32 %v4144_v31, %v9544_v1 }
 0x85f   :  { %6857 = vpow2.f32 %v5383_v8  ;;  %v4180_v51 = vadd.f32 %v4148_v19, %v9544_v1  ;;  %v4184_v55 = vadd.f32 %v4152_v11, %v9544_v1  ;;  %v8770_v56 = vadd.f32 %v4156_v14, %v9544_v1  ;;  %v9547_v19 = vld [vmem:[#allocation52_spill] sm:$0xff]  ;;  %v9548_v14 = vld [vmem:[#allocation55_spill] sm:$0xff] }
 0x860   :  { %v8773_v61 = vadd.f32 %v4160_v15, %v9544_v1  ;;  %v8776_v62 = vadd.f32 %v4164_v48, %v9544_v1  ;;  %6859 = vtanh.f32 %v4168_v54  ;;  %v4075_v3 = vrot.slane %v8736_v34, 2 }
 0x861   :  { %6861 = vtanh.f32 %v4172_v0  ;;  %v4079_v4 = vrot.slane %v8736_v34, 3  ;;  %v4083_v7 = vrot.slane %v8736_v34, 4  ;;  %v4087_v24 = vrot.slane %v8736_v34, 5 }
 0x862   :  { %v6844_v8 = vpop.eup %6843  ;;  %6863 = vtanh.f32 %v4176_v50  ;;  %v4091_v60 = vrot.slane %v8736_v34, 6  ;;  %v4095_v15 = vrot.slane %v8736_v34, 7  ;;  %v4099_v28 = vrot.slane %v8736_v34, 1  ;;  %v9549_v50 = vld [vmem:[#allocation58_spill] sm:$0xff] }
 0x863   :  { %v6846_v45 = vpop.eup %6845  ;;  %v4258_v42 = vadd.f32 1.0, %v6844_v8  ;;  %6865 = vtanh.f32 %v4180_v51  ;;  %v4135_v6 = vadd.f32 %v4075_v3, %v9545_v44  ;;  %v4139_v52 = vadd.f32 %v4079_v4, %v9546_v20  ;;  %v9551_v3 = vld [vmem:[#allocation64_spill] sm:$0xff]  ;;  %v9552_v20 = vld [vmem:[#allocation67_spill] sm:$0xff] }
 0x864   :  { %v6848_v35 = vpop.eup %6847  ;;  %v4246_v31 = vadd.f32 1.0, %v6846_v45  ;;  %6867 = vtanh.f32 %v4184_v55  ;;  %v4143_v11 = vadd.f32 %v4083_v7, %v9547_v19  ;;  %v4147_v48 = vadd.f32 %v4087_v24, %v9548_v14  ;;  %v9553_v7 = vld [vmem:[#allocation70_spill] sm:$0xff] }
 0x865   :  { %v6850_v54 = vpop.eup %6849  ;;  %v4248_v0 = vadd.f32 1.0, %v6848_v35  ;;  %6869 = vrcp.f32 %v4258_v42  ;;  %v4151_v1 = vadd.f32 %v4091_v60, %v9549_v50  ;;  %v4155_v26 = vadd.f32 %v4095_v15, %v9550_v2 }
 0x866   :  { %v6852_v8 = vpop.eup %6851  ;;  %v4250_v51 = vadd.f32 1.0, %v6850_v54  ;;  %6871 = vrcp.f32 %v4246_v31  ;;  %v4159_v4 = vadd.f32 %v8736_v34, %v9551_v3  ;;  %v4163_v45 = vadd.f32 %v4099_v28, %v9552_v20 }
 0x867   :  { %v6854_v55 = vpop.eup %6853  ;;  %v4252_v44 = vadd.f32 1.0, %v6852_v8  ;;  %6873 = vrcp.f32 %v4248_v0  ;;  %v4167_v24 = vadd.f32 %v4135_v6, %v9553_v7  ;;  %v4171_v35 = vadd.f32 %v4139_v52, %v9553_v7 }
 0x868   :  { %v6856_v42 = vpop.eup %6855  ;;  %v4254_v14 = vadd.f32 1.0, %v6854_v55  ;;  %6875 = vrcp.f32 %v4250_v51  ;;  %v4175_v60 = vadd.f32 %v4143_v11, %v9553_v7  ;;  %v4179_v15 = vadd.f32 %v4147_v48, %v9553_v7 }
 0x869   :  { %v6858_v31 = vpop.eup %6857  ;;  %v4256_v54 = vadd.f32 1.0, %v6856_v42  ;;  %6877 = vrcp.f32 %v4252_v44  ;;  %v4183_v34 = vadd.f32 %v4151_v1, %v9553_v7  ;;  %v4187_v28 = vadd.f32 %v4155_v26, %v9553_v7 }
 0x86a   :  { %v6860_v8 = vpop.eup %6859  ;;  %v4260_v0 = vadd.f32 1.0, %v6858_v31  ;;  %6879 = vrcp.f32 %v4254_v14  ;;  %v4191_v6 = vadd.f32 %v4159_v4, %v9553_v7  ;;  %v4195_v52 = vadd.f32 %v4163_v45, %v9553_v7 }
 0x86b   :  { %v6862_v55 = vpop.eup %6861  ;;  %6881 = vrcp.f32 %v4256_v54  ;;  %v5370_v51 = vmul.f32 -1.442695, %v4167_v24  ;;  %v5372_v11 = vmul.f32 -1.442695, %v4171_v35  ;;  %v5374_v20 = vmul.f32 -1.442695, %v4175_v60 }
 0x86c   :  { %v6864_v48 = vpop.eup %6863  ;;  %6883 = vrcp.f32 %v4260_v0  ;;  %v5376_v42 = vmul.f32 -1.442695, %v4179_v15  ;;  %v5378_v44 = vmul.f32 -1.442695, %v4183_v34  ;;  %v5380_v3 = vmul.f32 -1.442695, %v4187_v28 }
 0x86d   :  { %v6866_v1 = vpop.eup %6865  ;;  %6885 = vtanh.f32 %v8770_v56  ;;  %v5382_v26 = vmul.f32 -1.442695, %v4191_v6  ;;  %v5384_v31 = vmul.f32 -1.442695, %v4195_v52  ;;  %v4077_v14 = vrot.slane %v8738_v59, 2 }
 0x86e   :  { %v6868_v4 = vpop.eup %6867  ;;  %6887 = vtanh.f32 %v8773_v61  ;;  %v4081_v45 = vrot.slane %v8738_v59, 3  ;;  %v4085_v24 = vrot.slane %v8738_v59, 4  ;;  %v4089_v35 = vrot.slane %v8738_v59, 5  ;;  %v9554_v61 = vld [vmem:[#allocation49_spill] sm:$0xff] }
 0x86f   :  { %v6870_v60 = vpop.eup %6869  ;;  %6889 = vtanh.f32 %v8776_v62  ;;  %v4093_v15 = vrot.slane %v8738_v59, 6  ;;  %v4097_v56 = vrot.slane %v8738_v59, 7  ;;  %v4101_v54 = vrot.slane %v8738_v59, 1 }
 0x870   :  { %v6872_v34 = vpop.eup %6871  ;;  %6891 = vpow2.f32 %v5370_v51  ;;  %v4137_v28 = vadd.f32 %v4077_v14, %v7483_v27  ;;  %v4141_v0 = vadd.f32 %v4081_v45, %v9554_v61  ;;  %v4145_v6 = vadd.f32 %v4085_v24, %v7499_v39 }
 0x871   :  { %v6874_v52 = vpop.eup %6873  ;;  %v8815_v7 = vmul.f32 %v6872_v34, %v6860_v8  ;;  %6893 = vpow2.f32 %v5372_v11  ;;  %v4149_v62 = vadd.f32 %v4089_v35, %v7507_v47  ;;  %v4153_v2 = vadd.f32 %v4093_v15, %v7515_v57 }
 0x872   :  { %v6876_v50 = vpop.eup %6875  ;;  %v8819_v19 = vmul.f32 %v6874_v52, %v6862_v55  ;;  %6895 = vpow2.f32 %v5374_v20  ;;  %v4157_v51 = vadd.f32 %v4097_v56, %v7523_v5  ;;  %v4161_v14 = vadd.f32 %v8738_v59, %v7531_v18 }
 0x873   :  { %v6878_v45 = vpop.eup %6877  ;;  %v8824_v61 = vmul.f32 %v6876_v50, %v6864_v48  ;;  %6897 = vpow2.f32 %v5376_v42  ;;  %v4165_v8 = vadd.f32 %v4101_v54, %v7539_v40  ;;  %v4169_v11 = vadd.f32 %v4137_v28, %v7550_v53 }
 0x874   :  { %v6880_v24 = vpop.eup %6879  ;;  %6899 = vpow2.f32 %v5378_v44  ;;  %v4173_v35 = vadd.f32 %v4141_v0, %v7550_v53  ;;  %v4177_v55 = vadd.f32 %v4145_v6, %v7550_v53  ;;  %v4181_v20 = vadd.f32 %v4149_v62, %v7550_v53 }
 0x875   :  { %v6882_v15 = vpop.eup %6881  ;;  %6901 = vpow2.f32 %v5380_v3  ;;  %v4185_v59 = vadd.f32 %v4153_v2, %v7550_v53  ;;  %v5385_v50 = vmul.f32 -1.442695, %v4169_v11  ;;  %v8832_v6 = vmul.f32 %v6878_v45, %v6866_v1 }
 0x876   :  { %v6884_v56 = vpop.eup %6883  ;;  %6903 = vpow2.f32 %v5382_v26  ;;  %v5386_v48 = vmul.f32 -1.442695, %v4173_v35  ;;  %v5387_v54 = vmul.f32 -1.442695, %v4177_v55  ;;  %v5388_v34 = vmul.f32 -1.442695, %v4181_v20 }
 0x877   :  { %v6886_v42 = vpop.eup %6885  ;;  %6905 = vpow2.f32 %v5384_v31  ;;  %v5389_v44 = vmul.f32 -1.442695, %v4185_v59  ;;  %v8834_v52 = vmul.f32 %v6880_v24, %v6868_v4  ;;  %v4189_v1 = vadd.f32 %v4157_v51, %v7550_v53 }
 0x878   :  { %v6888_v28 = vpop.eup %6887  ;;  %6907 = vpow2.f32 %v5385_v50  ;;  %v8836_v3 = vmul.f32 %v6886_v42, %v6882_v15  ;;  %v4193_v24 = vadd.f32 %v4161_v14, %v7550_v53 }
 0x879   :  { %v6890_v0 = vpop.eup %6889  ;;  %6909 = vpow2.f32 %v5386_v48  ;;  %v8838_v26 = vmul.f32 %v6888_v28, %v6870_v60 }
 0x87a   :  { %v6892_v2 = vpop.eup %6891  ;;  %6911 = vpow2.f32 %v5387_v54  ;;  %v8840_v62 = vmul.f32 %v6890_v0, %v6884_v56  ;;  %v5390_v54 = vmul.f32 -1.442695, %v4189_v1  ;;  %v4197_v0 = vadd.f32 %v4165_v8, %v7550_v53 }
 0x87b   :  { %v6894_v31 = vpop.eup %6893  ;;  %v4247_v11 = vadd.f32 1.0, %v6892_v2  ;;  %6913 = vpow2.f32 %v5388_v34  ;;  %v4360_v8 = vrot.slane %v8666_v21, 7 }
 0x87c   :  { %v6896_v35 = vpop.eup %6895  ;;  %v4249_v55 = vadd.f32 1.0, %v6894_v31  ;;  %6915 = vpow2.f32 %v5389_v44  ;;  %v5391_v44 = vmul.f32 -1.442695, %v4193_v24 }
 0x87d   :  { %v6898_v20 = vpop.eup %6897  ;;  %v4251_v59 = vadd.f32 1.0, %v6896_v35  ;;  %6917 = vrcp.f32 %v4247_v11 }
 0x87e   :  { %v6900_v4 = vpop.eup %6899  ;;  %v4253_v45 = vadd.f32 1.0, %v6898_v20  ;;  %6919 = vrcp.f32 %v4249_v55  ;;  %v4358_v20 = vrot.slane %v8658_v38, 7  ;;  %v4362_v38 = vrot.slane %v8674_v37, 7 }
 0x87f   :  { %v6902_v60 = vpop.eup %6901  ;;  %v4255_v15 = vadd.f32 1.0, %v6900_v4  ;;  %6921 = vrcp.f32 %v4251_v59  ;;  %v4359_v4 = vrot.slane %v8662_v12, 7 }
 0x880   :  { %v6904_v56 = vpop.eup %6903  ;;  %v4257_v50 = vadd.f32 1.0, %v6902_v60  ;;  %6923 = vrcp.f32 %v4253_v45  ;;  %v5392_v45 = vmul.f32 -1.442695, %v4197_v0 }
 0x881   :  { %v6906_v48 = vpop.eup %6905  ;;  %v4259_v42 = vadd.f32 1.0, %v6904_v56  ;;  %6925 = vrcp.f32 %v4255_v15 }
 0x882   :  { %v6908_v34 = vpop.eup %6907  ;;  %v4261_v28 = vadd.f32 1.0, %v6906_v48  ;;  %6927 = vrcp.f32 %v4257_v50  ;;  %v4361_v50 = vrot.slane %v8670_v49, 7  ;;  %v4364_v49 = vrot.slane %v8682_v29, 7 }
 0x883   :  { %v6910_v51 = vpop.eup %6909  ;;  %6929 = vrcp.f32 %v4259_v42  ;;  %v4326_v2 = vadd.f32 1.0, %v6908_v34 }
 0x884   :  { %v6912_v14 = vpop.eup %6911  ;;  %6931 = vrcp.f32 %v4261_v28  ;;  %v4327_v31 = vadd.f32 1.0, %v6910_v51  ;;  %v4363_v28 = vrot.slane %v8678_v36, 7 }
 0x885   :  { %v6914_v11 = vpop.eup %6913  ;;  %6933 = vpow2.f32 %v5390_v54  ;;  %v4328_v35 = vadd.f32 1.0, %v6912_v14 }
 0x886   :  { %v6916_v55 = vpop.eup %6915  ;;  %6935 = vpow2.f32 %v5391_v44  ;;  %v4329_v59 = vadd.f32 1.0, %v6914_v11 }
 0x887   :  { %v6918_v1 = vpop.eup %6917  ;;  %6937 = vrcp.f32 %v4326_v2  ;;  %v4330_v60 = vadd.f32 1.0, %v6916_v55 }
 0x888   :  { %v6920_v24 = vpop.eup %6919  ;;  %6939 = vrcp.f32 %v4327_v31  ;;  %v4374_v15 = vmul.f32 %v6918_v1, %v4358_v20 }
 0x889   :  { %v6922_v56 = vpop.eup %6921  ;;  %6941 = vrcp.f32 %v4328_v35  ;;  %v4375_v48 = vmul.f32 %v6920_v24, %v4359_v4 }
 0x88a   :  { %v6924_v42 = vpop.eup %6923  ;;  %6943 = vrcp.f32 %v4329_v59  ;;  %v4376_v54 = vmul.f32 %v6922_v56, %v4360_v8  ;;  %v8851_v12 = vadd.f32 %v8815_v7, %v4374_v15  ;;  %v4365_v7 = vrot.slane %v8686_v17, 7 }
 0x88b   :  { %v6926_v34 = vpop.eup %6925  ;;  %6945 = vpow2.f32 %v5392_v45  ;;  %v4377_v21 = vmul.f32 %v6924_v42, %v4361_v50  ;;  %v8855_v44 = vadd.f32 %v8819_v19, %v4375_v48 }
 0x88c   :  { %v6928_v51 = vpop.eup %6927  ;;  %6947 = vrcp.f32 %v4330_v60  ;;  %v4378_v0 = vmul.f32 %v6926_v34, %v4362_v38  ;;  %v8859_v37 = vadd.f32 %v8824_v61, %v4376_v54 }
 0x88d   :  { %v6930_v2 = vpop.eup %6929  ;;  %v4379_v14 = vmul.f32 %v6928_v51, %v4363_v28  ;;  %v8863_v31 = vadd.f32 %v8832_v6, %v4377_v21  ;;  %6949 = vtanh.f32 %v8851_v12 }
 0x88e   :  { %v6932_v36 = vpop.eup %6931  ;;  %v4380_v19 = vmul.f32 %v6930_v2, %v4364_v49  ;;  %v8867_v11 = vadd.f32 %v8834_v52, %v4378_v0  ;;  %6951 = vtanh.f32 %v8855_v44 }
 0x88f   :  { %v6934_v29 = vpop.eup %6933  ;;  %v4381_v35 = vmul.f32 %v6932_v36, %v4365_v7  ;;  %v8871_v61 = vadd.f32 %v8836_v3, %v4379_v14  ;;  %6953 = vtanh.f32 %v8859_v37 }
 0x890   :  { %v6936_v17 = vpop.eup %6935  ;;  %v4331_v55 = vadd.f32 1.0, %v6934_v29  ;;  %v8875_v6 = vadd.f32 %v8838_v26, %v4380_v19  ;;  %6955 = vtanh.f32 %v8863_v31 }
 0x891   :  { %v6938_v20 = vpop.eup %6937  ;;  %v4332_v59 = vadd.f32 1.0, %v6936_v17  ;;  %v8879_v52 = vadd.f32 %v8840_v62, %v4381_v35  ;;  %6957 = vtanh.f32 %v8867_v11 }
 0x892   :  { %v6940_v1 = vpop.eup %6939  ;;  %6959 = vrcp.f32 %v4331_v55 }
 0x893   :  { %v6942_v3 = vpop.eup %6941  ;;  %6961 = vrcp.f32 %v4332_v59 }
 0x894   :  { %v6944_v4 = vpop.eup %6943  ;;  %6963 = vtanh.f32 %v8871_v61 }
 0x895   :  { %v6946_v45 = vpop.eup %6945  ;;  %6965 = vtanh.f32 %v8875_v6 }
 0x896   :  { %v6948_v26 = vpop.eup %6947  ;;  %v4333_v24 = vadd.f32 1.0, %v6946_v45  ;;  %6967 = vtanh.f32 %v8879_v52 }
 0x897   :  { %v6950_v8 = vpop.eup %6949 }
 0x898   :  { %v6952_v60 = vpop.eup %6951  ;;  %6969 = vrcp.f32 %v4333_v24  ;;  %v4406_v62 = vmul.f32 %v6950_v8, %v6938_v20 }
 0x899   :  { %v6954_v15 = vpop.eup %6953  ;;  %v4407_v56 = vmul.f32 %v6952_v60, %v6940_v1 }
 0x89a   :  { %v6956_v50 = vpop.eup %6955  ;;  %v4408_v48 = vmul.f32 %v6954_v15, %v6942_v3  ;;  %v5481_v42 = vpack.c.bf16 %v4406_v62, %v4406_v62  ;;  %v4480_v38 = vrot.slane %v4406_v62, 6 }
 0x89b   :  { %v6958_v54 = vpop.eup %6957  ;;  %v4409_v34 = vmul.f32 %v6956_v50, %v6944_v4  ;;  %v5482_v28 = vpack.c.bf16 %v4407_v56, %v4407_v56  ;;  %v4481_v21 = vrot.slane %v4407_v56, 5 }
 0x89c   :  { %v6960_v51 = vpop.eup %6959  ;;  %v4410_v49 = vmul.f32 %v6958_v54, %v6948_v26  ;;  %v5483_v0 = vpack.c.bf16 %v4408_v48, %v4408_v48  ;;  %v4446_v2 = vunpack.c.l.b16 %v5481_v42  ;;  %v4483_v7 = vrot.slane %v4408_v48, 4 }
 0x89d   :  { %v6962_v14 = vpop.eup %6961  ;;  %v5484_v36 = vpack.c.bf16 %v4409_v34, %v4409_v34  ;;  %v4447_v19 = vunpack.c.l.b16 %v5482_v28  ;;  %v4482_v29 = vsel %vm1047_vm0, %v4481_v21, %v4480_v38  ;;  %v4485_v35 = vrot.slane %v4409_v34, 3 }
 0x89e   :  { %v6964_v17 = vpop.eup %6963  ;;  %v5485_v55 = vpack.c.bf16 %v4410_v49, %v4410_v49  ;;  %v4448_v20 = vunpack.c.l.b16 %v5483_v0  ;;  %v4454_v59 = vrot.slane %v4446_v2, 6  ;;  %v4484_v1 = vsel %vm1050_vm1, %v4483_v7, %v4482_v29 }
 0x89f   :  { %v6966_v3 = vpop.eup %6965  ;;  %v4411_v4 = vmul.f32 %v6964_v17, %v6960_v51  ;;  %v4449_v45 = vunpack.c.l.b16 %v5484_v36  ;;  %v4455_v24 = vrot.slane %v4447_v19, 5  ;;  %v4486_v26 = vsel %vm1053_vm2, %v4485_v35, %v4484_v1 }
 0x8a0   :  { %v6968_v8 = vpop.eup %6967  ;;  %v4412_v60 = vmul.f32 %v6966_v3, %v6962_v14  ;;  %v4450_v62 = vunpack.c.l.b16 %v5485_v55  ;;  %v4457_v15 = vrot.slane %v4448_v20, 4  ;;  %v4487_v56 = vrot.slane %v4410_v49, 2 }
 0x8a1   :  { %v5486_v50 = vpack.c.bf16 %v4411_v4, %v4411_v4  ;;  %v4456_v48 = vsel %vm1047_vm0, %v4455_v24, %v4454_v59  ;;  %v4459_v42 = vrot.slane %v4449_v45, 3  ;;  %v4489_v38 = vrot.slane %v4411_v4, 1 }
 0x8a2   :  { %v6970_v54 = vpop.eup %6969  ;;  %v5487_v34 = vpack.c.bf16 %v4412_v60, %v4412_v60  ;;  %v4458_v28 = vsel %vm1050_vm1, %v4457_v15, %v4456_v48  ;;  %v4461_v21 = vrot.slane %v4450_v62, 2  ;;  %v4488_v51 = vsel %vm1056_vm3, %v4487_v56, %v4486_v26 }
 0x8a3   :  { %v4413_v0 = vmul.f32 %v6970_v54, %v6968_v8  ;;  %v4451_v2 = vunpack.c.l.b16 %v5486_v50  ;;  %v4460_v7 = vsel %vm1053_vm2, %v4459_v42, %v4458_v28  ;;  %v4490_v14 = vsel %vm1059_vm4, %v4489_v38, %v4488_v51 }
 0x8a4   :  { %v4462_v49 = vsel %vm1056_vm3, %v4461_v21, %v4460_v7  ;;  %v4491_v36 = vsel %vm1062_vm5, %v4412_v60, %v4490_v14  ;;  %v4452_v17 = vunpack.c.l.b16 %v5487_v34 }
 0x8a5   :  { %v5488_v19 = vpack.c.bf16 %v4413_v0, %v4413_v0  ;;  %v4463_v29 = vrot.slane %v4451_v2, 1  ;;  %v4492_v35 = vrot.slane %v4413_v0, 7 }
 0x8a7   :  { %v4453_v55 = vunpack.c.l.b16 %v5488_v19  ;;  %v4464_v20 = vsel %vm1059_vm4, %v4463_v29, %v4462_v49  ;;  %v4493_v59 = vsel %vm1065_vm6, %v4492_v35, %v4491_v36 }
 0x8a8   :  { %v4465_v1 = vsel %vm1062_vm5, %v4452_v17, %v4464_v20  ;;  %4560 = vmatmul.mubr.f32.vlgmr.msra.gmra.mrb[30].mxu0 %v4493_v59  ;;  %4631 = vmatmul.mubr.f32.vlgmr.msra.gmra.mrb[30].mxu1 %v4493_v59 }
 0x8a9   :  { %v4466_v3 = vrot.slane %v4453_v55, 7 }
 0x8ab   :  { %v4467_v4 = vsel %vm1065_vm6, %v4466_v3, %v4465_v1 }
 0x8ac   :  { %v4468_v45 = vpack.c.b16 %v4467_v4, %v4467_v4 }
 0x8ae   :  { %4471 = vst [vmem:[#allocation10 + $0x18] sm:$0xf] %v4468_v45 }
 0x97b   :  { %v4561_v24 = vpop.f32.mrb[30].mxu0  ;;  %v4632_v26 = vpop.f32.mrb[30].mxu1 }
 0x97c   :  { %v4641_v8 = vrot.slane %v4561_v24, 1  ;;  %v4645_v60 = vrot.slane %v4561_v24, 2  ;;  %v4649_v62 = vrot.slane %v4561_v24, 3  ;;  %v4653_v15 = vrot.slane %v4561_v24, 4  ;;  %v8899_v56 = vpop.f32.mrb[31].mxu0  ;;  %v8901_v50 = vpop.f32.mrb[31].mxu1 }
 0x97d   :  { %v4657_v48 = vrot.slane %v4561_v24, 5  ;;  %v4661_v42 = vrot.slane %v4561_v24, 6  ;;  %v4665_v38 = vrot.slane %v4561_v24, 7  ;;  %v4729_v54 = vadd.f32 %v4561_v24, %v9534_v41 }
 0x97e   :  { %v4701_v34 = vadd.f32 %v4641_v8, %v9528_v58  ;;  %v4705_v28 = vadd.f32 %v4645_v60, %v9529_v46  ;;  %v4709_v21 = vadd.f32 %v4649_v62, %v9530_v23  ;;  %v4713_v51 = vadd.f32 %v4653_v15, %v9531_v25 }
 0x97f   :  { %v4717_v0 = vadd.f32 %v4657_v48, %v9532_v43  ;;  %v4721_v2 = vadd.f32 %v4661_v42, %v9533_v9  ;;  %v4725_v7 = vadd.f32 %v4665_v38, %v9527_v32  ;;  %v4761_v14 = vadd.f32 %v4729_v54, %v9535_v22  ;;  %v9555_v48 = vld [vmem:[#allocation60_spill] sm:$0xff]  ;;  %v9556_v38 = vld [vmem:[#allocation63_spill] sm:$0xff] }
 0x980   :  { %v4733_v49 = vadd.f32 %v4701_v34, %v9535_v22  ;;  %v4737_v41 = vadd.f32 %v4705_v28, %v9535_v22  ;;  %v4741_v58 = vadd.f32 %v4709_v21, %v9535_v22  ;;  %v4745_v46 = vadd.f32 %v4713_v51, %v9535_v22  ;;  %v9557_v34 = vld [vmem:[#allocation69_spill] sm:$0xff] }
 0x981   :  { %v4749_v23 = vadd.f32 %v4717_v0, %v9535_v22  ;;  %v4753_v25 = vadd.f32 %v4721_v2, %v9535_v22  ;;  %v4757_v43 = vadd.f32 %v4725_v7, %v9535_v22  ;;  %v5415_v36 = vmul.f32 -1.442695, %v4761_v14 }
 0x982   :  { %v5401_v9 = vmul.f32 -1.442695, %v4733_v49  ;;  %v5403_v19 = vmul.f32 -1.442695, %v4737_v41  ;;  %v5405_v32 = vmul.f32 -1.442695, %v4741_v58  ;;  %v4731_v29 = vadd.f32 %v4632_v26, %v9543_v13 }
 0x983   :  { %v5407_v35 = vmul.f32 -1.442695, %v4745_v46  ;;  %v5409_v17 = vmul.f32 -1.442695, %v4749_v23  ;;  %v5411_v55 = vmul.f32 -1.442695, %v4753_v25  ;;  %6971 = vpow2.f32 %v5415_v36 }
 0x984   :  { %6973 = vpow2.f32 %v5401_v9  ;;  %v5413_v20 = vmul.f32 -1.442695, %v4757_v43  ;;  %v4643_v59 = vrot.slane %v4632_v26, 1  ;;  %v4647_v1 = vrot.slane %v4632_v26, 2  ;;  %v9558_v25 = vld [vmem:[#allocation45_spill] sm:$0xff]  ;;  %v9559_v36 = vld [vmem:[#allocation48_spill] sm:$0xff] }
 0x985   :  { %6975 = vpow2.f32 %v5403_v19  ;;  %v4651_v3 = vrot.slane %v4632_v26, 3  ;;  %v4655_v4 = vrot.slane %v4632_v26, 4  ;;  %v4659_v45 = vrot.slane %v4632_v26, 5 }
 0x986   :  { %6977 = vpow2.f32 %v5405_v32  ;;  %v4663_v22 = vrot.slane %v4632_v26, 6  ;;  %v4667_v24 = vrot.slane %v4632_v26, 7  ;;  %v4703_v8 = vadd.f32 %v4643_v59, %v9537_v33 }
 0x987   :  { %6979 = vpow2.f32 %v5407_v35  ;;  %v4707_v13 = vadd.f32 %v4647_v1, %v9538_v63  ;;  %v4711_v60 = vadd.f32 %v4651_v3, %v9539_v10  ;;  %v4715_v62 = vadd.f32 %v4655_v4, %v9540_v30  ;;  %v9562_v1 = vld [vmem:[#allocation58_spill] sm:$0xff]  ;;  %v9563_v4 = vld [vmem:[#allocation61_spill] sm:$0xff] }
 0x988   :  { %6981 = vpow2.f32 %v5409_v17  ;;  %v4719_v15 = vadd.f32 %v4659_v45, %v9541_v16  ;;  %v4723_v42 = vadd.f32 %v4663_v22, %v9555_v48  ;;  %v4727_v54 = vadd.f32 %v4667_v24, %v9556_v38  ;;  %v9561_v17 = vld [vmem:[#allocation55_spill] sm:$0xff] }
 0x989   :  { %6983 = vpow2.f32 %v5411_v55  ;;  %v4735_v28 = vadd.f32 %v4703_v8, %v9557_v34  ;;  %v4739_v26 = vadd.f32 %v4707_v13, %v9557_v34  ;;  %v4743_v33 = vadd.f32 %v4711_v60, %v9557_v34  ;;  %v9564_v8 = vld [vmem:[#allocation64_spill] sm:$0xff]  ;;  %v9565_v60 = vld [vmem:[#allocation67_spill] sm:$0xff] }
 0x98a   :  { %6985 = vpow2.f32 %v5413_v20  ;;  %v4747_v63 = vadd.f32 %v4715_v62, %v9557_v34  ;;  %v4751_v10 = vadd.f32 %v4719_v15, %v9557_v34  ;;  %v8933_v30 = vadd.f32 %v4723_v42, %v9557_v34  ;;  %v9566_v42 = vld [vmem:[#allocation70_spill] sm:$0xff] }
 0x98b   :  { %v8936_v16 = vadd.f32 %v4727_v54, %v9557_v34  ;;  %v8939_v21 = vadd.f32 %v4731_v29, %v9557_v34  ;;  %6987 = vtanh.f32 %v4735_v28  ;;  %v4642_v51 = vrot.slane %v8899_v56, 1  ;;  %v9560_v29 = vld [vmem:[#allocation52_spill] sm:$0xff] }
 0x98c   :  { %6989 = vtanh.f32 %v4739_v26  ;;  %v4646_v0 = vrot.slane %v8899_v56, 2  ;;  %v4650_v2 = vrot.slane %v8899_v56, 3  ;;  %v4654_v7 = vrot.slane %v8899_v56, 4 }
 0x98d   :  { %v6972_v14 = vpop.eup %6971  ;;  %6991 = vtanh.f32 %v4743_v33  ;;  %v4658_v49 = vrot.slane %v8899_v56, 5  ;;  %v4662_v41 = vrot.slane %v8899_v56, 6  ;;  %v4666_v58 = vrot.slane %v8899_v56, 7 }
 0x98e   :  { %v6974_v46 = vpop.eup %6973  ;;  %v4827_v23 = vadd.f32 1.0, %v6972_v14  ;;  %6993 = vtanh.f32 %v4747_v63  ;;  %v4702_v43 = vadd.f32 %v4642_v51, %v9558_v25  ;;  %v4706_v9 = vadd.f32 %v4646_v0, %v9559_v36 }
 0x98f   :  { %v6976_v19 = vpop.eup %6975  ;;  %v4813_v32 = vadd.f32 1.0, %v6974_v46  ;;  %6995 = vtanh.f32 %v4751_v10  ;;  %v4710_v35 = vadd.f32 %v4650_v2, %v9560_v29  ;;  %v4714_v55 = vadd.f32 %v4654_v7, %v9561_v17 }
 0x990   :  { %v6978_v20 = vpop.eup %6977  ;;  %v4815_v59 = vadd.f32 1.0, %v6976_v19  ;;  %6997 = vrcp.f32 %v4827_v23  ;;  %v4718_v3 = vadd.f32 %v4658_v49, %v9562_v1  ;;  %v4722_v45 = vadd.f32 %v4662_v41, %v9563_v4 }
 0x991   :  { %v6980_v22 = vpop.eup %6979  ;;  %v4817_v24 = vadd.f32 1.0, %v6978_v20  ;;  %6999 = vrcp.f32 %v4813_v32  ;;  %v4726_v13 = vadd.f32 %v4666_v58, %v9564_v8  ;;  %v4730_v62 = vadd.f32 %v8899_v56, %v9565_v60 }
 0x992   :  { %v6982_v15 = vpop.eup %6981  ;;  %v4819_v48 = vadd.f32 1.0, %v6980_v22  ;;  %7001 = vrcp.f32 %v4815_v59  ;;  %v4734_v38 = vadd.f32 %v4702_v43, %v9566_v42  ;;  %v4738_v54 = vadd.f32 %v4706_v9, %v9566_v42 }
 0x993   :  { %v6984_v34 = vpop.eup %6983  ;;  %v4821_v28 = vadd.f32 1.0, %v6982_v15  ;;  %7003 = vrcp.f32 %v4817_v24  ;;  %v4742_v26 = vadd.f32 %v4710_v35, %v9566_v42  ;;  %v4746_v33 = vadd.f32 %v4714_v55, %v9566_v42 }
 0x994   :  { %v6986_v63 = vpop.eup %6985  ;;  %v4823_v10 = vadd.f32 1.0, %v6984_v34  ;;  %7005 = vrcp.f32 %v4819_v48  ;;  %v4750_v51 = vadd.f32 %v4718_v3, %v9566_v42  ;;  %v4754_v56 = vadd.f32 %v4722_v45, %v9566_v42 }
 0x995   :  { %v6988_v0 = vpop.eup %6987  ;;  %v4825_v2 = vadd.f32 1.0, %v6986_v63  ;;  %7007 = vrcp.f32 %v4821_v28  ;;  %v4758_v7 = vadd.f32 %v4726_v13, %v9566_v42  ;;  %v4762_v14 = vadd.f32 %v4730_v62, %v9566_v42 }
 0x996   :  { %v6990_v49 = vpop.eup %6989  ;;  %7009 = vrcp.f32 %v4823_v10  ;;  %v5402_v41 = vmul.f32 -1.442695, %v4734_v38  ;;  %v5404_v58 = vmul.f32 -1.442695, %v4738_v54  ;;  %v5406_v46 = vmul.f32 -1.442695, %v4742_v26 }
 0x997   :  { %v6992_v23 = vpop.eup %6991  ;;  %7011 = vrcp.f32 %v4825_v2  ;;  %v5408_v25 = vmul.f32 -1.442695, %v4746_v33  ;;  %v5410_v43 = vmul.f32 -1.442695, %v4750_v51  ;;  %v5412_v36 = vmul.f32 -1.442695, %v4754_v56 }
 0x998   :  { %v6994_v9 = vpop.eup %6993  ;;  %7013 = vtanh.f32 %v8933_v30  ;;  %v5414_v19 = vmul.f32 -1.442695, %v4758_v7  ;;  %v5416_v32 = vmul.f32 -1.442695, %v4762_v14  ;;  %v4644_v29 = vrot.slane %v8901_v50, 1 }
 0x999   :  { %v6996_v35 = vpop.eup %6995  ;;  %7015 = vtanh.f32 %v8936_v16  ;;  %v4648_v17 = vrot.slane %v8901_v50, 2  ;;  %v4652_v55 = vrot.slane %v8901_v50, 3  ;;  %v4656_v20 = vrot.slane %v8901_v50, 4  ;;  %v9567_v16 = vld [vmem:[#allocation49_spill] sm:$0xff] }
 0x99a   :  { %v6998_v59 = vpop.eup %6997  ;;  %7017 = vtanh.f32 %v8939_v21  ;;  %v4660_v1 = vrot.slane %v8901_v50, 5  ;;  %v4664_v30 = vrot.slane %v8901_v50, 6  ;;  %v4668_v3 = vrot.slane %v8901_v50, 7 }
 0x99b   :  { %v7000_v4 = vpop.eup %6999  ;;  %7019 = vpow2.f32 %v5402_v41  ;;  %v4704_v45 = vadd.f32 %v4644_v29, %v7483_v27  ;;  %v4708_v22 = vadd.f32 %v4648_v17, %v9567_v16  ;;  %v4712_v24 = vadd.f32 %v4652_v55, %v7499_v39 }
 0x99c   :  { %v7002_v8 = vpop.eup %7001  ;;  %v8978_v13 = vmul.f32 %v7000_v4, %v6988_v0  ;;  %7021 = vpow2.f32 %v5404_v58  ;;  %v4716_v21 = vadd.f32 %v4656_v20, %v7507_v47  ;;  %v4720_v60 = vadd.f32 %v4660_v1, %v7515_v57 }
 0x99d   :  { %v7004_v62 = vpop.eup %7003  ;;  %v8982_v15 = vmul.f32 %v7002_v8, %v6990_v49  ;;  %7023 = vpow2.f32 %v5406_v46  ;;  %v4724_v48 = vadd.f32 %v4664_v30, %v7523_v5  ;;  %v4728_v27 = vadd.f32 %v4668_v3, %v7531_v18 }
 0x99e   :  { %v7006_v42 = vpop.eup %7005  ;;  %v8986_v38 = vmul.f32 %v7004_v62, %v6992_v23  ;;  %7025 = vpow2.f32 %v5408_v25  ;;  %v4732_v39 = vadd.f32 %v8901_v50, %v7539_v40  ;;  %v4736_v54 = vadd.f32 %v4704_v45, %v7550_v53 }
 0x99f   :  { %v7008_v47 = vpop.eup %7007  ;;  %v8991_v34 = vmul.f32 %v7006_v42, %v6994_v9  ;;  %7027 = vpow2.f32 %v5410_v43  ;;  %v4740_v57 = vadd.f32 %v4708_v22, %v7550_v53  ;;  %v4744_v28 = vadd.f32 %v4712_v24, %v7550_v53 }
 0x9a0   :  { %v7010_v5 = vpop.eup %7009  ;;  %v8995_v26 = vmul.f32 %v7008_v47, %v6996_v35  ;;  %7029 = vpow2.f32 %v5412_v36  ;;  %v4748_v18 = vadd.f32 %v4716_v21, %v7550_v53  ;;  %v5417_v40 = vmul.f32 -1.442695, %v4736_v54 }
 0x9a1   :  { %v7012_v33 = vpop.eup %7011  ;;  %7031 = vpow2.f32 %v5414_v19  ;;  %v5418_v50 = vmul.f32 -1.442695, %v4740_v57  ;;  %v5419_v10 = vmul.f32 -1.442695, %v4744_v28  ;;  %v4752_v36 = vadd.f32 %v4720_v60, %v7550_v53 }
 0x9a2   :  { %v7014_v63 = vpop.eup %7013  ;;  %7033 = vpow2.f32 %v5416_v32  ;;  %v5420_v0 = vmul.f32 -1.442695, %v4748_v18  ;;  %v4756_v32 = vadd.f32 %v4724_v48, %v7550_v53  ;;  %v4760_v17 = vadd.f32 %v4728_v27, %v7550_v53 }
 0x9a3   :  { %v7016_v51 = vpop.eup %7015  ;;  %v8998_v56 = vmul.f32 %v7014_v63, %v7010_v5  ;;  %7035 = vpow2.f32 %v5417_v40  ;;  %v5421_v3 = vmul.f32 -1.442695, %v4752_v36  ;;  %v4925_v48 = vrot.slane %v8851_v12, 7 }
 0x9a4   :  { %v7018_v2 = vpop.eup %7017  ;;  %v9000_v7 = vmul.f32 %v7016_v51, %v7012_v33  ;;  %7037 = vpow2.f32 %v5418_v50  ;;  %v5422_v45 = vmul.f32 -1.442695, %v4756_v32  ;;  %v5423_v22 = vmul.f32 -1.442695, %v4760_v17 }
 0x9a5   :  { %v7020_v14 = vpop.eup %7019  ;;  %v9002_v49 = vmul.f32 %v7018_v2, %v6998_v59  ;;  %7039 = vpow2.f32 %v5419_v10  ;;  %v4764_v59 = vadd.f32 %v4732_v39, %v7550_v53  ;;  %v4926_v42 = vrot.slane %v8855_v44, 7 }
 0x9a6   :  { %v7022_v41 = vpop.eup %7021  ;;  %v4814_v58 = vadd.f32 1.0, %v7020_v14  ;;  %7041 = vpow2.f32 %v5420_v0  ;;  %v4927_v47 = vrot.slane %v8859_v37, 7  ;;  %v4928_v57 = vrot.slane %v8863_v31, 7 }
 0x9a7   :  { %v7024_v46 = vpop.eup %7023  ;;  %v4816_v23 = vadd.f32 1.0, %v7022_v41  ;;  %v5424_v8 = vmul.f32 -1.442695, %v4764_v59  ;;  %v4929_v18 = vrot.slane %v8867_v11, 7  ;;  %v4930_v33 = vrot.slane %v8871_v61, 7 }
 0x9a8   :  { %v7026_v25 = vpop.eup %7025  ;;  %v4818_v43 = vadd.f32 1.0, %v7024_v46  ;;  %7043 = vrcp.f32 %v4814_v58  ;;  %v4931_v40 = vrot.slane %v8875_v6, 7  ;;  %v4932_v37 = vrot.slane %v8879_v52, 7 }
 0x9a9   :  { %v7028_v9 = vpop.eup %7027  ;;  %v4820_v19 = vadd.f32 1.0, %v7026_v25  ;;  %7045 = vrcp.f32 %v4816_v23 }
 0x9aa   :  { %v7030_v29 = vpop.eup %7029  ;;  %v4822_v35 = vadd.f32 1.0, %v7028_v9  ;;  %7047 = vrcp.f32 %v4818_v43 }
 0x9ab   :  { %v7032_v55 = vpop.eup %7031  ;;  %v4824_v20 = vadd.f32 1.0, %v7030_v29  ;;  %7049 = vrcp.f32 %v4820_v19 }
 0x9ac   :  { %v7034_v1 = vpop.eup %7033  ;;  %v4826_v30 = vadd.f32 1.0, %v7032_v55  ;;  %7051 = vrcp.f32 %v4822_v35 }
 0x9ad   :  { %v4828_v4 = vadd.f32 1.0, %v7034_v1  ;;  %7053 = vrcp.f32 %v4824_v20  ;;  %v7036_v16 = vpop.eup %7035 }
 0x9ae   :  { %7055 = vrcp.f32 %v4826_v30  ;;  %v7038_v24 = vpop.eup %7037  ;;  %v4893_v60 = vadd.f32 1.0, %v7036_v16 }
 0x9af   :  { %7057 = vrcp.f32 %v4828_v4  ;;  %v7040_v21 = vpop.eup %7039  ;;  %v4894_v53 = vadd.f32 1.0, %v7038_v24 }
 0x9b0   :  { %7059 = vpow2.f32 %v5421_v3  ;;  %v7042_v62 = vpop.eup %7041  ;;  %v4895_v39 = vadd.f32 1.0, %v7040_v21 }
 0x9b1   :  { %7061 = vpow2.f32 %v5422_v45  ;;  %v4896_v2 = vadd.f32 1.0, %v7042_v62 }
 0x9b2   :  { %v7044_v27 = vpop.eup %7043  ;;  %7063 = vpow2.f32 %v5423_v22 }
 0x9b3   :  { %v7046_v54 = vpop.eup %7045  ;;  %v4941_v28 = vmul.f32 %v7044_v27, %v4925_v48  ;;  %7065 = vpow2.f32 %v5424_v8 }
 0x9b4   :  { %v7048_v5 = vpop.eup %7047  ;;  %v4942_v12 = vmul.f32 %v7046_v54, %v4926_v42  ;;  %7067 = vrcp.f32 %v4893_v60 }
 0x9b5   :  { %v7050_v63 = vpop.eup %7049  ;;  %v4943_v44 = vmul.f32 %v7048_v5, %v4927_v47  ;;  %v4957_v50 = vadd.f32 %v8978_v13, %v4941_v28  ;;  %7069 = vrcp.f32 %v4894_v53 }
 0x9b6   :  { %v7052_v10 = vpop.eup %7051  ;;  %v4944_v31 = vmul.f32 %v7050_v63, %v4928_v57  ;;  %v4958_v51 = vadd.f32 %v8982_v15, %v4942_v12  ;;  %7071 = vrcp.f32 %v4895_v39 }
 0x9b7   :  { %v7054_v0 = vpop.eup %7053  ;;  %v4945_v11 = vmul.f32 %v7052_v10, %v4929_v18  ;;  %v4959_v61 = vadd.f32 %v8986_v38, %v4943_v44  ;;  %7073 = vtanh.f32 %v4957_v50  ;;  %5087 = vst [vmem:[#allocation3 - $0x7] sm:$0x80] %v4957_v50 }
 0x9b8   :  { %v7056_v14 = vpop.eup %7055  ;;  %v4946_v6 = vmul.f32 %v7054_v0, %v4930_v33  ;;  %v4960_v41 = vadd.f32 %v8991_v34, %v4944_v31  ;;  %7075 = vtanh.f32 %v4958_v51  ;;  %v5072_v13 = vrot.slane %v4958_v51, 7 }
 0x9b9   :  { %v7058_v58 = vpop.eup %7057  ;;  %v4947_v46 = vmul.f32 %v7056_v14, %v4931_v40  ;;  %v4961_v52 = vadd.f32 %v8995_v26, %v4945_v11  ;;  %7077 = vtanh.f32 %v4959_v61  ;;  %v5073_v15 = vrot.slane %v4959_v61, 6 }
 0x9ba   :  { %v7060_v23 = vpop.eup %7059  ;;  %v4948_v25 = vmul.f32 %v7058_v58, %v4932_v37  ;;  %v4962_v43 = vadd.f32 %v8998_v56, %v4946_v6  ;;  %7079 = vtanh.f32 %v4960_v41  ;;  %v5075_v38 = vrot.slane %v4960_v41, 5 }
 0x9bb   :  { %v7062_v36 = vpop.eup %7061  ;;  %v4963_v9 = vadd.f32 %v9000_v7, %v4947_v46  ;;  %7081 = vtanh.f32 %v4961_v52  ;;  %v5074_v34 = vsel %vm1047_vm0, %v5073_v15, %v5072_v13  ;;  %v5077_v19 = vrot.slane %v4961_v52, 4 }
 0x9bc   :  { %v7064_v32 = vpop.eup %7063  ;;  %v4964_v29 = vadd.f32 %v9002_v49, %v4948_v25  ;;  %7083 = vtanh.f32 %v4962_v43  ;;  %v5076_v26 = vsel %vm1050_vm1, %v5075_v38, %v5074_v34  ;;  %v5079_v35 = vrot.slane %v4962_v43, 3 }
 0x9bd   :  { %v7066_v17 = vpop.eup %7065  ;;  %7085 = vtanh.f32 %v4963_v9  ;;  %v5078_v56 = vsel %vm1053_vm2, %v5077_v19, %v5076_v26  ;;  %v5081_v55 = vrot.slane %v4963_v9, 2  ;;  %v4897_v20 = vadd.f32 1.0, %v7060_v23 }
 0x9be   :  { %v7068_v59 = vpop.eup %7067  ;;  %7087 = vtanh.f32 %v4964_v29  ;;  %v5080_v7 = vsel %vm1056_vm3, %v5079_v35, %v5078_v56  ;;  %v5083_v1 = vrot.slane %v4964_v29, 1  ;;  %v4898_v30 = vadd.f32 1.0, %v7062_v36 }
 0x9bf   :  { %v7070_v3 = vpop.eup %7069  ;;  %v4899_v4 = vadd.f32 1.0, %v7064_v32  ;;  %v4900_v45 = vadd.f32 1.0, %v7066_v17  ;;  %7089 = vrcp.f32 %v4896_v2  ;;  %v5082_v49 = vsel %vm1059_vm4, %v5081_v55, %v5080_v7 }
 0x9c0   :  { %v7072_v16 = vpop.eup %7071  ;;  %7091 = vrcp.f32 %v4897_v20  ;;  %v5084_v22 = vsel %vm1062_vm5, %v5083_v1, %v5082_v49 }
 0x9c1   :  { %v7074_v24 = vpop.eup %7073  ;;  %7093 = vrcp.f32 %v4898_v30  ;;  %5088 = vst [vmem:[#allocation3 + $0x1] sm:$0x7f] %v5084_v22 }
 0x9c2   :  { %v7076_v8 = vpop.eup %7075  ;;  %7095 = vrcp.f32 %v4899_v4  ;;  %v4973_v21 = vmul.f32 %v7074_v24, %v7068_v59 }
 0x9c3   :  { %v7078_v60 = vpop.eup %7077  ;;  %7097 = vrcp.f32 %v4900_v45  ;;  %v4974_v62 = vmul.f32 %v7076_v8, %v7070_v3 }
 0x9c4   :  { %v7080_v48 = vpop.eup %7079  ;;  %v4975_v53 = vmul.f32 %v7078_v60, %v7072_v16  ;;  %v5489_v27 = vpack.c.bf16 %v4973_v21, %v4973_v21  ;;  %5062 = vst [vmem:[#allocation2 - $0x7] sm:$0x80] %v4973_v21 }
 0x9c5   :  { %v7082_v42 = vpop.eup %7081  ;;  %v5490_v39 = vpack.c.bf16 %v4974_v62, %v4974_v62  ;;  %v5047_v54 = vrot.slane %v4974_v62, 7 }
 0x9c6   :  { %v7084_v47 = vpop.eup %7083  ;;  %v5491_v57 = vpack.c.bf16 %v4975_v53, %v4975_v53  ;;  %v5013_v28 = vunpack.c.l.b16 %v5489_v27  ;;  %v5048_v5 = vrot.slane %v4975_v53, 6 }
 0x9c7   :  { %v7086_v18 = vpop.eup %7085  ;;  %v5014_v33 = vunpack.c.l.b16 %v5490_v39 }
 0x9c8   :  { %v7088_v12 = vpop.eup %7087  ;;  %v5015_v63 = vunpack.c.l.b16 %v5491_v57  ;;  %v5021_v40 = vrot.slane %v5013_v28, 7  ;;  %v5049_v44 = vsel %vm1047_vm0, %v5048_v5, %v5047_v54  ;;  %v5094_v50 = vld [vmem:[#allocation3] sm:$0xff] }
 0x9c9   :  { %v7090_v10 = vpop.eup %7089  ;;  %v5022_v37 = vrot.slane %v5014_v33, 6  ;;  %5095 = vst [vmem:[#allocation13] sm:$0xff] %v5094_v50 }
 0x9ca   :  { %v7092_v31 = vpop.eup %7091  ;;  %v4976_v51 = vmul.f32 %v7090_v10, %v7080_v48  ;;  %v5024_v0 = vrot.slane %v5015_v63, 5 }
 0x9cb   :  { %v7094_v11 = vpop.eup %7093  ;;  %v4977_v61 = vmul.f32 %v7092_v31, %v7082_v42  ;;  %v5023_v2 = vsel %vm1047_vm0, %v5022_v37, %v5021_v40 }
 0x9cc   :  { %v7096_v14 = vpop.eup %7095  ;;  %v4978_v6 = vmul.f32 %v7094_v11, %v7084_v47  ;;  %v5492_v41 = vpack.c.bf16 %v4976_v51, %v4976_v51  ;;  %v5050_v13 = vrot.slane %v4976_v51, 5  ;;  %v5025_v58 = vsel %vm1050_vm1, %v5024_v0, %v5023_v2 }
 0x9cd   :  { %v7098_v46 = vpop.eup %7097  ;;  %v4979_v52 = vmul.f32 %v7096_v14, %v7086_v18  ;;  %v5493_v15 = vpack.c.bf16 %v4977_v61, %v4977_v61  ;;  %v5052_v23 = vrot.slane %v4977_v61, 4 }
 0x9ce   :  { %v4980_v25 = vmul.f32 %v7098_v46, %v7088_v12  ;;  %v5016_v43 = vunpack.c.l.b16 %v5492_v41  ;;  %v5051_v38 = vsel %vm1050_vm1, %v5050_v13, %v5049_v44  ;;  %v5054_v36 = vrot.slane %v4978_v6, 3 }
 0x9cf   :  { %v5017_v9 = vunpack.c.l.b16 %v5493_v15  ;;  %v5053_v34 = vsel %vm1053_vm2, %v5052_v23, %v5051_v38  ;;  %v5056_v19 = vrot.slane %v4979_v52, 2  ;;  %v5494_v32 = vpack.c.bf16 %v4978_v6, %v4978_v6 }
 0x9d0   :  { %v5026_v29 = vrot.slane %v5016_v43, 4  ;;  %v5055_v26 = vsel %vm1056_vm3, %v5054_v36, %v5053_v34  ;;  %v5058_v35 = vrot.slane %v4980_v25, 1  ;;  %v5495_v17 = vpack.c.bf16 %v4979_v52, %v4979_v52 }
 0x9d1   :  { %v5028_v56 = vrot.slane %v5017_v9, 3  ;;  %v5057_v55 = vsel %vm1059_vm4, %v5056_v19, %v5055_v26  ;;  %v5496_v20 = vpack.c.bf16 %v4980_v25, %v4980_v25  ;;  %v5018_v59 = vunpack.c.l.b16 %v5494_v32 }
 0x9d2   :  { %v5059_v7 = vsel %vm1062_vm5, %v5058_v35, %v5057_v55  ;;  %v5019_v1 = vunpack.c.l.b16 %v5495_v17  ;;  %v5027_v30 = vsel %vm1053_vm2, %v5026_v29, %v5025_v58 }
 0x9d3   :  { %5063 = vst [vmem:[#allocation2 + $0x1] sm:$0x7f] %v5059_v7  ;;  %v5029_v3 = vsel %vm1056_vm3, %v5028_v56, %v5027_v30  ;;  %v5030_v4 = vrot.slane %v5018_v59, 2  ;;  %v5020_v49 = vunpack.c.l.b16 %v5496_v20 }
 0x9d4   :  { %v5032_v45 = vrot.slane %v5019_v1, 1 }
 0x9d5   :  { %v5031_v16 = vsel %vm1059_vm4, %v5030_v4, %v5029_v3 }
 0x9d6   :  { %v5033_v22 = vsel %vm1062_vm5, %v5032_v45, %v5031_v16 }
 0x9d7   :  { %v5034_v24 = vsel %vm1065_vm6, %v5020_v49, %v5033_v22 }
 0x9d8   :  { %v5035_v8 = vpack.c.b16 %v5034_v24, %v5034_v24 }
 0x9da   :  { %v5092_v21 = vld [vmem:[#allocation2] sm:$0xff]  ;;  %5038 = vst [vmem:[#allocation10 + $0x1c] sm:$0xf] %v5035_v8 }
 0x9db   :  { %5093 = vst [vmem:[#allocation11] sm:$0xff] %v5092_v21 }
 0x9dc   :  { %7180 = shalt.err (!%p7177_p0)
}
 0x9dd   :  { %s7181_s23 = scalar_lea.hbm %s9100_s4, 512 }
 0x9de   :  { %p7182_p1 = scmp.ne.s32.totalorder %s9100_s4, %s7181_s23  ;;  %p7185_p2 = scmp.lt.u32.totalorder %s7181_s23, %s9100_s4 }
 0x9e0   :  { %p7187_p3 = pnand %p7185_p2, %p7182_p1 }
 0x9e2   :  { %7190 = shalt.err (!%p7187_p3)
}
 0x9e3   :  { %5107 = dma.vmem_to_hbm [thread:$0]  %s5102_s14, 512, %s9100_s4, [#allocation6], %s7247_s1, %s7247_s1, %s7248_s21  }
 0x9e4   :  { %s7191_s30 = scalar_lea.vmem %s9043_s16, 128  ;;  %p7196_p5 = scmp.lt.s32.totalorder %s9043_s16, %s9043_s16 }
 0x9e5   :  { %p7192_p4 = scmp.ne.s32.totalorder %s9043_s16, %s7191_s30  ;;  %p7197_p6 = scmp.lt.s32.totalorder %s7191_s30, %s7191_s30 }
 0x9e7   :  { %p7198_p7 = por %p7197_p6, %p7196_p5 }
 0x9e9   :  { %p7199_p8 = pnand %p7198_p7, %p7192_p4 }
 0x9eb   :  { %7202 = shalt.err (!%p7199_p8)
}
 0x9ec   :  { %s7203_s9 = scalar_lea.hbm %s9101_s5, 128 }
 0x9ed   :  { %p7204_p9 = scmp.ne.s32.totalorder %s9101_s5, %s7203_s9  ;;  %p7207_p10 = scmp.lt.u32.totalorder %s7203_s9, %s9101_s5 }
 0x9ef   :  { %p7209_p11 = pnand %p7207_p10, %p7204_p9 }
 0x9f1   :  { %7212 = shalt.err (!%p7209_p11)
}
 0x9f2   :  { %5117 = dma.vmem_to_hbm [thread:$0]  %s9043_s16, 128, %s9101_s5, [#allocation12]  }
 0x9f3   :  { %s7213_s21 = scalar_lea.vmem %s9045_s18, 128  ;;  %p7218_p13 = scmp.lt.s32.totalorder %s9045_s18, %s9045_s18 }
 0x9f4   :  { %p7214_p12 = scmp.ne.s32.totalorder %s9045_s18, %s7213_s21  ;;  %p7219_p0 = scmp.lt.s32.totalorder %s7213_s21, %s7213_s21 }
 0x9f6   :  { %p7220_p1 = por %p7219_p0, %p7218_p13 }
 0x9f8   :  { %p7221_p2 = pnand %p7220_p1, %p7214_p12 }
 0x9fa   :  { %7224 = shalt.err (!%p7221_p2)
}
 0x9fb   :  { %s7225_s3 = scalar_lea.hbm %s9102_s6, 128 }
 0x9fc   :  { %p7226_p3 = scmp.ne.s32.totalorder %s9102_s6, %s7225_s3  ;;  %p7229_p4 = scmp.lt.u32.totalorder %s7225_s3, %s9102_s6 }
 0x9fe   :  { %p7231_p5 = pnand %p7229_p4, %p7226_p3 }
 0xa00   :  { %7234 = shalt.err (!%p7231_p5)
}
 0xa01   :  { %5127 = dma.vmem_to_hbm [thread:$0]  %s9045_s18, 128, %s9102_s6, [#allocation12]  }
 0xa02   :  { %7239 = dma.done.wait [#allocation6], 512  }
 0xa03   :  { %7240 = vsyncadd [#allocation6], 4294966784 }
 0xa04   :  { %7241 = dma.done.wait [#allocation12], 256  }
 0xa05   :  { %7242 = vsyncadd [#allocation12], 4294967040 }
 0xa06   :  { %5137 = vsyncpa [#allocation5], 1 }
 0xa07   :  { %5138 = vsyncpa [#allocation8], 1 }
 0xa08   :  { %5139 = vsyncpa [#allocation6], 1 }
 0xa09   :  { %5140 = vsyncpa [#allocation12], 1 }

</bundles_post_ra>
